<compile_context>
chip_gen: v7x
topology: tpu7x:2x2x1
jax: 0.10.0
libtpu: 0.0.40
codegen_flags: <defaults>
</compile_context>

<pallas_src>
import functools

import jax
import jax.numpy as jnp
from jax import lax
from jax.experimental import pallas as pl
from jax.experimental.pallas import tpu as pltpu


# ----------------------------- fused Pallas kernel -----------------------------

def fused_horizon_lstm_kernel(
        x_ref, fcw_ref, fcb_ref, scale_ref, shift_ref,
        wih0_ref, whh0_ref, b0_ref,
        wih1_ref, whh1_ref, b1_ref,
        predw_ref, predb_ref,
        out_ref,
        fc_ref, l0_ref, l1_ref, gx_ref,
        *, S, B, H):
    """Whole HorizonLSTMEmbedder forward, resident in VMEM.

    x_ref:    (S*B, Din)  time-major rows (row = t*B + b)
    fcw_ref:  (Din, H)    fc weight (pre-transposed);  fcb/scale/shift: (1, H)
    wihL_ref: (DinL, 8H)  [fwd i,f,g,o | rev i,f,g,o] input weights for layer L
    whhL_ref: (2H, 8H)    block-diagonal recurrent weights (fwd block | rev block)
    bL_ref:   (1, 8H)     (bih+bhh) per direction
    predw_ref:(2H, Dout)  predictor weight (pre-transposed); predb_ref: (1, Dout)
    out_ref:  (S*B, Dout) time-major rows
    scratch:  fc_ref (S*B, H), l0_ref/l1_ref (S*B, 2H), gx_ref (S*B, 8H)
    """
    H4 = 4 * H

    # ---- fc: Linear + BatchNorm1d(eval, folded affine) + ReLU ----
    # TODO(synk): nn.Dropout(0.2) is stochastic in train mode; identity in eval.
    h = jnp.dot(x_ref[...], fcw_ref[...], preferred_element_type=jnp.float32)
    h = (h + fcb_ref[...]) * scale_ref[...] + shift_ref[...]
    fc_ref[...] = jnp.maximum(h, 0.0)

    def bilstm(in_ref, wih_ref, whh_ref, b_ref, out_layer_ref):
        # Hoisted input projection for BOTH directions in one matmul:
        # cols [0:4H] = forward gates, cols [4H:8H] = reverse gates.
        gx_ref[...] = (jnp.dot(in_ref[...], wih_ref[...],
                               preferred_element_type=jnp.float32) + b_ref[...])

        whh = whh_ref[...]                              # (2H, 8H) block-diagonal
        h_cat = jnp.zeros((B, 2 * H), jnp.float32)      # [h_fwd | h_rev]
        c_f = jnp.zeros((B, H), jnp.float32)
        c_r = jnp.zeros((B, H), jnp.float32)

        # Statically unrolled recurrence (S is small and static).
        for t in range(S):
            # One recurrent matmul covering both directions.
            gh = jnp.dot(h_cat, whh, preferred_element_type=jnp.float32)  # (B, 8H)
            # fwd consumes timestep t; rev consumes timestep S-1-t (in-kernel flip).
            gates_f = gh[:, 0:H4] + gx_ref[t * B:(t + 1) * B, 0:H4]
            gates_r = gh[:, H4:2 * H4] + gx_ref[(S - 1 - t) * B:(S - t) * B, H4:2 * H4]

            # Full-vreg transcendentals (EUP slot), then slice i/f/g/o.
            sig_f = jax.nn.sigmoid(gates_f)
            sig_r = jax.nn.sigmoid(gates_r)
            tanh_f = jnp.tanh(gates_f)
            tanh_r = jnp.tanh(gates_r)

            c_f = sig_f[:, H:2 * H] * c_f + sig_f[:, 0:H] * tanh_f[:, 2 * H:3 * H]
            c_r = sig_r[:, H:2 * H] * c_r + sig_r[:, 0:H] * tanh_r[:, 2 * H:3 * H]
            h_f = sig_f[:, 3 * H:4 * H] * jnp.tanh(c_f)
            h_r = sig_r[:, 3 * H:4 * H] * jnp.tanh(c_r)
            h_cat = jnp.concatenate([h_f, h_r], axis=-1)

            # Bidirectional concat by writing disjoint lane ranges:
            # fwd output belongs to time t, rev output to time S-1-t.
            out_layer_ref[t * B:(t + 1) * B, 0:H] = h_f
            out_layer_ref[(S - 1 - t) * B:(S - t) * B, H:2 * H] = h_r

    # TODO(synk): nn.LSTM inter-layer dropout(0.2) is stochastic; identity in eval mode.
    bilstm(fc_ref, wih0_ref, whh0_ref, b0_ref, l0_ref)
    bilstm(l0_ref, wih1_ref, whh1_ref, b1_ref, l1_ref)

    # ---- predictor (only masked (<128-lane) store in the whole pipeline) ----
    out_ref[...] = (jnp.dot(l1_ref[...], predw_ref[...],
                            preferred_element_type=jnp.float32) + predb_ref[...])


# ----------------------------- model glue -----------------------------

def _pack_bilstm_weights(params, layer, H):
    """Pack per-direction PyTorch LSTM weights into fused kernel layout."""
    wf = params[f"lstm_wih_l{layer}_fwd"]     # (4H, Din)
    wr = params[f"lstm_wih_l{layer}_rev"]
    uf = params[f"lstm_whh_l{layer}_fwd"]     # (4H, H)
    ur = params[f"lstm_whh_l{layer}_rev"]
    bf = params[f"lstm_bih_l{layer}_fwd"] + params[f"lstm_bhh_l{layer}_fwd"]
    br = params[f"lstm_bih_l{layer}_rev"] + params[f"lstm_bhh_l{layer}_rev"]

    wih_cat = jnp.concatenate([wf.T, wr.T], axis=1)          # (Din, 8H)
    b_cat = jnp.concatenate([bf, br])[None, :]               # (1, 8H)
    whh_bd = jnp.zeros((2 * H, 8 * H), jnp.float32)          # block-diagonal
    whh_bd = whh_bd.at[0:H, 0:4 * H].set(uf.T)
    whh_bd = whh_bd.at[H:2 * H, 4 * H:8 * H].set(ur.T)
    return wih_cat, whh_bd, b_cat


def horizon_lstm_embedder_forward(params, x, num_segments):
    """x: (N, input_dim) with N = batch * num_segments. Returns (batch, num_segments, output_dim)."""
    H = params["hidden_dim"]
    Dout = params["output_dim"]
    N, Din = x.shape
    S = num_segments
    B = N // S

    # BatchNorm1d (eval, running stats) folded to affine.
    eps = 1e-5
    scale = params["bn_gamma"] / jnp.sqrt(params["bn_var"] + eps)
    shift = params["bn_beta"] - params["bn_mean"] * scale

    # Present rows time-major (row = t*B + b) so each timestep is a contiguous block.
    x_tm = jnp.transpose(x.reshape(B, S, Din), (1, 0, 2)).reshape(S * B, Din)

    wih0, whh0, b0 = _pack_bilstm_weights(params, 0, H)
    wih1, whh1, b1 = _pack_bilstm_weights(params, 1, H)

    kernel = functools.partial(fused_horizon_lstm_kernel, S=S, B=B, H=H)
    vmem_spec = pl.BlockSpec(memory_space=pltpu.MemorySpace.VMEM)

    out_tm = pl.pallas_call(
        kernel,
        out_shape=jax.ShapeDtypeStruct((S * B, Dout), jnp.float32),
        in_specs=[vmem_spec] * 13,
        out_specs=vmem_spec,
        scratch_shapes=[
            pltpu.VMEM((S * B, H), jnp.float32),        # fc output
            pltpu.VMEM((S * B, 2 * H), jnp.float32),    # layer-0 bidir output
            pltpu.VMEM((S * B, 2 * H), jnp.float32),    # layer-1 bidir output
            pltpu.VMEM((S * B, 8 * H), jnp.float32),    # hoisted gate projections
        ],
    )(x_tm,
      params["fc_w"].T, params["fc_b"][None, :], scale[None, :], shift[None, :],
      wih0, whh0, b0,
      wih1, whh1, b1,
      params["pred_w"].T, params["pred_b"][None, :])

    # back to (batch, num_segments, output_dim)
    return jnp.transpose(out_tm.reshape(S, B, Dout), (1, 0, 2))


def init_params(key, input_dim, hidden_dim, output_dim):
    H = hidden_dim
    params = {"hidden_dim": H, "output_dim": output_dim}

    def uni(k, shape, fan_in):
        lim = 1.0 / jnp.sqrt(jnp.float32(fan_in))
        return jax.random.uniform(k, shape, jnp.float32, -lim, lim)

    keys = iter(jax.random.split(key, 64))
    params["fc_w"] = uni(next(keys), (H, input_dim), input_dim)
    params["fc_b"] = uni(next(keys), (H,), input_dim)
    params["bn_gamma"] = 1.0 + 0.1 * jax.random.normal(next(keys), (H,), jnp.float32)
    params["bn_beta"] = 0.1 * jax.random.normal(next(keys), (H,), jnp.float32)
    params["bn_mean"] = 0.05 * jax.random.normal(next(keys), (H,), jnp.float32)
    params["bn_var"] = 1.0 + 0.1 * jax.random.uniform(next(keys), (H,), jnp.float32)
    for l in range(2):
        din = H if l == 0 else 2 * H
        for d in ("fwd", "rev"):
            params[f"lstm_wih_l{l}_{d}"] = uni(next(keys), (4 * H, din), H)
            params[f"lstm_whh_l{l}_{d}"] = uni(next(keys), (4 * H, H), H)
            params[f"lstm_bih_l{l}_{d}"] = uni(next(keys), (4 * H,), H)
            params[f"lstm_bhh_l{l}_{d}"] = uni(next(keys), (4 * H,), H)
    params["pred_w"] = uni(next(keys), (output_dim, 2 * H), 2 * H)
    params["pred_b"] = uni(next(keys), (output_dim,), 2 * H)
    return params


# ----------------------------- pure-JAX reference -----------------------------

def reference_forward(params, x, num_segments):
    H = params["hidden_dim"]
    N = x.shape[0]
    S = num_segments
    B = N // S
    eps = 1e-5
    h = x @ params["fc_w"].T + params["fc_b"]
    h = (h - params["bn_mean"]) / jnp.sqrt(params["bn_var"] + eps) * params["bn_gamma"] + params["bn_beta"]
    h = jnp.maximum(h, 0.0)
    layer_in = h.reshape(B, S, H)

    def lstm_dir(xin, wih, whh, bih, bhh):
        def step(carry, xt):
            hp, cp = carry
            g = xt @ wih.T + hp @ whh.T + bih + bhh
            i = jax.nn.sigmoid(g[:, 0:H])
            f = jax.nn.sigmoid(g[:, H:2 * H])
            gg = jnp.tanh(g[:, 2 * H:3 * H])
            o = jax.nn.sigmoid(g[:, 3 * H:4 * H])
            c = f * cp + i * gg
            hn = o * jnp.tanh(c)
            return (hn, c), hn
        x_tm = jnp.transpose(xin, (1, 0, 2))
        init = (jnp.zeros((B, H), jnp.float32), jnp.zeros((B, H), jnp.float32))
        _, out = lax.scan(step, init, x_tm)
        return jnp.transpose(out, (1, 0, 2))

    for l in range(2):
        outs = []
        for d in ("fwd", "rev"):
            wih = params[f"lstm_wih_l{l}_{d}"]
            whh = params[f"lstm_whh_l{l}_{d}"]
            bih = params[f"lstm_bih_l{l}_{d}"]
            bhh = params[f"lstm_bhh_l{l}_{d}"]
            xin = layer_in if d == "fwd" else layer_in[:, ::-1, :]
            o = lstm_dir(xin, wih, whh, bih, bhh)
            if d == "rev":
                o = o[:, ::-1, :]
            outs.append(o)
        layer_in = jnp.concatenate(outs, axis=-1)
    pred = layer_in.reshape(B * S, 2 * H) @ params["pred_w"].T + params["pred_b"]
    return pred.reshape(B, S, params["output_dim"])


# ----------------------------- main -----------------------------

if __name__ == "__main__":
    input_dim, hidden_dim, output_dim = 16, 32, 8
    batch, num_segments = 2, 8

    key = jax.random.PRNGKey(0)
    pkey, xkey = jax.random.split(key)
    params = init_params(pkey, input_dim, hidden_dim, output_dim)
    x = jax.random.normal(xkey, (batch * num_segments, input_dim), jnp.float32)

    out = horizon_lstm_embedder_forward(params, x, num_segments)
    out = jax.block_until_ready(out)

    ref = reference_forward(params, x, num_segments)
    assert out.shape == (batch, num_segments, output_dim), out.shape
    max_err = float(jnp.max(jnp.abs(out - ref)))
    assert max_err < 1e-3, f"max abs error {max_err}"
    print("KERNEL_OK")
</pallas_src>

<mosaic_0001>
module attributes {stable_mosaic.version = 11 : i64} {
  func.func @fused_horizon_lstm_kernel(%arg0: memref<16x16xf32, #tpu.memory_space<vmem>>, %arg1: memref<16x32xf32, #tpu.memory_space<vmem>>, %arg2: memref<1x32xf32, #tpu.memory_space<vmem>>, %arg3: memref<1x32xf32, #tpu.memory_space<vmem>>, %arg4: memref<1x32xf32, #tpu.memory_space<vmem>>, %arg5: memref<32x256xf32, #tpu.memory_space<vmem>>, %arg6: memref<64x256xf32, #tpu.memory_space<vmem>>, %arg7: memref<1x256xf32, #tpu.memory_space<vmem>>, %arg8: memref<64x256xf32, #tpu.memory_space<vmem>>, %arg9: memref<64x256xf32, #tpu.memory_space<vmem>>, %arg10: memref<1x256xf32, #tpu.memory_space<vmem>>, %arg11: memref<64x8xf32, #tpu.memory_space<vmem>>, %arg12: memref<1x8xf32, #tpu.memory_space<vmem>>, %arg13: memref<16x8xf32, #tpu.memory_space<vmem>>, %arg14: memref<16x32xf32, #tpu.memory_space<vmem>>, %arg15: memref<16x64xf32, #tpu.memory_space<vmem>>, %arg16: memref<16x64xf32, #tpu.memory_space<vmem>>, %arg17: memref<16x256xf32, #tpu.memory_space<vmem>>) attributes {dimension_semantics = [], scalar_prefetch = 0 : i64, scratch_operands = 4 : i64, tpu.core_type = #tpu.core_type<tc>} {
    %c0 = arith.constant 0 : index
    %c0_0 = arith.constant 0 : index
    %0 = vector.load %arg0[%c0, %c0_0] : memref<16x16xf32, #tpu.memory_space<vmem>>, vector<16x16xf32>
    %c0_1 = arith.constant 0 : index
    %c0_2 = arith.constant 0 : index
    %1 = vector.load %arg1[%c0_1, %c0_2] : memref<16x32xf32, #tpu.memory_space<vmem>>, vector<16x32xf32>
    %cst = arith.constant dense<0.000000e+00> : vector<16x32xf32>
    %2 = tpu.matmul %0, %1, %cst {dimension_numbers = #tpu.dot_dimension_numbers<[1], [0], [0], [1], [0, 0, 1, 1], [], []>} : vector<16x16xf32>, vector<16x32xf32>, vector<16x32xf32> -> vector<16x32xf32>
    %c0_3 = arith.constant 0 : index
    %c0_4 = arith.constant 0 : index
    %3 = vector.load %arg2[%c0_3, %c0_4] : memref<1x32xf32, #tpu.memory_space<vmem>>, vector<1x32xf32>
    %4 = vector.broadcast %3 : vector<1x32xf32> to vector<16x32xf32>
    %5 = arith.addf %2, %4 : vector<16x32xf32>
    %c0_5 = arith.constant 0 : index
    %c0_6 = arith.constant 0 : index
    %6 = vector.load %arg3[%c0_5, %c0_6] : memref<1x32xf32, #tpu.memory_space<vmem>>, vector<1x32xf32>
    %7 = vector.broadcast %6 : vector<1x32xf32> to vector<16x32xf32>
    %8 = arith.mulf %5, %7 : vector<16x32xf32>
    %c0_7 = arith.constant 0 : index
    %c0_8 = arith.constant 0 : index
    %9 = vector.load %arg4[%c0_7, %c0_8] : memref<1x32xf32, #tpu.memory_space<vmem>>, vector<1x32xf32>
    %10 = vector.broadcast %9 : vector<1x32xf32> to vector<16x32xf32>
    %11 = arith.addf %8, %10 : vector<16x32xf32>
    %cst_9 = arith.constant 0.000000e+00 : f32
    %12 = vector.broadcast %cst_9 : f32 to vector<16x32xf32>
    %13 = arith.maximumf %11, %12 : vector<16x32xf32>
    %c0_10 = arith.constant 0 : index
    %c0_11 = arith.constant 0 : index
    %14 = vector.load %arg14[%c0_10, %c0_11] : memref<16x32xf32, #tpu.memory_space<vmem>>, vector<16x32xf32>
    tpu.vector_store %arg14[%c0_10, %c0_11], %13 {strides = array<i32>} : memref<16x32xf32, #tpu.memory_space<vmem>>, vector<16x32xf32>,
    %c0_12 = arith.constant 0 : index
    %c0_13 = arith.constant 0 : index
    %15 = vector.load %arg14[%c0_12, %c0_13] : memref<16x32xf32, #tpu.memory_space<vmem>>, vector<16x32xf32>
    %c0_14 = arith.constant 0 : index
    %c0_15 = arith.constant 0 : index
    %16 = vector.load %arg5[%c0_14, %c0_15] : memref<32x256xf32, #tpu.memory_space<vmem>>, vector<32x256xf32>
    %cst_16 = arith.constant dense<0.000000e+00> : vector<16x256xf32>
    %17 = tpu.matmul %15, %16, %cst_16 {dimension_numbers = #tpu.dot_dimension_numbers<[1], [0], [0], [1], [0, 0, 1, 1], [], []>} : vector<16x32xf32>, vector<32x256xf32>, vector<16x256xf32> -> vector<16x256xf32>
    %c0_17 = arith.constant 0 : index
    %c0_18 = arith.constant 0 : index
    %18 = vector.load %arg7[%c0_17, %c0_18] : memref<1x256xf32, #tpu.memory_space<vmem>>, vector<1x256xf32>
    %19 = vector.broadcast %18 : vector<1x256xf32> to vector<16x256xf32>
    %20 = arith.addf %17, %19 : vector<16x256xf32>
    %c0_19 = arith.constant 0 : index
    %c0_20 = arith.constant 0 : index
    %21 = vector.load %arg17[%c0_19, %c0_20] : memref<16x256xf32, #tpu.memory_space<vmem>>, vector<16x256xf32>
    tpu.vector_store %arg17[%c0_19, %c0_20], %20 {strides = array<i32>} : memref<16x256xf32, #tpu.memory_space<vmem>>, vector<16x256xf32>,
    %c0_21 = arith.constant 0 : index
    %c0_22 = arith.constant 0 : index
    %22 = vector.load %arg6[%c0_21, %c0_22] : memref<64x256xf32, #tpu.memory_space<vmem>>, vector<64x256xf32>
    %cst_23 = arith.constant 0.000000e+00 : f32
    %23 = vector.broadcast %cst_23 : f32 to vector<2x64xf32>
    %cst_24 = arith.constant 0.000000e+00 : f32
    %24 = vector.broadcast %cst_24 : f32 to vector<2x32xf32>
    %cst_25 = arith.constant 0.000000e+00 : f32
    %25 = vector.broadcast %cst_25 : f32 to vector<2x32xf32>
    %cst_26 = arith.constant dense<0.000000e+00> : vector<2x256xf32>
    %26 = tpu.matmul %23, %22, %cst_26 {dimension_numbers = #tpu.dot_dimension_numbers<[1], [0], [0], [1], [0, 0, 1, 1], [], []>} : vector<2x64xf32>, vector<64x256xf32>, vector<2x256xf32> -> vector<2x256xf32>
    %27 = vector.extract_strided_slice %26 {offsets = [0, 0], sizes = [2, 128], strides = [1, 1]} : vector<2x256xf32> to vector<2x128xf32>
    %c0_27 = arith.constant 0 : index
    %c0_28 = arith.constant 0 : index
    %28 = vector.load %arg17[%c0_27, %c0_28] : memref<16x256xf32, #tpu.memory_space<vmem>>, vector<2x128xf32>
    %29 = arith.addf %27, %28 : vector<2x128xf32>
    %30 = vector.extract_strided_slice %26 {offsets = [0, 128], sizes = [2, 128], strides = [1, 1]} : vector<2x256xf32> to vector<2x128xf32>
    %c14 = arith.constant 14 : index
    %c128 = arith.constant 128 : index
    %31 = vector.load %arg17[%c14, %c128] : memref<16x256xf32, #tpu.memory_space<vmem>>, vector<2x128xf32>
    %32 = arith.addf %30, %31 : vector<2x128xf32>
    %33 = arith.negf %29 : vector<2x128xf32>
    %34 = math.exp %33 : vector<2x128xf32>
    %cst_29 = arith.constant 1.000000e+00 : f32
    %35 = vector.broadcast %cst_29 : f32 to vector<2x128xf32>
    %36 = arith.addf %35, %34 : vector<2x128xf32>
    %37 = arith.divf %35, %36 : vector<2x128xf32>
    %38 = arith.negf %32 : vector<2x128xf32>
    %39 = math.exp %38 : vector<2x128xf32>
    %cst_30 = arith.constant 1.000000e+00 : f32
    %40 = vector.broadcast %cst_30 : f32 to vector<2x128xf32>
    %41 = arith.addf %40, %39 : vector<2x128xf32>
    %42 = arith.divf %40, %41 : vector<2x128xf32>
    %43 = math.tanh %29 : vector<2x128xf32>
    %44 = math.tanh %32 : vector<2x128xf32>
    %45 = vector.extract_strided_slice %37 {offsets = [0, 32], sizes = [2, 32], strides = [1, 1]} : vector<2x128xf32> to vector<2x32xf32>
    %46 = arith.mulf %45, %24 : vector<2x32xf32>
    %47 = vector.extract_strided_slice %37 {offsets = [0, 0], sizes = [2, 32], strides = [1, 1]} : vector<2x128xf32> to vector<2x32xf32>
    %48 = vector.extract_strided_slice %43 {offsets = [0, 64], sizes = [2, 32], strides = [1, 1]} : vector<2x128xf32> to vector<2x32xf32>
    %49 = arith.mulf %47, %48 : vector<2x32xf32>
    %50 = arith.addf %46, %49 : vector<2x32xf32>
    %51 = vector.extract_strided_slice %42 {offsets = [0, 32], sizes = [2, 32], strides = [1, 1]} : vector<2x128xf32> to vector<2x32xf32>
    %52 = arith.mulf %51, %25 : vector<2x32xf32>
    %53 = vector.extract_strided_slice %42 {offsets = [0, 0], sizes = [2, 32], strides = [1, 1]} : vector<2x128xf32> to vector<2x32xf32>
    %54 = vector.extract_strided_slice %44 {offsets = [0, 64], sizes = [2, 32], strides = [1, 1]} : vector<2x128xf32> to vector<2x32xf32>
    %55 = arith.mulf %53, %54 : vector<2x32xf32>
    %56 = arith.addf %52, %55 : vector<2x32xf32>
    %57 = vector.extract_strided_slice %37 {offsets = [0, 96], sizes = [2, 32], strides = [1, 1]} : vector<2x128xf32> to vector<2x32xf32>
    %58 = math.tanh %50 : vector<2x32xf32>
    %59 = arith.mulf %57, %58 : vector<2x32xf32>
    %60 = vector.extract_strided_slice %42 {offsets = [0, 96], sizes = [2, 32], strides = [1, 1]} : vector<2x128xf32> to vector<2x32xf32>
    %61 = math.tanh %56 : vector<2x32xf32>
    %62 = arith.mulf %60, %61 : vector<2x32xf32>
    %63 = tpu.concatenate %59, %62 in 1 : vector<2x32xf32>, vector<2x32xf32> -> vector<2x64xf32>
    %c0_31 = arith.constant 0 : index
    %c0_32 = arith.constant 0 : index
    %64 = vector.load %arg15[%c0_31, %c0_32] : memref<16x64xf32, #tpu.memory_space<vmem>>, vector<2x32xf32>
    tpu.vector_store %arg15[%c0_31, %c0_32], %59 {strides = array<i32>} : memref<16x64xf32, #tpu.memory_space<vmem>>, vector<2x32xf32>,
    %c14_33 = arith.constant 14 : index
    %c32 = arith.constant 32 : index
    %65 = vector.load %arg15[%c14_33, %c32] : memref<16x64xf32, #tpu.memory_space<vmem>>, vector<2x32xf32>
    tpu.vector_store %arg15[%c14_33, %c32], %62 {strides = array<i32>} : memref<16x64xf32, #tpu.memory_space<vmem>>, vector<2x32xf32>,
    %cst_34 = arith.constant dense<0.000000e+00> : vector<2x256xf32>
    %66 = tpu.matmul %63, %22, %cst_34 {dimension_numbers = #tpu.dot_dimension_numbers<[1], [0], [0], [1], [0, 0, 1, 1], [], []>} : vector<2x64xf32>, vector<64x256xf32>, vector<2x256xf32> -> vector<2x256xf32>
    %67 = vector.extract_strided_slice %66 {offsets = [0, 0], sizes = [2, 128], strides = [1, 1]} : vector<2x256xf32> to vector<2x128xf32>
    %c2 = arith.constant 2 : index
    %c0_35 = arith.constant 0 : index
    %68 = vector.load %arg17[%c2, %c0_35] : memref<16x256xf32, #tpu.memory_space<vmem>>, vector<2x128xf32>
    %69 = arith.addf %67, %68 : vector<2x128xf32>
    %70 = vector.extract_strided_slice %66 {offsets = [0, 128], sizes = [2, 128], strides = [1, 1]} : vector<2x256xf32> to vector<2x128xf32>
    %c12 = arith.constant 12 : index
    %c128_36 = arith.constant 128 : index
    %71 = vector.load %arg17[%c12, %c128_36] : memref<16x256xf32, #tpu.memory_space<vmem>>, vector<2x128xf32>
    %72 = arith.addf %70, %71 : vector<2x128xf32>
    %73 = arith.negf %69 : vector<2x128xf32>
    %74 = math.exp %73 : vector<2x128xf32>
    %cst_37 = arith.constant 1.000000e+00 : f32
    %75 = vector.broadcast %cst_37 : f32 to vector<2x128xf32>
    %76 = arith.addf %75, %74 : vector<2x128xf32>
    %77 = arith.divf %75, %76 : vector<2x128xf32>
    %78 = arith.negf %72 : vector<2x128xf32>
    %79 = math.exp %78 : vector<2x128xf32>
    %cst_38 = arith.constant 1.000000e+00 : f32
    %80 = vector.broadcast %cst_38 : f32 to vector<2x128xf32>
    %81 = arith.addf %80, %79 : vector<2x128xf32>
    %82 = arith.divf %80, %81 : vector<2x128xf32>
    %83 = math.tanh %69 : vector<2x128xf32>
    %84 = math.tanh %72 : vector<2x128xf32>
    %85 = vector.extract_strided_slice %77 {offsets = [0, 32], sizes = [2, 32], strides = [1, 1]} : vector<2x128xf32> to vector<2x32xf32>
    %86 = arith.mulf %85, %50 : vector<2x32xf32>
    %87 = vector.extract_strided_slice %77 {offsets = [0, 0], sizes = [2, 32], strides = [1, 1]} : vector<2x128xf32> to vector<2x32xf32>
    %88 = vector.extract_strided_slice %83 {offsets = [0, 64], sizes = [2, 32], strides = [1, 1]} : vector<2x128xf32> to vector<2x32xf32>
    %89 = arith.mulf %87, %88 : vector<2x32xf32>
    %90 = arith.addf %86, %89 : vector<2x32xf32>
    %91 = vector.extract_strided_slice %82 {offsets = [0, 32], sizes = [2, 32], strides = [1, 1]} : vector<2x128xf32> to vector<2x32xf32>
    %92 = arith.mulf %91, %56 : vector<2x32xf32>
    %93 = vector.extract_strided_slice %82 {offsets = [0, 0], sizes = [2, 32], strides = [1, 1]} : vector<2x128xf32> to vector<2x32xf32>
    %94 = vector.extract_strided_slice %84 {offsets = [0, 64], sizes = [2, 32], strides = [1, 1]} : vector<2x128xf32> to vector<2x32xf32>
    %95 = arith.mulf %93, %94 : vector<2x32xf32>
    %96 = arith.addf %92, %95 : vector<2x32xf32>
    %97 = vector.extract_strided_slice %77 {offsets = [0, 96], sizes = [2, 32], strides = [1, 1]} : vector<2x128xf32> to vector<2x32xf32>
    %98 = math.tanh %90 : vector<2x32xf32>
    %99 = arith.mulf %97, %98 : vector<2x32xf32>
    %100 = vector.extract_strided_slice %82 {offsets = [0, 96], sizes = [2, 32], strides = [1, 1]} : vector<2x128xf32> to vector<2x32xf32>
    %101 = math.tanh %96 : vector<2x32xf32>
    %102 = arith.mulf %100, %101 : vector<2x32xf32>
    %103 = tpu.concatenate %99, %102 in 1 : vector<2x32xf32>, vector<2x32xf32> -> vector<2x64xf32>
    %c2_39 = arith.constant 2 : index
    %c0_40 = arith.constant 0 : index
    %104 = vector.load %arg15[%c2_39, %c0_40] : memref<16x64xf32, #tpu.memory_space<vmem>>, vector<2x32xf32>
    tpu.vector_store %arg15[%c2_39, %c0_40], %99 {strides = array<i32>} : memref<16x64xf32, #tpu.memory_space<vmem>>, vector<2x32xf32>,
    %c12_41 = arith.constant 12 : index
    %c32_42 = arith.constant 32 : index
    %105 = vector.load %arg15[%c12_41, %c32_42] : memref<16x64xf32, #tpu.memory_space<vmem>>, vector<2x32xf32>
    tpu.vector_store %arg15[%c12_41, %c32_42], %102 {strides = array<i32>} : memref<16x64xf32, #tpu.memory_space<vmem>>, vector<2x32xf32>,
    %cst_43 = arith.constant dense<0.000000e+00> : vector<2x256xf32>
    %106 = tpu.matmul %103, %22, %cst_43 {dimension_numbers = #tpu.dot_dimension_numbers<[1], [0], [0], [1], [0, 0, 1, 1], [], []>} : vector<2x64xf32>, vector<64x256xf32>, vector<2x256xf32> -> vector<2x256xf32>
    %107 = vector.extract_strided_slice %106 {offsets = [0, 0], sizes = [2, 128], strides = [1, 1]} : vector<2x256xf32> to vector<2x128xf32>
    %c4 = arith.constant 4 : index
    %c0_44 = arith.constant 0 : index
    %108 = vector.load %arg17[%c4, %c0_44] : memref<16x256xf32, #tpu.memory_space<vmem>>, vector<2x128xf32>
    %109 = arith.addf %107, %108 : vector<2x128xf32>
    %110 = vector.extract_strided_slice %106 {offsets = [0, 128], sizes = [2, 128], strides = [1, 1]} : vector<2x256xf32> to vector<2x128xf32>
    %c10 = arith.constant 10 : index
    %c128_45 = arith.constant 128 : index
    %111 = vector.load %arg17[%c10, %c128_45] : memref<16x256xf32, #tpu.memory_space<vmem>>, vector<2x128xf32>
    %112 = arith.addf %110, %111 : vector<2x128xf32>
    %113 = arith.negf %109 : vector<2x128xf32>
    %114 = math.exp %113 : vector<2x128xf32>
    %cst_46 = arith.constant 1.000000e+00 : f32
    %115 = vector.broadcast %cst_46 : f32 to vector<2x128xf32>
    %116 = arith.addf %115, %114 : vector<2x128xf32>
    %117 = arith.divf %115, %116 : vector<2x128xf32>
    %118 = arith.negf %112 : vector<2x128xf32>
    %119 = math.exp %118 : vector<2x128xf32>
    %cst_47 = arith.constant 1.000000e+00 : f32
    %120 = vector.broadcast %cst_47 : f32 to vector<2x128xf32>
    %121 = arith.addf %120, %119 : vector<2x128xf32>
    %122 = arith.divf %120, %121 : vector<2x128xf32>
    %123 = math.tanh %109 : vector<2x128xf32>
    %124 = math.tanh %112 : vector<2x128xf32>
    %125 = vector.extract_strided_slice %117 {offsets = [0, 32], sizes = [2, 32], strides = [1, 1]} : vector<2x128xf32> to vector<2x32xf32>
    %126 = arith.mulf %125, %90 : vector<2x32xf32>
    %127 = vector.extract_strided_slice %117 {offsets = [0, 0], sizes = [2, 32], strides = [1, 1]} : vector<2x128xf32> to vector<2x32xf32>
    %128 = vector.extract_strided_slice %123 {offsets = [0, 64], sizes = [2, 32], strides = [1, 1]} : vector<2x128xf32> to vector<2x32xf32>
    %129 = arith.mulf %127, %128 : vector<2x32xf32>
    %130 = arith.addf %126, %129 : vector<2x32xf32>
    %131 = vector.extract_strided_slice %122 {offsets = [0, 32], sizes = [2, 32], strides = [1, 1]} : vector<2x128xf32> to vector<2x32xf32>
    %132 = arith.mulf %131, %96 : vector<2x32xf32>
    %133 = vector.extract_strided_slice %122 {offsets = [0, 0], sizes = [2, 32], strides = [1, 1]} : vector<2x128xf32> to vector<2x32xf32>
    %134 = vector.extract_strided_slice %124 {offsets = [0, 64], sizes = [2, 32], strides = [1, 1]} : vector<2x128xf32> to vector<2x32xf32>
    %135 = arith.mulf %133, %134 : vector<2x32xf32>
    %136 = arith.addf %132, %135 : vector<2x32xf32>
    %137 = vector.extract_strided_slice %117 {offsets = [0, 96], sizes = [2, 32], strides = [1, 1]} : vector<2x128xf32> to vector<2x32xf32>
    %138 = math.tanh %130 : vector<2x32xf32>
    %139 = arith.mulf %137, %138 : vector<2x32xf32>
    %140 = vector.extract_strided_slice %122 {offsets = [0, 96], sizes = [2, 32], strides = [1, 1]} : vector<2x128xf32> to vector<2x32xf32>
    %141 = math.tanh %136 : vector<2x32xf32>
    %142 = arith.mulf %140, %141 : vector<2x32xf32>
    %143 = tpu.concatenate %139, %142 in 1 : vector<2x32xf32>, vector<2x32xf32> -> vector<2x64xf32>
    %c4_48 = arith.constant 4 : index
    %c0_49 = arith.constant 0 : index
    %144 = vector.load %arg15[%c4_48, %c0_49] : memref<16x64xf32, #tpu.memory_space<vmem>>, vector<2x32xf32>
    tpu.vector_store %arg15[%c4_48, %c0_49], %139 {strides = array<i32>} : memref<16x64xf32, #tpu.memory_space<vmem>>, vector<2x32xf32>,
    %c10_50 = arith.constant 10 : index
    %c32_51 = arith.constant 32 : index
    %145 = vector.load %arg15[%c10_50, %c32_51] : memref<16x64xf32, #tpu.memory_space<vmem>>, vector<2x32xf32>
    tpu.vector_store %arg15[%c10_50, %c32_51], %142 {strides = array<i32>} : memref<16x64xf32, #tpu.memory_space<vmem>>, vector<2x32xf32>,
    %cst_52 = arith.constant dense<0.000000e+00> : vector<2x256xf32>
    %146 = tpu.matmul %143, %22, %cst_52 {dimension_numbers = #tpu.dot_dimension_numbers<[1], [0], [0], [1], [0, 0, 1, 1], [], []>} : vector<2x64xf32>, vector<64x256xf32>, vector<2x256xf32> -> vector<2x256xf32>
    %147 = vector.extract_strided_slice %146 {offsets = [0, 0], sizes = [2, 128], strides = [1, 1]} : vector<2x256xf32> to vector<2x128xf32>
    %c6 = arith.constant 6 : index
    %c0_53 = arith.constant 0 : index
    %148 = vector.load %arg17[%c6, %c0_53] : memref<16x256xf32, #tpu.memory_space<vmem>>, vector<2x128xf32>
    %149 = arith.addf %147, %148 : vector<2x128xf32>
    %150 = vector.extract_strided_slice %146 {offsets = [0, 128], sizes = [2, 128], strides = [1, 1]} : vector<2x256xf32> to vector<2x128xf32>
    %c8 = arith.constant 8 : index
    %c128_54 = arith.constant 128 : index
    %151 = vector.load %arg17[%c8, %c128_54] : memref<16x256xf32, #tpu.memory_space<vmem>>, vector<2x128xf32>
    %152 = arith.addf %150, %151 : vector<2x128xf32>
    %153 = arith.negf %149 : vector<2x128xf32>
    %154 = math.exp %153 : vector<2x128xf32>
    %cst_55 = arith.constant 1.000000e+00 : f32
    %155 = vector.broadcast %cst_55 : f32 to vector<2x128xf32>
    %156 = arith.addf %155, %154 : vector<2x128xf32>
    %157 = arith.divf %155, %156 : vector<2x128xf32>
    %158 = arith.negf %152 : vector<2x128xf32>
    %159 = math.exp %158 : vector<2x128xf32>
    %cst_56 = arith.constant 1.000000e+00 : f32
    %160 = vector.broadcast %cst_56 : f32 to vector<2x128xf32>
    %161 = arith.addf %160, %159 : vector<2x128xf32>
    %162 = arith.divf %160, %161 : vector<2x128xf32>
    %163 = math.tanh %149 : vector<2x128xf32>
    %164 = math.tanh %152 : vector<2x128xf32>
    %165 = vector.extract_strided_slice %157 {offsets = [0, 32], sizes = [2, 32], strides = [1, 1]} : vector<2x128xf32> to vector<2x32xf32>
    %166 = arith.mulf %165, %130 : vector<2x32xf32>
    %167 = vector.extract_strided_slice %157 {offsets = [0, 0], sizes = [2, 32], strides = [1, 1]} : vector<2x128xf32> to vector<2x32xf32>
    %168 = vector.extract_strided_slice %163 {offsets = [0, 64], sizes = [2, 32], strides = [1, 1]} : vector<2x128xf32> to vector<2x32xf32>
    %169 = arith.mulf %167, %168 : vector<2x32xf32>
    %170 = arith.addf %166, %169 : vector<2x32xf32>
    %171 = vector.extract_strided_slice %162 {offsets = [0, 32], sizes = [2, 32], strides = [1, 1]} : vector<2x128xf32> to vector<2x32xf32>
    %172 = arith.mulf %171, %136 : vector<2x32xf32>
    %173 = vector.extract_strided_slice %162 {offsets = [0, 0], sizes = [2, 32], strides = [1, 1]} : vector<2x128xf32> to vector<2x32xf32>
    %174 = vector.extract_strided_slice %164 {offsets = [0, 64], sizes = [2, 32], strides = [1, 1]} : vector<2x128xf32> to vector<2x32xf32>
    %175 = arith.mulf %173, %174 : vector<2x32xf32>
    %176 = arith.addf %172, %175 : vector<2x32xf32>
    %177 = vector.extract_strided_slice %157 {offsets = [0, 96], sizes = [2, 32], strides = [1, 1]} : vector<2x128xf32> to vector<2x32xf32>
    %178 = math.tanh %170 : vector<2x32xf32>
    %179 = arith.mulf %177, %178 : vector<2x32xf32>
    %180 = vector.extract_strided_slice %162 {offsets = [0, 96], sizes = [2, 32], strides = [1, 1]} : vector<2x128xf32> to vector<2x32xf32>
    %181 = math.tanh %176 : vector<2x32xf32>
    %182 = arith.mulf %180, %181 : vector<2x32xf32>
    %183 = tpu.concatenate %179, %182 in 1 : vector<2x32xf32>, vector<2x32xf32> -> vector<2x64xf32>
    %c6_57 = arith.constant 6 : index
    %c0_58 = arith.constant 0 : index
    %184 = vector.load %arg15[%c6_57, %c0_58] : memref<16x64xf32, #tpu.memory_space<vmem>>, vector<2x32xf32>
    tpu.vector_store %arg15[%c6_57, %c0_58], %179 {strides = array<i32>} : memref<16x64xf32, #tpu.memory_space<vmem>>, vector<2x32xf32>,
    %c8_59 = arith.constant 8 : index
    %c32_60 = arith.constant 32 : index
    %185 = vector.load %arg15[%c8_59, %c32_60] : memref<16x64xf32, #tpu.memory_space<vmem>>, vector<2x32xf32>
    tpu.vector_store %arg15[%c8_59, %c32_60], %182 {strides = array<i32>} : memref<16x64xf32, #tpu.memory_space<vmem>>, vector<2x32xf32>,
    %cst_61 = arith.constant dense<0.000000e+00> : vector<2x256xf32>
    %186 = tpu.matmul %183, %22, %cst_61 {dimension_numbers = #tpu.dot_dimension_numbers<[1], [0], [0], [1], [0, 0, 1, 1], [], []>} : vector<2x64xf32>, vector<64x256xf32>, vector<2x256xf32> -> vector<2x256xf32>
    %187 = vector.extract_strided_slice %186 {offsets = [0, 0], sizes = [2, 128], strides = [1, 1]} : vector<2x256xf32> to vector<2x128xf32>
    %c8_62 = arith.constant 8 : index
    %c0_63 = arith.constant 0 : index
    %188 = vector.load %arg17[%c8_62, %c0_63] : memref<16x256xf32, #tpu.memory_space<vmem>>, vector<2x128xf32>
    %189 = arith.addf %187, %188 : vector<2x128xf32>
    %190 = vector.extract_strided_slice %186 {offsets = [0, 128], sizes = [2, 128], strides = [1, 1]} : vector<2x256xf32> to vector<2x128xf32>
    %c6_64 = arith.constant 6 : index
    %c128_65 = arith.constant 128 : index
    %191 = vector.load %arg17[%c6_64, %c128_65] : memref<16x256xf32, #tpu.memory_space<vmem>>, vector<2x128xf32>
    %192 = arith.addf %190, %191 : vector<2x128xf32>
    %193 = arith.negf %189 : vector<2x128xf32>
    %194 = math.exp %193 : vector<2x128xf32>
    %cst_66 = arith.constant 1.000000e+00 : f32
    %195 = vector.broadcast %cst_66 : f32 to vector<2x128xf32>
    %196 = arith.addf %195, %194 : vector<2x128xf32>
    %197 = arith.divf %195, %196 : vector<2x128xf32>
    %198 = arith.negf %192 : vector<2x128xf32>
    %199 = math.exp %198 : vector<2x128xf32>
    %cst_67 = arith.constant 1.000000e+00 : f32
    %200 = vector.broadcast %cst_67 : f32 to vector<2x128xf32>
    %201 = arith.addf %200, %199 : vector<2x128xf32>
    %202 = arith.divf %200, %201 : vector<2x128xf32>
    %203 = math.tanh %189 : vector<2x128xf32>
    %204 = math.tanh %192 : vector<2x128xf32>
    %205 = vector.extract_strided_slice %197 {offsets = [0, 32], sizes = [2, 32], strides = [1, 1]} : vector<2x128xf32> to vector<2x32xf32>
    %206 = arith.mulf %205, %170 : vector<2x32xf32>
    %207 = vector.extract_strided_slice %197 {offsets = [0, 0], sizes = [2, 32], strides = [1, 1]} : vector<2x128xf32> to vector<2x32xf32>
    %208 = vector.extract_strided_slice %203 {offsets = [0, 64], sizes = [2, 32], strides = [1, 1]} : vector<2x128xf32> to vector<2x32xf32>
    %209 = arith.mulf %207, %208 : vector<2x32xf32>
    %210 = arith.addf %206, %209 : vector<2x32xf32>
    %211 = vector.extract_strided_slice %202 {offsets = [0, 32], sizes = [2, 32], strides = [1, 1]} : vector<2x128xf32> to vector<2x32xf32>
    %212 = arith.mulf %211, %176 : vector<2x32xf32>
    %213 = vector.extract_strided_slice %202 {offsets = [0, 0], sizes = [2, 32], strides = [1, 1]} : vector<2x128xf32> to vector<2x32xf32>
    %214 = vector.extract_strided_slice %204 {offsets = [0, 64], sizes = [2, 32], strides = [1, 1]} : vector<2x128xf32> to vector<2x32xf32>
    %215 = arith.mulf %213, %214 : vector<2x32xf32>
    %216 = arith.addf %212, %215 : vector<2x32xf32>
    %217 = vector.extract_strided_slice %197 {offsets = [0, 96], sizes = [2, 32], strides = [1, 1]} : vector<2x128xf32> to vector<2x32xf32>
    %218 = math.tanh %210 : vector<2x32xf32>
    %219 = arith.mulf %217, %218 : vector<2x32xf32>
    %220 = vector.extract_strided_slice %202 {offsets = [0, 96], sizes = [2, 32], strides = [1, 1]} : vector<2x128xf32> to vector<2x32xf32>
    %221 = math.tanh %216 : vector<2x32xf32>
    %222 = arith.mulf %220, %221 : vector<2x32xf32>
    %223 = tpu.concatenate %219, %222 in 1 : vector<2x32xf32>, vector<2x32xf32> -> vector<2x64xf32>
    %c8_68 = arith.constant 8 : index
    %c0_69 = arith.constant 0 : index
    %224 = vector.load %arg15[%c8_68, %c0_69] : memref<16x64xf32, #tpu.memory_space<vmem>>, vector<2x32xf32>
    tpu.vector_store %arg15[%c8_68, %c0_69], %219 {strides = array<i32>} : memref<16x64xf32, #tpu.memory_space<vmem>>, vector<2x32xf32>,
    %c6_70 = arith.constant 6 : index
    %c32_71 = arith.constant 32 : index
    %225 = vector.load %arg15[%c6_70, %c32_71] : memref<16x64xf32, #tpu.memory_space<vmem>>, vector<2x32xf32>
    tpu.vector_store %arg15[%c6_70, %c32_71], %222 {strides = array<i32>} : memref<16x64xf32, #tpu.memory_space<vmem>>, vector<2x32xf32>,
    %cst_72 = arith.constant dense<0.000000e+00> : vector<2x256xf32>
    %226 = tpu.matmul %223, %22, %cst_72 {dimension_numbers = #tpu.dot_dimension_numbers<[1], [0], [0], [1], [0, 0, 1, 1], [], []>} : vector<2x64xf32>, vector<64x256xf32>, vector<2x256xf32> -> vector<2x256xf32>
    %227 = vector.extract_strided_slice %226 {offsets = [0, 0], sizes = [2, 128], strides = [1, 1]} : vector<2x256xf32> to vector<2x128xf32>
    %c10_73 = arith.constant 10 : index
    %c0_74 = arith.constant 0 : index
    %228 = vector.load %arg17[%c10_73, %c0_74] : memref<16x256xf32, #tpu.memory_space<vmem>>, vector<2x128xf32>
    %229 = arith.addf %227, %228 : vector<2x128xf32>
    %230 = vector.extract_strided_slice %226 {offsets = [0, 128], sizes = [2, 128], strides = [1, 1]} : vector<2x256xf32> to vector<2x128xf32>
    %c4_75 = arith.constant 4 : index
    %c128_76 = arith.constant 128 : index
    %231 = vector.load %arg17[%c4_75, %c128_76] : memref<16x256xf32, #tpu.memory_space<vmem>>, vector<2x128xf32>
    %232 = arith.addf %230, %231 : vector<2x128xf32>
    %233 = arith.negf %229 : vector<2x128xf32>
    %234 = math.exp %233 : vector<2x128xf32>
    %cst_77 = arith.constant 1.000000e+00 : f32
    %235 = vector.broadcast %cst_77 : f32 to vector<2x128xf32>
    %236 = arith.addf %235, %234 : vector<2x128xf32>
    %237 = arith.divf %235, %236 : vector<2x128xf32>
    %238 = arith.negf %232 : vector<2x128xf32>
    %239 = math.exp %238 : vector<2x128xf32>
    %cst_78 = arith.constant 1.000000e+00 : f32
    %240 = vector.broadcast %cst_78 : f32 to vector<2x128xf32>
    %241 = arith.addf %240, %239 : vector<2x128xf32>
    %242 = arith.divf %240, %241 : vector<2x128xf32>
    %243 = math.tanh %229 : vector<2x128xf32>
    %244 = math.tanh %232 : vector<2x128xf32>
    %245 = vector.extract_strided_slice %237 {offsets = [0, 32], sizes = [2, 32], strides = [1, 1]} : vector<2x128xf32> to vector<2x32xf32>
    %246 = arith.mulf %245, %210 : vector<2x32xf32>
    %247 = vector.extract_strided_slice %237 {offsets = [0, 0], sizes = [2, 32], strides = [1, 1]} : vector<2x128xf32> to vector<2x32xf32>
    %248 = vector.extract_strided_slice %243 {offsets = [0, 64], sizes = [2, 32], strides = [1, 1]} : vector<2x128xf32> to vector<2x32xf32>
    %249 = arith.mulf %247, %248 : vector<2x32xf32>
    %250 = arith.addf %246, %249 : vector<2x32xf32>
    %251 = vector.extract_strided_slice %242 {offsets = [0, 32], sizes = [2, 32], strides = [1, 1]} : vector<2x128xf32> to vector<2x32xf32>
    %252 = arith.mulf %251, %216 : vector<2x32xf32>
    %253 = vector.extract_strided_slice %242 {offsets = [0, 0], sizes = [2, 32], strides = [1, 1]} : vector<2x128xf32> to vector<2x32xf32>
    %254 = vector.extract_strided_slice %244 {offsets = [0, 64], sizes = [2, 32], strides = [1, 1]} : vector<2x128xf32> to vector<2x32xf32>
    %255 = arith.mulf %253, %254 : vector<2x32xf32>
    %256 = arith.addf %252, %255 : vector<2x32xf32>
    %257 = vector.extract_strided_slice %237 {offsets = [0, 96], sizes = [2, 32], strides = [1, 1]} : vector<2x128xf32> to vector<2x32xf32>
    %258 = math.tanh %250 : vector<2x32xf32>
    %259 = arith.mulf %257, %258 : vector<2x32xf32>
    %260 = vector.extract_strided_slice %242 {offsets = [0, 96], sizes = [2, 32], strides = [1, 1]} : vector<2x128xf32> to vector<2x32xf32>
    %261 = math.tanh %256 : vector<2x32xf32>
    %262 = arith.mulf %260, %261 : vector<2x32xf32>
    %263 = tpu.concatenate %259, %262 in 1 : vector<2x32xf32>, vector<2x32xf32> -> vector<2x64xf32>
    %c10_79 = arith.constant 10 : index
    %c0_80 = arith.constant 0 : index
    %264 = vector.load %arg15[%c10_79, %c0_80] : memref<16x64xf32, #tpu.memory_space<vmem>>, vector<2x32xf32>
    tpu.vector_store %arg15[%c10_79, %c0_80], %259 {strides = array<i32>} : memref<16x64xf32, #tpu.memory_space<vmem>>, vector<2x32xf32>,
    %c4_81 = arith.constant 4 : index
    %c32_82 = arith.constant 32 : index
    %265 = vector.load %arg15[%c4_81, %c32_82] : memref<16x64xf32, #tpu.memory_space<vmem>>, vector<2x32xf32>
    tpu.vector_store %arg15[%c4_81, %c32_82], %262 {strides = array<i32>} : memref<16x64xf32, #tpu.memory_space<vmem>>, vector<2x32xf32>,
    %cst_83 = arith.constant dense<0.000000e+00> : vector<2x256xf32>
    %266 = tpu.matmul %263, %22, %cst_83 {dimension_numbers = #tpu.dot_dimension_numbers<[1], [0], [0], [1], [0, 0, 1, 1], [], []>} : vector<2x64xf32>, vector<64x256xf32>, vector<2x256xf32> -> vector<2x256xf32>
    %267 = vector.extract_strided_slice %266 {offsets = [0, 0], sizes = [2, 128], strides = [1, 1]} : vector<2x256xf32> to vector<2x128xf32>
    %c12_84 = arith.constant 12 : index
    %c0_85 = arith.constant 0 : index
    %268 = vector.load %arg17[%c12_84, %c0_85] : memref<16x256xf32, #tpu.memory_space<vmem>>, vector<2x128xf32>
    %269 = arith.addf %267, %268 : vector<2x128xf32>
    %270 = vector.extract_strided_slice %266 {offsets = [0, 128], sizes = [2, 128], strides = [1, 1]} : vector<2x256xf32> to vector<2x128xf32>
    %c2_86 = arith.constant 2 : index
    %c128_87 = arith.constant 128 : index
    %271 = vector.load %arg17[%c2_86, %c128_87] : memref<16x256xf32, #tpu.memory_space<vmem>>, vector<2x128xf32>
    %272 = arith.addf %270, %271 : vector<2x128xf32>
    %273 = arith.negf %269 : vector<2x128xf32>
    %274 = math.exp %273 : vector<2x128xf32>
    %cst_88 = arith.constant 1.000000e+00 : f32
    %275 = vector.broadcast %cst_88 : f32 to vector<2x128xf32>
    %276 = arith.addf %275, %274 : vector<2x128xf32>
    %277 = arith.divf %275, %276 : vector<2x128xf32>
    %278 = arith.negf %272 : vector<2x128xf32>
    %279 = math.exp %278 : vector<2x128xf32>
    %cst_89 = arith.constant 1.000000e+00 : f32
    %280 = vector.broadcast %cst_89 : f32 to vector<2x128xf32>
    %281 = arith.addf %280, %279 : vector<2x128xf32>
    %282 = arith.divf %280, %281 : vector<2x128xf32>
    %283 = math.tanh %269 : vector<2x128xf32>
    %284 = math.tanh %272 : vector<2x128xf32>
    %285 = vector.extract_strided_slice %277 {offsets = [0, 32], sizes = [2, 32], strides = [1, 1]} : vector<2x128xf32> to vector<2x32xf32>
    %286 = arith.mulf %285, %250 : vector<2x32xf32>
    %287 = vector.extract_strided_slice %277 {offsets = [0, 0], sizes = [2, 32], strides = [1, 1]} : vector<2x128xf32> to vector<2x32xf32>
    %288 = vector.extract_strided_slice %283 {offsets = [0, 64], sizes = [2, 32], strides = [1, 1]} : vector<2x128xf32> to vector<2x32xf32>
    %289 = arith.mulf %287, %288 : vector<2x32xf32>
    %290 = arith.addf %286, %289 : vector<2x32xf32>
    %291 = vector.extract_strided_slice %282 {offsets = [0, 32], sizes = [2, 32], strides = [1, 1]} : vector<2x128xf32> to vector<2x32xf32>
    %292 = arith.mulf %291, %256 : vector<2x32xf32>
    %293 = vector.extract_strided_slice %282 {offsets = [0, 0], sizes = [2, 32], strides = [1, 1]} : vector<2x128xf32> to vector<2x32xf32>
    %294 = vector.extract_strided_slice %284 {offsets = [0, 64], sizes = [2, 32], strides = [1, 1]} : vector<2x128xf32> to vector<2x32xf32>
    %295 = arith.mulf %293, %294 : vector<2x32xf32>
    %296 = arith.addf %292, %295 : vector<2x32xf32>
    %297 = vector.extract_strided_slice %277 {offsets = [0, 96], sizes = [2, 32], strides = [1, 1]} : vector<2x128xf32> to vector<2x32xf32>
    %298 = math.tanh %290 : vector<2x32xf32>
    %299 = arith.mulf %297, %298 : vector<2x32xf32>
    %300 = vector.extract_strided_slice %282 {offsets = [0, 96], sizes = [2, 32], strides = [1, 1]} : vector<2x128xf32> to vector<2x32xf32>
    %301 = math.tanh %296 : vector<2x32xf32>
    %302 = arith.mulf %300, %301 : vector<2x32xf32>
    %303 = tpu.concatenate %299, %302 in 1 : vector<2x32xf32>, vector<2x32xf32> -> vector<2x64xf32>
    %c12_90 = arith.constant 12 : index
    %c0_91 = arith.constant 0 : index
    %304 = vector.load %arg15[%c12_90, %c0_91] : memref<16x64xf32, #tpu.memory_space<vmem>>, vector<2x32xf32>
    tpu.vector_store %arg15[%c12_90, %c0_91], %299 {strides = array<i32>} : memref<16x64xf32, #tpu.memory_space<vmem>>, vector<2x32xf32>,
    %c2_92 = arith.constant 2 : index
    %c32_93 = arith.constant 32 : index
    %305 = vector.load %arg15[%c2_92, %c32_93] : memref<16x64xf32, #tpu.memory_space<vmem>>, vector<2x32xf32>
    tpu.vector_store %arg15[%c2_92, %c32_93], %302 {strides = array<i32>} : memref<16x64xf32, #tpu.memory_space<vmem>>, vector<2x32xf32>,
    %cst_94 = arith.constant dense<0.000000e+00> : vector<2x256xf32>
    %306 = tpu.matmul %303, %22, %cst_94 {dimension_numbers = #tpu.dot_dimension_numbers<[1], [0], [0], [1], [0, 0, 1, 1], [], []>} : vector<2x64xf32>, vector<64x256xf32>, vector<2x256xf32> -> vector<2x256xf32>
    %307 = vector.extract_strided_slice %306 {offsets = [0, 0], sizes = [2, 128], strides = [1, 1]} : vector<2x256xf32> to vector<2x128xf32>
    %c14_95 = arith.constant 14 : index
    %c0_96 = arith.constant 0 : index
    %308 = vector.load %arg17[%c14_95, %c0_96] : memref<16x256xf32, #tpu.memory_space<vmem>>, vector<2x128xf32>
    %309 = arith.addf %307, %308 : vector<2x128xf32>
    %310 = vector.extract_strided_slice %306 {offsets = [0, 128], sizes = [2, 128], strides = [1, 1]} : vector<2x256xf32> to vector<2x128xf32>
    %c0_97 = arith.constant 0 : index
    %c128_98 = arith.constant 128 : index
    %311 = vector.load %arg17[%c0_97, %c128_98] : memref<16x256xf32, #tpu.memory_space<vmem>>, vector<2x128xf32>
    %312 = arith.addf %310, %311 : vector<2x128xf32>
    %313 = arith.negf %309 : vector<2x128xf32>
    %314 = math.exp %313 : vector<2x128xf32>
    %cst_99 = arith.constant 1.000000e+00 : f32
    %315 = vector.broadcast %cst_99 : f32 to vector<2x128xf32>
    %316 = arith.addf %315, %314 : vector<2x128xf32>
    %317 = arith.divf %315, %316 : vector<2x128xf32>
    %318 = arith.negf %312 : vector<2x128xf32>
    %319 = math.exp %318 : vector<2x128xf32>
    %cst_100 = arith.constant 1.000000e+00 : f32
    %320 = vector.broadcast %cst_100 : f32 to vector<2x128xf32>
    %321 = arith.addf %320, %319 : vector<2x128xf32>
    %322 = arith.divf %320, %321 : vector<2x128xf32>
    %323 = math.tanh %309 : vector<2x128xf32>
    %324 = math.tanh %312 : vector<2x128xf32>
    %325 = vector.extract_strided_slice %317 {offsets = [0, 32], sizes = [2, 32], strides = [1, 1]} : vector<2x128xf32> to vector<2x32xf32>
    %326 = arith.mulf %325, %290 : vector<2x32xf32>
    %327 = vector.extract_strided_slice %317 {offsets = [0, 0], sizes = [2, 32], strides = [1, 1]} : vector<2x128xf32> to vector<2x32xf32>
    %328 = vector.extract_strided_slice %323 {offsets = [0, 64], sizes = [2, 32], strides = [1, 1]} : vector<2x128xf32> to vector<2x32xf32>
    %329 = arith.mulf %327, %328 : vector<2x32xf32>
    %330 = arith.addf %326, %329 : vector<2x32xf32>
    %331 = vector.extract_strided_slice %322 {offsets = [0, 32], sizes = [2, 32], strides = [1, 1]} : vector<2x128xf32> to vector<2x32xf32>
    %332 = arith.mulf %331, %296 : vector<2x32xf32>
    %333 = vector.extract_strided_slice %322 {offsets = [0, 0], sizes = [2, 32], strides = [1, 1]} : vector<2x128xf32> to vector<2x32xf32>
    %334 = vector.extract_strided_slice %324 {offsets = [0, 64], sizes = [2, 32], strides = [1, 1]} : vector<2x128xf32> to vector<2x32xf32>
    %335 = arith.mulf %333, %334 : vector<2x32xf32>
    %336 = arith.addf %332, %335 : vector<2x32xf32>
    %337 = vector.extract_strided_slice %317 {offsets = [0, 96], sizes = [2, 32], strides = [1, 1]} : vector<2x128xf32> to vector<2x32xf32>
    %338 = math.tanh %330 : vector<2x32xf32>
    %339 = arith.mulf %337, %338 : vector<2x32xf32>
    %340 = vector.extract_strided_slice %322 {offsets = [0, 96], sizes = [2, 32], strides = [1, 1]} : vector<2x128xf32> to vector<2x32xf32>
    %341 = math.tanh %336 : vector<2x32xf32>
    %342 = arith.mulf %340, %341 : vector<2x32xf32>
    %c14_101 = arith.constant 14 : index
    %c0_102 = arith.constant 0 : index
    %343 = vector.load %arg15[%c14_101, %c0_102] : memref<16x64xf32, #tpu.memory_space<vmem>>, vector<2x32xf32>
    tpu.vector_store %arg15[%c14_101, %c0_102], %339 {strides = array<i32>} : memref<16x64xf32, #tpu.memory_space<vmem>>, vector<2x32xf32>,
    %c0_103 = arith.constant 0 : index
    %c32_104 = arith.constant 32 : index
    %344 = vector.load %arg15[%c0_103, %c32_104] : memref<16x64xf32, #tpu.memory_space<vmem>>, vector<2x32xf32>
    tpu.vector_store %arg15[%c0_103, %c32_104], %342 {strides = array<i32>} : memref<16x64xf32, #tpu.memory_space<vmem>>, vector<2x32xf32>,
    %c0_105 = arith.constant 0 : index
    %c0_106 = arith.constant 0 : index
    %345 = vector.load %arg15[%c0_105, %c0_106] : memref<16x64xf32, #tpu.memory_space<vmem>>, vector<16x64xf32>
    %c0_107 = arith.constant 0 : index
    %c0_108 = arith.constant 0 : index
    %346 = vector.load %arg8[%c0_107, %c0_108] : memref<64x256xf32, #tpu.memory_space<vmem>>, vector<64x256xf32>
    %cst_109 = arith.constant dense<0.000000e+00> : vector<16x256xf32>
    %347 = tpu.matmul %345, %346, %cst_109 {dimension_numbers = #tpu.dot_dimension_numbers<[1], [0], [0], [1], [0, 0, 1, 1], [], []>} : vector<16x64xf32>, vector<64x256xf32>, vector<16x256xf32> -> vector<16x256xf32>
    %c0_110 = arith.constant 0 : index
    %c0_111 = arith.constant 0 : index
    %348 = vector.load %arg10[%c0_110, %c0_111] : memref<1x256xf32, #tpu.memory_space<vmem>>, vector<1x256xf32>
    %349 = vector.broadcast %348 : vector<1x256xf32> to vector<16x256xf32>
    %350 = arith.addf %347, %349 : vector<16x256xf32>
    %c0_112 = arith.constant 0 : index
    %c0_113 = arith.constant 0 : index
    %351 = vector.load %arg17[%c0_112, %c0_113] : memref<16x256xf32, #tpu.memory_space<vmem>>, vector<16x256xf32>
    tpu.vector_store %arg17[%c0_112, %c0_113], %350 {strides = array<i32>} : memref<16x256xf32, #tpu.memory_space<vmem>>, vector<16x256xf32>,
    %c0_114 = arith.constant 0 : index
    %c0_115 = arith.constant 0 : index
    %352 = vector.load %arg9[%c0_114, %c0_115] : memref<64x256xf32, #tpu.memory_space<vmem>>, vector<64x256xf32>
    %cst_116 = arith.constant 0.000000e+00 : f32
    %353 = vector.broadcast %cst_116 : f32 to vector<2x64xf32>
    %cst_117 = arith.constant 0.000000e+00 : f32
    %354 = vector.broadcast %cst_117 : f32 to vector<2x32xf32>
    %cst_118 = arith.constant 0.000000e+00 : f32
    %355 = vector.broadcast %cst_118 : f32 to vector<2x32xf32>
    %cst_119 = arith.constant dense<0.000000e+00> : vector<2x256xf32>
    %356 = tpu.matmul %353, %352, %cst_119 {dimension_numbers = #tpu.dot_dimension_numbers<[1], [0], [0], [1], [0, 0, 1, 1], [], []>} : vector<2x64xf32>, vector<64x256xf32>, vector<2x256xf32> -> vector<2x256xf32>
    %357 = vector.extract_strided_slice %356 {offsets = [0, 0], sizes = [2, 128], strides = [1, 1]} : vector<2x256xf32> to vector<2x128xf32>
    %c0_120 = arith.constant 0 : index
    %c0_121 = arith.constant 0 : index
    %358 = vector.load %arg17[%c0_120, %c0_121] : memref<16x256xf32, #tpu.memory_space<vmem>>, vector<2x128xf32>
    %359 = arith.addf %357, %358 : vector<2x128xf32>
    %360 = vector.extract_strided_slice %356 {offsets = [0, 128], sizes = [2, 128], strides = [1, 1]} : vector<2x256xf32> to vector<2x128xf32>
    %c14_122 = arith.constant 14 : index
    %c128_123 = arith.constant 128 : index
    %361 = vector.load %arg17[%c14_122, %c128_123] : memref<16x256xf32, #tpu.memory_space<vmem>>, vector<2x128xf32>
    %362 = arith.addf %360, %361 : vector<2x128xf32>
    %363 = arith.negf %359 : vector<2x128xf32>
    %364 = math.exp %363 : vector<2x128xf32>
    %cst_124 = arith.constant 1.000000e+00 : f32
    %365 = vector.broadcast %cst_124 : f32 to vector<2x128xf32>
    %366 = arith.addf %365, %364 : vector<2x128xf32>
    %367 = arith.divf %365, %366 : vector<2x128xf32>
    %368 = arith.negf %362 : vector<2x128xf32>
    %369 = math.exp %368 : vector<2x128xf32>
    %cst_125 = arith.constant 1.000000e+00 : f32
    %370 = vector.broadcast %cst_125 : f32 to vector<2x128xf32>
    %371 = arith.addf %370, %369 : vector<2x128xf32>
    %372 = arith.divf %370, %371 : vector<2x128xf32>
    %373 = math.tanh %359 : vector<2x128xf32>
    %374 = math.tanh %362 : vector<2x128xf32>
    %375 = vector.extract_strided_slice %367 {offsets = [0, 32], sizes = [2, 32], strides = [1, 1]} : vector<2x128xf32> to vector<2x32xf32>
    %376 = arith.mulf %375, %354 : vector<2x32xf32>
    %377 = vector.extract_strided_slice %367 {offsets = [0, 0], sizes = [2, 32], strides = [1, 1]} : vector<2x128xf32> to vector<2x32xf32>
    %378 = vector.extract_strided_slice %373 {offsets = [0, 64], sizes = [2, 32], strides = [1, 1]} : vector<2x128xf32> to vector<2x32xf32>
    %379 = arith.mulf %377, %378 : vector<2x32xf32>
    %380 = arith.addf %376, %379 : vector<2x32xf32>
    %381 = vector.extract_strided_slice %372 {offsets = [0, 32], sizes = [2, 32], strides = [1, 1]} : vector<2x128xf32> to vector<2x32xf32>
    %382 = arith.mulf %381, %355 : vector<2x32xf32>
    %383 = vector.extract_strided_slice %372 {offsets = [0, 0], sizes = [2, 32], strides = [1, 1]} : vector<2x128xf32> to vector<2x32xf32>
    %384 = vector.extract_strided_slice %374 {offsets = [0, 64], sizes = [2, 32], strides = [1, 1]} : vector<2x128xf32> to vector<2x32xf32>
    %385 = arith.mulf %383, %384 : vector<2x32xf32>
    %386 = arith.addf %382, %385 : vector<2x32xf32>
    %387 = vector.extract_strided_slice %367 {offsets = [0, 96], sizes = [2, 32], strides = [1, 1]} : vector<2x128xf32> to vector<2x32xf32>
    %388 = math.tanh %380 : vector<2x32xf32>
    %389 = arith.mulf %387, %388 : vector<2x32xf32>
    %390 = vector.extract_strided_slice %372 {offsets = [0, 96], sizes = [2, 32], strides = [1, 1]} : vector<2x128xf32> to vector<2x32xf32>
    %391 = math.tanh %386 : vector<2x32xf32>
    %392 = arith.mulf %390, %391 : vector<2x32xf32>
    %393 = tpu.concatenate %389, %392 in 1 : vector<2x32xf32>, vector<2x32xf32> -> vector<2x64xf32>
    %c0_126 = arith.constant 0 : index
    %c0_127 = arith.constant 0 : index
    %394 = vector.load %arg16[%c0_126, %c0_127] : memref<16x64xf32, #tpu.memory_space<vmem>>, vector<2x32xf32>
    tpu.vector_store %arg16[%c0_126, %c0_127], %389 {strides = array<i32>} : memref<16x64xf32, #tpu.memory_space<vmem>>, vector<2x32xf32>,
    %c14_128 = arith.constant 14 : index
    %c32_129 = arith.constant 32 : index
    %395 = vector.load %arg16[%c14_128, %c32_129] : memref<16x64xf32, #tpu.memory_space<vmem>>, vector<2x32xf32>
    tpu.vector_store %arg16[%c14_128, %c32_129], %392 {strides = array<i32>} : memref<16x64xf32, #tpu.memory_space<vmem>>, vector<2x32xf32>,
    %cst_130 = arith.constant dense<0.000000e+00> : vector<2x256xf32>
    %396 = tpu.matmul %393, %352, %cst_130 {dimension_numbers = #tpu.dot_dimension_numbers<[1], [0], [0], [1], [0, 0, 1, 1], [], []>} : vector<2x64xf32>, vector<64x256xf32>, vector<2x256xf32> -> vector<2x256xf32>
    %397 = vector.extract_strided_slice %396 {offsets = [0, 0], sizes = [2, 128], strides = [1, 1]} : vector<2x256xf32> to vector<2x128xf32>
    %c2_131 = arith.constant 2 : index
    %c0_132 = arith.constant 0 : index
    %398 = vector.load %arg17[%c2_131, %c0_132] : memref<16x256xf32, #tpu.memory_space<vmem>>, vector<2x128xf32>
    %399 = arith.addf %397, %398 : vector<2x128xf32>
    %400 = vector.extract_strided_slice %396 {offsets = [0, 128], sizes = [2, 128], strides = [1, 1]} : vector<2x256xf32> to vector<2x128xf32>
    %c12_133 = arith.constant 12 : index
    %c128_134 = arith.constant 128 : index
    %401 = vector.load %arg17[%c12_133, %c128_134] : memref<16x256xf32, #tpu.memory_space<vmem>>, vector<2x128xf32>
    %402 = arith.addf %400, %401 : vector<2x128xf32>
    %403 = arith.negf %399 : vector<2x128xf32>
    %404 = math.exp %403 : vector<2x128xf32>
    %cst_135 = arith.constant 1.000000e+00 : f32
    %405 = vector.broadcast %cst_135 : f32 to vector<2x128xf32>
    %406 = arith.addf %405, %404 : vector<2x128xf32>
    %407 = arith.divf %405, %406 : vector<2x128xf32>
    %408 = arith.negf %402 : vector<2x128xf32>
    %409 = math.exp %408 : vector<2x128xf32>
    %cst_136 = arith.constant 1.000000e+00 : f32
    %410 = vector.broadcast %cst_136 : f32 to vector<2x128xf32>
    %411 = arith.addf %410, %409 : vector<2x128xf32>
    %412 = arith.divf %410, %411 : vector<2x128xf32>
    %413 = math.tanh %399 : vector<2x128xf32>
    %414 = math.tanh %402 : vector<2x128xf32>
    %415 = vector.extract_strided_slice %407 {offsets = [0, 32], sizes = [2, 32], strides = [1, 1]} : vector<2x128xf32> to vector<2x32xf32>
    %416 = arith.mulf %415, %380 : vector<2x32xf32>
    %417 = vector.extract_strided_slice %407 {offsets = [0, 0], sizes = [2, 32], strides = [1, 1]} : vector<2x128xf32> to vector<2x32xf32>
    %418 = vector.extract_strided_slice %413 {offsets = [0, 64], sizes = [2, 32], strides = [1, 1]} : vector<2x128xf32> to vector<2x32xf32>
    %419 = arith.mulf %417, %418 : vector<2x32xf32>
    %420 = arith.addf %416, %419 : vector<2x32xf32>
    %421 = vector.extract_strided_slice %412 {offsets = [0, 32], sizes = [2, 32], strides = [1, 1]} : vector<2x128xf32> to vector<2x32xf32>
    %422 = arith.mulf %421, %386 : vector<2x32xf32>
    %423 = vector.extract_strided_slice %412 {offsets = [0, 0], sizes = [2, 32], strides = [1, 1]} : vector<2x128xf32> to vector<2x32xf32>
    %424 = vector.extract_strided_slice %414 {offsets = [0, 64], sizes = [2, 32], strides = [1, 1]} : vector<2x128xf32> to vector<2x32xf32>
    %425 = arith.mulf %423, %424 : vector<2x32xf32>
    %426 = arith.addf %422, %425 : vector<2x32xf32>
    %427 = vector.extract_strided_slice %407 {offsets = [0, 96], sizes = [2, 32], strides = [1, 1]} : vector<2x128xf32> to vector<2x32xf32>
    %428 = math.tanh %420 : vector<2x32xf32>
    %429 = arith.mulf %427, %428 : vector<2x32xf32>
    %430 = vector.extract_strided_slice %412 {offsets = [0, 96], sizes = [2, 32], strides = [1, 1]} : vector<2x128xf32> to vector<2x32xf32>
    %431 = math.tanh %426 : vector<2x32xf32>
    %432 = arith.mulf %430, %431 : vector<2x32xf32>
    %433 = tpu.concatenate %429, %432 in 1 : vector<2x32xf32>, vector<2x32xf32> -> vector<2x64xf32>
    %c2_137 = arith.constant 2 : index
    %c0_138 = arith.constant 0 : index
    %434 = vector.load %arg16[%c2_137, %c0_138] : memref<16x64xf32, #tpu.memory_space<vmem>>, vector<2x32xf32>
    tpu.vector_store %arg16[%c2_137, %c0_138], %429 {strides = array<i32>} : memref<16x64xf32, #tpu.memory_space<vmem>>, vector<2x32xf32>,
    %c12_139 = arith.constant 12 : index
    %c32_140 = arith.constant 32 : index
    %435 = vector.load %arg16[%c12_139, %c32_140] : memref<16x64xf32, #tpu.memory_space<vmem>>, vector<2x32xf32>
    tpu.vector_store %arg16[%c12_139, %c32_140], %432 {strides = array<i32>} : memref<16x64xf32, #tpu.memory_space<vmem>>, vector<2x32xf32>,
    %cst_141 = arith.constant dense<0.000000e+00> : vector<2x256xf32>
    %436 = tpu.matmul %433, %352, %cst_141 {dimension_numbers = #tpu.dot_dimension_numbers<[1], [0], [0], [1], [0, 0, 1, 1], [], []>} : vector<2x64xf32>, vector<64x256xf32>, vector<2x256xf32> -> vector<2x256xf32>
    %437 = vector.extract_strided_slice %436 {offsets = [0, 0], sizes = [2, 128], strides = [1, 1]} : vector<2x256xf32> to vector<2x128xf32>
    %c4_142 = arith.constant 4 : index
    %c0_143 = arith.constant 0 : index
    %438 = vector.load %arg17[%c4_142, %c0_143] : memref<16x256xf32, #tpu.memory_space<vmem>>, vector<2x128xf32>
    %439 = arith.addf %437, %438 : vector<2x128xf32>
    %440 = vector.extract_strided_slice %436 {offsets = [0, 128], sizes = [2, 128], strides = [1, 1]} : vector<2x256xf32> to vector<2x128xf32>
    %c10_144 = arith.constant 10 : index
    %c128_145 = arith.constant 128 : index
    %441 = vector.load %arg17[%c10_144, %c128_145] : memref<16x256xf32, #tpu.memory_space<vmem>>, vector<2x128xf32>
    %442 = arith.addf %440, %441 : vector<2x128xf32>
    %443 = arith.negf %439 : vector<2x128xf32>
    %444 = math.exp %443 : vector<2x128xf32>
    %cst_146 = arith.constant 1.000000e+00 : f32
    %445 = vector.broadcast %cst_146 : f32 to vector<2x128xf32>
    %446 = arith.addf %445, %444 : vector<2x128xf32>
    %447 = arith.divf %445, %446 : vector<2x128xf32>
    %448 = arith.negf %442 : vector<2x128xf32>
    %449 = math.exp %448 : vector<2x128xf32>
    %cst_147 = arith.constant 1.000000e+00 : f32
    %450 = vector.broadcast %cst_147 : f32 to vector<2x128xf32>
    %451 = arith.addf %450, %449 : vector<2x128xf32>
    %452 = arith.divf %450, %451 : vector<2x128xf32>
    %453 = math.tanh %439 : vector<2x128xf32>
    %454 = math.tanh %442 : vector<2x128xf32>
    %455 = vector.extract_strided_slice %447 {offsets = [0, 32], sizes = [2, 32], strides = [1, 1]} : vector<2x128xf32> to vector<2x32xf32>
    %456 = arith.mulf %455, %420 : vector<2x32xf32>
    %457 = vector.extract_strided_slice %447 {offsets = [0, 0], sizes = [2, 32], strides = [1, 1]} : vector<2x128xf32> to vector<2x32xf32>
    %458 = vector.extract_strided_slice %453 {offsets = [0, 64], sizes = [2, 32], strides = [1, 1]} : vector<2x128xf32> to vector<2x32xf32>
    %459 = arith.mulf %457, %458 : vector<2x32xf32>
    %460 = arith.addf %456, %459 : vector<2x32xf32>
    %461 = vector.extract_strided_slice %452 {offsets = [0, 32], sizes = [2, 32], strides = [1, 1]} : vector<2x128xf32> to vector<2x32xf32>
    %462 = arith.mulf %461, %426 : vector<2x32xf32>
    %463 = vector.extract_strided_slice %452 {offsets = [0, 0], sizes = [2, 32], strides = [1, 1]} : vector<2x128xf32> to vector<2x32xf32>
    %464 = vector.extract_strided_slice %454 {offsets = [0, 64], sizes = [2, 32], strides = [1, 1]} : vector<2x128xf32> to vector<2x32xf32>
    %465 = arith.mulf %463, %464 : vector<2x32xf32>
    %466 = arith.addf %462, %465 : vector<2x32xf32>
    %467 = vector.extract_strided_slice %447 {offsets = [0, 96], sizes = [2, 32], strides = [1, 1]} : vector<2x128xf32> to vector<2x32xf32>
    %468 = math.tanh %460 : vector<2x32xf32>
    %469 = arith.mulf %467, %468 : vector<2x32xf32>
    %470 = vector.extract_strided_slice %452 {offsets = [0, 96], sizes = [2, 32], strides = [1, 1]} : vector<2x128xf32> to vector<2x32xf32>
    %471 = math.tanh %466 : vector<2x32xf32>
    %472 = arith.mulf %470, %471 : vector<2x32xf32>
    %473 = tpu.concatenate %469, %472 in 1 : vector<2x32xf32>, vector<2x32xf32> -> vector<2x64xf32>
    %c4_148 = arith.constant 4 : index
    %c0_149 = arith.constant 0 : index
    %474 = vector.load %arg16[%c4_148, %c0_149] : memref<16x64xf32, #tpu.memory_space<vmem>>, vector<2x32xf32>
    tpu.vector_store %arg16[%c4_148, %c0_149], %469 {strides = array<i32>} : memref<16x64xf32, #tpu.memory_space<vmem>>, vector<2x32xf32>,
    %c10_150 = arith.constant 10 : index
    %c32_151 = arith.constant 32 : index
    %475 = vector.load %arg16[%c10_150, %c32_151] : memref<16x64xf32, #tpu.memory_space<vmem>>, vector<2x32xf32>
    tpu.vector_store %arg16[%c10_150, %c32_151], %472 {strides = array<i32>} : memref<16x64xf32, #tpu.memory_space<vmem>>, vector<2x32xf32>,
    %cst_152 = arith.constant dense<0.000000e+00> : vector<2x256xf32>
    %476 = tpu.matmul %473, %352, %cst_152 {dimension_numbers = #tpu.dot_dimension_numbers<[1], [0], [0], [1], [0, 0, 1, 1], [], []>} : vector<2x64xf32>, vector<64x256xf32>, vector<2x256xf32> -> vector<2x256xf32>
    %477 = vector.extract_strided_slice %476 {offsets = [0, 0], sizes = [2, 128], strides = [1, 1]} : vector<2x256xf32> to vector<2x128xf32>
    %c6_153 = arith.constant 6 : index
    %c0_154 = arith.constant 0 : index
    %478 = vector.load %arg17[%c6_153, %c0_154] : memref<16x256xf32, #tpu.memory_space<vmem>>, vector<2x128xf32>
    %479 = arith.addf %477, %478 : vector<2x128xf32>
    %480 = vector.extract_strided_slice %476 {offsets = [0, 128], sizes = [2, 128], strides = [1, 1]} : vector<2x256xf32> to vector<2x128xf32>
    %c8_155 = arith.constant 8 : index
    %c128_156 = arith.constant 128 : index
    %481 = vector.load %arg17[%c8_155, %c128_156] : memref<16x256xf32, #tpu.memory_space<vmem>>, vector<2x128xf32>
    %482 = arith.addf %480, %481 : vector<2x128xf32>
    %483 = arith.negf %479 : vector<2x128xf32>
    %484 = math.exp %483 : vector<2x128xf32>
    %cst_157 = arith.constant 1.000000e+00 : f32
    %485 = vector.broadcast %cst_157 : f32 to vector<2x128xf32>
    %486 = arith.addf %485, %484 : vector<2x128xf32>
    %487 = arith.divf %485, %486 : vector<2x128xf32>
    %488 = arith.negf %482 : vector<2x128xf32>
    %489 = math.exp %488 : vector<2x128xf32>
    %cst_158 = arith.constant 1.000000e+00 : f32
    %490 = vector.broadcast %cst_158 : f32 to vector<2x128xf32>
    %491 = arith.addf %490, %489 : vector<2x128xf32>
    %492 = arith.divf %490, %491 : vector<2x128xf32>
    %493 = math.tanh %479 : vector<2x128xf32>
    %494 = math.tanh %482 : vector<2x128xf32>
    %495 = vector.extract_strided_slice %487 {offsets = [0, 32], sizes = [2, 32], strides = [1, 1]} : vector<2x128xf32> to vector<2x32xf32>
    %496 = arith.mulf %495, %460 : vector<2x32xf32>
    %497 = vector.extract_strided_slice %487 {offsets = [0, 0], sizes = [2, 32], strides = [1, 1]} : vector<2x128xf32> to vector<2x32xf32>
    %498 = vector.extract_strided_slice %493 {offsets = [0, 64], sizes = [2, 32], strides = [1, 1]} : vector<2x128xf32> to vector<2x32xf32>
    %499 = arith.mulf %497, %498 : vector<2x32xf32>
    %500 = arith.addf %496, %499 : vector<2x32xf32>
    %501 = vector.extract_strided_slice %492 {offsets = [0, 32], sizes = [2, 32], strides = [1, 1]} : vector<2x128xf32> to vector<2x32xf32>
    %502 = arith.mulf %501, %466 : vector<2x32xf32>
    %503 = vector.extract_strided_slice %492 {offsets = [0, 0], sizes = [2, 32], strides = [1, 1]} : vector<2x128xf32> to vector<2x32xf32>
    %504 = vector.extract_strided_slice %494 {offsets = [0, 64], sizes = [2, 32], strides = [1, 1]} : vector<2x128xf32> to vector<2x32xf32>
    %505 = arith.mulf %503, %504 : vector<2x32xf32>
    %506 = arith.addf %502, %505 : vector<2x32xf32>
    %507 = vector.extract_strided_slice %487 {offsets = [0, 96], sizes = [2, 32], strides = [1, 1]} : vector<2x128xf32> to vector<2x32xf32>
    %508 = math.tanh %500 : vector<2x32xf32>
    %509 = arith.mulf %507, %508 : vector<2x32xf32>
    %510 = vector.extract_strided_slice %492 {offsets = [0, 96], sizes = [2, 32], strides = [1, 1]} : vector<2x128xf32> to vector<2x32xf32>
    %511 = math.tanh %506 : vector<2x32xf32>
    %512 = arith.mulf %510, %511 : vector<2x32xf32>
    %513 = tpu.concatenate %509, %512 in 1 : vector<2x32xf32>, vector<2x32xf32> -> vector<2x64xf32>
    %c6_159 = arith.constant 6 : index
    %c0_160 = arith.constant 0 : index
    %514 = vector.load %arg16[%c6_159, %c0_160] : memref<16x64xf32, #tpu.memory_space<vmem>>, vector<2x32xf32>
    tpu.vector_store %arg16[%c6_159, %c0_160], %509 {strides = array<i32>} : memref<16x64xf32, #tpu.memory_space<vmem>>, vector<2x32xf32>,
    %c8_161 = arith.constant 8 : index
    %c32_162 = arith.constant 32 : index
    %515 = vector.load %arg16[%c8_161, %c32_162] : memref<16x64xf32, #tpu.memory_space<vmem>>, vector<2x32xf32>
    tpu.vector_store %arg16[%c8_161, %c32_162], %512 {strides = array<i32>} : memref<16x64xf32, #tpu.memory_space<vmem>>, vector<2x32xf32>,
    %cst_163 = arith.constant dense<0.000000e+00> : vector<2x256xf32>
    %516 = tpu.matmul %513, %352, %cst_163 {dimension_numbers = #tpu.dot_dimension_numbers<[1], [0], [0], [1], [0, 0, 1, 1], [], []>} : vector<2x64xf32>, vector<64x256xf32>, vector<2x256xf32> -> vector<2x256xf32>
    %517 = vector.extract_strided_slice %516 {offsets = [0, 0], sizes = [2, 128], strides = [1, 1]} : vector<2x256xf32> to vector<2x128xf32>
    %c8_164 = arith.constant 8 : index
    %c0_165 = arith.constant 0 : index
    %518 = vector.load %arg17[%c8_164, %c0_165] : memref<16x256xf32, #tpu.memory_space<vmem>>, vector<2x128xf32>
    %519 = arith.addf %517, %518 : vector<2x128xf32>
    %520 = vector.extract_strided_slice %516 {offsets = [0, 128], sizes = [2, 128], strides = [1, 1]} : vector<2x256xf32> to vector<2x128xf32>
    %c6_166 = arith.constant 6 : index
    %c128_167 = arith.constant 128 : index
    %521 = vector.load %arg17[%c6_166, %c128_167] : memref<16x256xf32, #tpu.memory_space<vmem>>, vector<2x128xf32>
    %522 = arith.addf %520, %521 : vector<2x128xf32>
    %523 = arith.negf %519 : vector<2x128xf32>
    %524 = math.exp %523 : vector<2x128xf32>
    %cst_168 = arith.constant 1.000000e+00 : f32
    %525 = vector.broadcast %cst_168 : f32 to vector<2x128xf32>
    %526 = arith.addf %525, %524 : vector<2x128xf32>
    %527 = arith.divf %525, %526 : vector<2x128xf32>
    %528 = arith.negf %522 : vector<2x128xf32>
    %529 = math.exp %528 : vector<2x128xf32>
    %cst_169 = arith.constant 1.000000e+00 : f32
    %530 = vector.broadcast %cst_169 : f32 to vector<2x128xf32>
    %531 = arith.addf %530, %529 : vector<2x128xf32>
    %532 = arith.divf %530, %531 : vector<2x128xf32>
    %533 = math.tanh %519 : vector<2x128xf32>
    %534 = math.tanh %522 : vector<2x128xf32>
    %535 = vector.extract_strided_slice %527 {offsets = [0, 32], sizes = [2, 32], strides = [1, 1]} : vector<2x128xf32> to vector<2x32xf32>
    %536 = arith.mulf %535, %500 : vector<2x32xf32>
    %537 = vector.extract_strided_slice %527 {offsets = [0, 0], sizes = [2, 32], strides = [1, 1]} : vector<2x128xf32> to vector<2x32xf32>
    %538 = vector.extract_strided_slice %533 {offsets = [0, 64], sizes = [2, 32], strides = [1, 1]} : vector<2x128xf32> to vector<2x32xf32>
    %539 = arith.mulf %537, %538 : vector<2x32xf32>
    %540 = arith.addf %536, %539 : vector<2x32xf32>
    %541 = vector.extract_strided_slice %532 {offsets = [0, 32], sizes = [2, 32], strides = [1, 1]} : vector<2x128xf32> to vector<2x32xf32>
    %542 = arith.mulf %541, %506 : vector<2x32xf32>
    %543 = vector.extract_strided_slice %532 {offsets = [0, 0], sizes = [2, 32], strides = [1, 1]} : vector<2x128xf32> to vector<2x32xf32>
    %544 = vector.extract_strided_slice %534 {offsets = [0, 64], sizes = [2, 32], strides = [1, 1]} : vector<2x128xf32> to vector<2x32xf32>
    %545 = arith.mulf %543, %544 : vector<2x32xf32>
    %546 = arith.addf %542, %545 : vector<2x32xf32>
    %547 = vector.extract_strided_slice %527 {offsets = [0, 96], sizes = [2, 32], strides = [1, 1]} : vector<2x128xf32> to vector<2x32xf32>
    %548 = math.tanh %540 : vector<2x32xf32>
    %549 = arith.mulf %547, %548 : vector<2x32xf32>
    %550 = vector.extract_strided_slice %532 {offsets = [0, 96], sizes = [2, 32], strides = [1, 1]} : vector<2x128xf32> to vector<2x32xf32>
    %551 = math.tanh %546 : vector<2x32xf32>
    %552 = arith.mulf %550, %551 : vector<2x32xf32>
    %553 = tpu.concatenate %549, %552 in 1 : vector<2x32xf32>, vector<2x32xf32> -> vector<2x64xf32>
    %c8_170 = arith.constant 8 : index
    %c0_171 = arith.constant 0 : index
    %554 = vector.load %arg16[%c8_170, %c0_171] : memref<16x64xf32, #tpu.memory_space<vmem>>, vector<2x32xf32>
    tpu.vector_store %arg16[%c8_170, %c0_171], %549 {strides = array<i32>} : memref<16x64xf32, #tpu.memory_space<vmem>>, vector<2x32xf32>,
    %c6_172 = arith.constant 6 : index
    %c32_173 = arith.constant 32 : index
    %555 = vector.load %arg16[%c6_172, %c32_173] : memref<16x64xf32, #tpu.memory_space<vmem>>, vector<2x32xf32>
    tpu.vector_store %arg16[%c6_172, %c32_173], %552 {strides = array<i32>} : memref<16x64xf32, #tpu.memory_space<vmem>>, vector<2x32xf32>,
    %cst_174 = arith.constant dense<0.000000e+00> : vector<2x256xf32>
    %556 = tpu.matmul %553, %352, %cst_174 {dimension_numbers = #tpu.dot_dimension_numbers<[1], [0], [0], [1], [0, 0, 1, 1], [], []>} : vector<2x64xf32>, vector<64x256xf32>, vector<2x256xf32> -> vector<2x256xf32>
    %557 = vector.extract_strided_slice %556 {offsets = [0, 0], sizes = [2, 128], strides = [1, 1]} : vector<2x256xf32> to vector<2x128xf32>
    %c10_175 = arith.constant 10 : index
    %c0_176 = arith.constant 0 : index
    %558 = vector.load %arg17[%c10_175, %c0_176] : memref<16x256xf32, #tpu.memory_space<vmem>>, vector<2x128xf32>
    %559 = arith.addf %557, %558 : vector<2x128xf32>
    %560 = vector.extract_strided_slice %556 {offsets = [0, 128], sizes = [2, 128], strides = [1, 1]} : vector<2x256xf32> to vector<2x128xf32>
    %c4_177 = arith.constant 4 : index
    %c128_178 = arith.constant 128 : index
    %561 = vector.load %arg17[%c4_177, %c128_178] : memref<16x256xf32, #tpu.memory_space<vmem>>, vector<2x128xf32>
    %562 = arith.addf %560, %561 : vector<2x128xf32>
    %563 = arith.negf %559 : vector<2x128xf32>
    %564 = math.exp %563 : vector<2x128xf32>
    %cst_179 = arith.constant 1.000000e+00 : f32
    %565 = vector.broadcast %cst_179 : f32 to vector<2x128xf32>
    %566 = arith.addf %565, %564 : vector<2x128xf32>
    %567 = arith.divf %565, %566 : vector<2x128xf32>
    %568 = arith.negf %562 : vector<2x128xf32>
    %569 = math.exp %568 : vector<2x128xf32>
    %cst_180 = arith.constant 1.000000e+00 : f32
    %570 = vector.broadcast %cst_180 : f32 to vector<2x128xf32>
    %571 = arith.addf %570, %569 : vector<2x128xf32>
    %572 = arith.divf %570, %571 : vector<2x128xf32>
    %573 = math.tanh %559 : vector<2x128xf32>
    %574 = math.tanh %562 : vector<2x128xf32>
    %575 = vector.extract_strided_slice %567 {offsets = [0, 32], sizes = [2, 32], strides = [1, 1]} : vector<2x128xf32> to vector<2x32xf32>
    %576 = arith.mulf %575, %540 : vector<2x32xf32>
    %577 = vector.extract_strided_slice %567 {offsets = [0, 0], sizes = [2, 32], strides = [1, 1]} : vector<2x128xf32> to vector<2x32xf32>
    %578 = vector.extract_strided_slice %573 {offsets = [0, 64], sizes = [2, 32], strides = [1, 1]} : vector<2x128xf32> to vector<2x32xf32>
    %579 = arith.mulf %577, %578 : vector<2x32xf32>
    %580 = arith.addf %576, %579 : vector<2x32xf32>
    %581 = vector.extract_strided_slice %572 {offsets = [0, 32], sizes = [2, 32], strides = [1, 1]} : vector<2x128xf32> to vector<2x32xf32>
    %582 = arith.mulf %581, %546 : vector<2x32xf32>
    %583 = vector.extract_strided_slice %572 {offsets = [0, 0], sizes = [2, 32], strides = [1, 1]} : vector<2x128xf32> to vector<2x32xf32>
    %584 = vector.extract_strided_slice %574 {offsets = [0, 64], sizes = [2, 32], strides = [1, 1]} : vector<2x128xf32> to vector<2x32xf32>
    %585 = arith.mulf %583, %584 : vector<2x32xf32>
    %586 = arith.addf %582, %585 : vector<2x32xf32>
    %587 = vector.extract_strided_slice %567 {offsets = [0, 96], sizes = [2, 32], strides = [1, 1]} : vector<2x128xf32> to vector<2x32xf32>
    %588 = math.tanh %580 : vector<2x32xf32>
    %589 = arith.mulf %587, %588 : vector<2x32xf32>
    %590 = vector.extract_strided_slice %572 {offsets = [0, 96], sizes = [2, 32], strides = [1, 1]} : vector<2x128xf32> to vector<2x32xf32>
    %591 = math.tanh %586 : vector<2x32xf32>
    %592 = arith.mulf %590, %591 : vector<2x32xf32>
    %593 = tpu.concatenate %589, %592 in 1 : vector<2x32xf32>, vector<2x32xf32> -> vector<2x64xf32>
    %c10_181 = arith.constant 10 : index
    %c0_182 = arith.constant 0 : index
    %594 = vector.load %arg16[%c10_181, %c0_182] : memref<16x64xf32, #tpu.memory_space<vmem>>, vector<2x32xf32>
    tpu.vector_store %arg16[%c10_181, %c0_182], %589 {strides = array<i32>} : memref<16x64xf32, #tpu.memory_space<vmem>>, vector<2x32xf32>,
    %c4_183 = arith.constant 4 : index
    %c32_184 = arith.constant 32 : index
    %595 = vector.load %arg16[%c4_183, %c32_184] : memref<16x64xf32, #tpu.memory_space<vmem>>, vector<2x32xf32>
    tpu.vector_store %arg16[%c4_183, %c32_184], %592 {strides = array<i32>} : memref<16x64xf32, #tpu.memory_space<vmem>>, vector<2x32xf32>,
    %cst_185 = arith.constant dense<0.000000e+00> : vector<2x256xf32>
    %596 = tpu.matmul %593, %352, %cst_185 {dimension_numbers = #tpu.dot_dimension_numbers<[1], [0], [0], [1], [0, 0, 1, 1], [], []>} : vector<2x64xf32>, vector<64x256xf32>, vector<2x256xf32> -> vector<2x256xf32>
    %597 = vector.extract_strided_slice %596 {offsets = [0, 0], sizes = [2, 128], strides = [1, 1]} : vector<2x256xf32> to vector<2x128xf32>
    %c12_186 = arith.constant 12 : index
    %c0_187 = arith.constant 0 : index
    %598 = vector.load %arg17[%c12_186, %c0_187] : memref<16x256xf32, #tpu.memory_space<vmem>>, vector<2x128xf32>
    %599 = arith.addf %597, %598 : vector<2x128xf32>
    %600 = vector.extract_strided_slice %596 {offsets = [0, 128], sizes = [2, 128], strides = [1, 1]} : vector<2x256xf32> to vector<2x128xf32>
    %c2_188 = arith.constant 2 : index
    %c128_189 = arith.constant 128 : index
    %601 = vector.load %arg17[%c2_188, %c128_189] : memref<16x256xf32, #tpu.memory_space<vmem>>, vector<2x128xf32>
    %602 = arith.addf %600, %601 : vector<2x128xf32>
    %603 = arith.negf %599 : vector<2x128xf32>
    %604 = math.exp %603 : vector<2x128xf32>
    %cst_190 = arith.constant 1.000000e+00 : f32
    %605 = vector.broadcast %cst_190 : f32 to vector<2x128xf32>
    %606 = arith.addf %605, %604 : vector<2x128xf32>
    %607 = arith.divf %605, %606 : vector<2x128xf32>
    %608 = arith.negf %602 : vector<2x128xf32>
    %609 = math.exp %608 : vector<2x128xf32>
    %cst_191 = arith.constant 1.000000e+00 : f32
    %610 = vector.broadcast %cst_191 : f32 to vector<2x128xf32>
    %611 = arith.addf %610, %609 : vector<2x128xf32>
    %612 = arith.divf %610, %611 : vector<2x128xf32>
    %613 = math.tanh %599 : vector<2x128xf32>
    %614 = math.tanh %602 : vector<2x128xf32>
    %615 = vector.extract_strided_slice %607 {offsets = [0, 32], sizes = [2, 32], strides = [1, 1]} : vector<2x128xf32> to vector<2x32xf32>
    %616 = arith.mulf %615, %580 : vector<2x32xf32>
    %617 = vector.extract_strided_slice %607 {offsets = [0, 0], sizes = [2, 32], strides = [1, 1]} : vector<2x128xf32> to vector<2x32xf32>
    %618 = vector.extract_strided_slice %613 {offsets = [0, 64], sizes = [2, 32], strides = [1, 1]} : vector<2x128xf32> to vector<2x32xf32>
    %619 = arith.mulf %617, %618 : vector<2x32xf32>
    %620 = arith.addf %616, %619 : vector<2x32xf32>
    %621 = vector.extract_strided_slice %612 {offsets = [0, 32], sizes = [2, 32], strides = [1, 1]} : vector<2x128xf32> to vector<2x32xf32>
    %622 = arith.mulf %621, %586 : vector<2x32xf32>
    %623 = vector.extract_strided_slice %612 {offsets = [0, 0], sizes = [2, 32], strides = [1, 1]} : vector<2x128xf32> to vector<2x32xf32>
    %624 = vector.extract_strided_slice %614 {offsets = [0, 64], sizes = [2, 32], strides = [1, 1]} : vector<2x128xf32> to vector<2x32xf32>
    %625 = arith.mulf %623, %624 : vector<2x32xf32>
    %626 = arith.addf %622, %625 : vector<2x32xf32>
    %627 = vector.extract_strided_slice %607 {offsets = [0, 96], sizes = [2, 32], strides = [1, 1]} : vector<2x128xf32> to vector<2x32xf32>
    %628 = math.tanh %620 : vector<2x32xf32>
    %629 = arith.mulf %627, %628 : vector<2x32xf32>
    %630 = vector.extract_strided_slice %612 {offsets = [0, 96], sizes = [2, 32], strides = [1, 1]} : vector<2x128xf32> to vector<2x32xf32>
    %631 = math.tanh %626 : vector<2x32xf32>
    %632 = arith.mulf %630, %631 : vector<2x32xf32>
    %633 = tpu.concatenate %629, %632 in 1 : vector<2x32xf32>, vector<2x32xf32> -> vector<2x64xf32>
    %c12_192 = arith.constant 12 : index
    %c0_193 = arith.constant 0 : index
    %634 = vector.load %arg16[%c12_192, %c0_193] : memref<16x64xf32, #tpu.memory_space<vmem>>, vector<2x32xf32>
    tpu.vector_store %arg16[%c12_192, %c0_193], %629 {strides = array<i32>} : memref<16x64xf32, #tpu.memory_space<vmem>>, vector<2x32xf32>,
    %c2_194 = arith.constant 2 : index
    %c32_195 = arith.constant 32 : index
    %635 = vector.load %arg16[%c2_194, %c32_195] : memref<16x64xf32, #tpu.memory_space<vmem>>, vector<2x32xf32>
    tpu.vector_store %arg16[%c2_194, %c32_195], %632 {strides = array<i32>} : memref<16x64xf32, #tpu.memory_space<vmem>>, vector<2x32xf32>,
    %cst_196 = arith.constant dense<0.000000e+00> : vector<2x256xf32>
    %636 = tpu.matmul %633, %352, %cst_196 {dimension_numbers = #tpu.dot_dimension_numbers<[1], [0], [0], [1], [0, 0, 1, 1], [], []>} : vector<2x64xf32>, vector<64x256xf32>, vector<2x256xf32> -> vector<2x256xf32>
    %637 = vector.extract_strided_slice %636 {offsets = [0, 0], sizes = [2, 128], strides = [1, 1]} : vector<2x256xf32> to vector<2x128xf32>
    %c14_197 = arith.constant 14 : index
    %c0_198 = arith.constant 0 : index
    %638 = vector.load %arg17[%c14_197, %c0_198] : memref<16x256xf32, #tpu.memory_space<vmem>>, vector<2x128xf32>
    %639 = arith.addf %637, %638 : vector<2x128xf32>
    %640 = vector.extract_strided_slice %636 {offsets = [0, 128], sizes = [2, 128], strides = [1, 1]} : vector<2x256xf32> to vector<2x128xf32>
    %c0_199 = arith.constant 0 : index
    %c128_200 = arith.constant 128 : index
    %641 = vector.load %arg17[%c0_199, %c128_200] : memref<16x256xf32, #tpu.memory_space<vmem>>, vector<2x128xf32>
    %642 = arith.addf %640, %641 : vector<2x128xf32>
    %643 = arith.negf %639 : vector<2x128xf32>
    %644 = math.exp %643 : vector<2x128xf32>
    %cst_201 = arith.constant 1.000000e+00 : f32
    %645 = vector.broadcast %cst_201 : f32 to vector<2x128xf32>
    %646 = arith.addf %645, %644 : vector<2x128xf32>
    %647 = arith.divf %645, %646 : vector<2x128xf32>
    %648 = arith.negf %642 : vector<2x128xf32>
    %649 = math.exp %648 : vector<2x128xf32>
    %cst_202 = arith.constant 1.000000e+00 : f32
    %650 = vector.broadcast %cst_202 : f32 to vector<2x128xf32>
    %651 = arith.addf %650, %649 : vector<2x128xf32>
    %652 = arith.divf %650, %651 : vector<2x128xf32>
    %653 = math.tanh %639 : vector<2x128xf32>
    %654 = math.tanh %642 : vector<2x128xf32>
    %655 = vector.extract_strided_slice %647 {offsets = [0, 32], sizes = [2, 32], strides = [1, 1]} : vector<2x128xf32> to vector<2x32xf32>
    %656 = arith.mulf %655, %620 : vector<2x32xf32>
    %657 = vector.extract_strided_slice %647 {offsets = [0, 0], sizes = [2, 32], strides = [1, 1]} : vector<2x128xf32> to vector<2x32xf32>
    %658 = vector.extract_strided_slice %653 {offsets = [0, 64], sizes = [2, 32], strides = [1, 1]} : vector<2x128xf32> to vector<2x32xf32>
    %659 = arith.mulf %657, %658 : vector<2x32xf32>
    %660 = arith.addf %656, %659 : vector<2x32xf32>
    %661 = vector.extract_strided_slice %652 {offsets = [0, 32], sizes = [2, 32], strides = [1, 1]} : vector<2x128xf32> to vector<2x32xf32>
    %662 = arith.mulf %661, %626 : vector<2x32xf32>
    %663 = vector.extract_strided_slice %652 {offsets = [0, 0], sizes = [2, 32], strides = [1, 1]} : vector<2x128xf32> to vector<2x32xf32>
    %664 = vector.extract_strided_slice %654 {offsets = [0, 64], sizes = [2, 32], strides = [1, 1]} : vector<2x128xf32> to vector<2x32xf32>
    %665 = arith.mulf %663, %664 : vector<2x32xf32>
    %666 = arith.addf %662, %665 : vector<2x32xf32>
    %667 = vector.extract_strided_slice %647 {offsets = [0, 96], sizes = [2, 32], strides = [1, 1]} : vector<2x128xf32> to vector<2x32xf32>
    %668 = math.tanh %660 : vector<2x32xf32>
    %669 = arith.mulf %667, %668 : vector<2x32xf32>
    %670 = vector.extract_strided_slice %652 {offsets = [0, 96], sizes = [2, 32], strides = [1, 1]} : vector<2x128xf32> to vector<2x32xf32>
    %671 = math.tanh %666 : vector<2x32xf32>
    %672 = arith.mulf %670, %671 : vector<2x32xf32>
    %c14_203 = arith.constant 14 : index
    %c0_204 = arith.constant 0 : index
    %673 = vector.load %arg16[%c14_203, %c0_204] : memref<16x64xf32, #tpu.memory_space<vmem>>, vector<2x32xf32>
    tpu.vector_store %arg16[%c14_203, %c0_204], %669 {strides = array<i32>} : memref<16x64xf32, #tpu.memory_space<vmem>>, vector<2x32xf32>,
    %c0_205 = arith.constant 0 : index
    %c32_206 = arith.constant 32 : index
    %674 = vector.load %arg16[%c0_205, %c32_206] : memref<16x64xf32, #tpu.memory_space<vmem>>, vector<2x32xf32>
    tpu.vector_store %arg16[%c0_205, %c32_206], %672 {strides = array<i32>} : memref<16x64xf32, #tpu.memory_space<vmem>>, vector<2x32xf32>,
    %c0_207 = arith.constant 0 : index
    %c0_208 = arith.constant 0 : index
    %675 = vector.load %arg16[%c0_207, %c0_208] : memref<16x64xf32, #tpu.memory_space<vmem>>, vector<16x64xf32>
    %c0_209 = arith.constant 0 : index
    %c0_210 = arith.constant 0 : index
    %676 = vector.load %arg11[%c0_209, %c0_210] : memref<64x8xf32, #tpu.memory_space<vmem>>, vector<64x8xf32>
    %cst_211 = arith.constant dense<0.000000e+00> : vector<16x8xf32>
    %677 = tpu.matmul %675, %676, %cst_211 {dimension_numbers = #tpu.dot_dimension_numbers<[1], [0], [0], [1], [0, 0, 1, 1], [], []>} : vector<16x64xf32>, vector<64x8xf32>, vector<16x8xf32> -> vector<16x8xf32>
    %c0_212 = arith.constant 0 : index
    %c0_213 = arith.constant 0 : index
    %678 = vector.load %arg12[%c0_212, %c0_213] : memref<1x8xf32, #tpu.memory_space<vmem>>, vector<1x8xf32>
    %679 = vector.broadcast %678 : vector<1x8xf32> to vector<16x8xf32>
    %680 = arith.addf %677, %679 : vector<16x8xf32>
    %c0_214 = arith.constant 0 : index
    %c0_215 = arith.constant 0 : index
    %681 = vector.load %arg13[%c0_214, %c0_215] : memref<16x8xf32, #tpu.memory_space<vmem>>, vector<16x8xf32>
    tpu.vector_store %arg13[%c0_214, %c0_215], %680 {strides = array<i32>} : memref<16x8xf32, #tpu.memory_space<vmem>>, vector<16x8xf32>,
    return
  }
}

</mosaic_0001>

<bundles_post_ra>
// kernel: tpu_custom_call.1
= control target key start
LH: loop header
LB: loop body
LE: loop exit
PB: predicated region body
PF: predicated region fallthrough
CT: control target
= control target key end

     0   :  { %18 = vsyncpa [#allocation7], 0  ;;  %s4274_s0 = inlined_call_operand.vmem [shape: f32[16,16], index: 0, kind: input, shape index: {}]   ;;  %s4275_s1 = inlined_call_operand.hbm [shape: f32[16,32], index: 1, kind: input, shape index: {}]   ;;  %s4276_s2 = inlined_call_operand.vmem [shape: f32[1,32], index: 2, kind: input, shape index: {}]   ;;  %s4277_s3 = inlined_call_operand.vmem [shape: f32[1,32], index: 3, kind: input, shape index: {}]   ;;  %s4278_s4 = inlined_call_operand.hbm [shape: f32[1,32], index: 4, kind: input, shape index: {}]   ;;  %s4279_s5 = inlined_call_operand.vmem [shape: f32[32,256], index: 5, kind: input, shape index: {}]   ;;  %s4280_s6 = inlined_call_operand.hbm [shape: f32[64,256], index: 6, kind: input, shape index: {}]   ;;  %s4281_s7 = inlined_call_operand.vmem [shape: f32[1,256], index: 7, kind: input, shape index: {}]   ;;  %s4282_s8 = inlined_call_operand.hbm [shape: f32[64,256], index: 8, kind: input, shape index: {}]   ;;  %s4283_s9 = inlined_call_operand.hbm [shape: f32[64,256], index: 9, kind: input, shape index: {}]   ;;  %s4284_s10 = inlined_call_operand.vmem [shape: f32[1,256], index: 10, kind: input, shape index: {}]   ;;  %s4285_s11 = inlined_call_operand.vmem [shape: f32[64,8], index: 11, kind: input, shape index: {}]   ;;  %s4286_s12 = inlined_call_operand.vmem [shape: f32[1,8], index: 12, kind: input, shape index: {}]   ;;  %s4287_s13 = inlined_call_operand.vmem [shape: f32[16,8], index: 13, kind: output, shape index: {}]  }
   0x1   :  { %19 = vsyncpa [#allocation9], 0 }
   0x2   :  { %20 = vsyncpa [#allocation12], 0  ;;  %s3636_s25 = smov [#allocation8]   ;;  %s3520_s29 = scalar_lea.hbm %s4278_s4, 16 }
   0x3   :  { %s45_s26 = sshll.u32 %s3636_s25, 4  ;;  %p3521_p0 = scmp.ne.s32.totalorder %s4278_s4, %s3520_s29  ;;  %s46_s26 = int_to_ptr.vmem [resolvable:$true] %s45_s26 }
   0x4   :  { %p3524_p1 = scmp.lt.u32.totalorder %s3520_s29, %s4278_s4 }
   0x6   :  { %p3526_p2 = pnand %p3524_p1, %p3521_p0 }
   0x8   :  { %3529 = shalt.err (!%p3526_p2)
}
   0x9   :  { %s3530_s17 = scalar_lea.vmem %s46_s26, 16  ;;  %s3534_s18 = scalar_lea.vmem %s46_s26, 32 }
   0xa   :  { %p3531_p3 = scmp.ne.s32.totalorder %s46_s26, %s3530_s17  ;;  %p3535_p4 = scmp.lt.s32.totalorder %s46_s26, %s46_s26 }
   0xb   :  { %p3536_p5 = scmp.lt.s32.totalorder %s3534_s18, %s3530_s17 }
   0xd   :  { %p3537_p6 = por %p3536_p5, %p3535_p4 }
   0xf   :  { %p3538_p7 = pnand %p3537_p6, %p3531_p3 }
  0x11   :  { %3541 = shalt.err (!%p3538_p7)
}
  0x12   :  { %48 = dma.hbm_to_vmem [thread:$0]  %s4278_s4, 16, %s46_s26, [#allocation9]  }
  0x13   :  { %s3637_s21 = smov [#allocation11]   ;;  %s3638_s23 = smov [#allocation6]  }
  0x14   :  { %s70_s22 = sshll.u32 %s3637_s21, 4  ;;  %s28_s24 = sshll.u32 %s3638_s23, 4  ;;  %s71_s22 = int_to_ptr.vmem [resolvable:$true] %s70_s22  ;;  %s29_s24 = int_to_ptr.vmem [resolvable:$true] %s28_s24 }
  0x15   :  { %s3542_s28 = scalar_lea.hbm %s4282_s8, 2048 }
  0x16   :  { %p3543_p8 = scmp.ne.s32.totalorder %s4282_s8, %s3542_s28  ;;  %p3546_p9 = scmp.lt.u32.totalorder %s3542_s28, %s4282_s8 }
  0x18   :  { %p3548_p10 = pnand %p3546_p9, %p3543_p8 }
  0x1a   :  { %3551 = shalt.err (!%p3548_p10)
}
  0x1b   :  { %s3552_s4 = scalar_lea.vmem %s71_s22, 2048  ;;  %p3557_p12 = scmp.lt.s32.totalorder %s71_s22, %s71_s22 }
  0x1c   :  { %p3553_p11 = scmp.ne.s32.totalorder %s71_s22, %s3552_s4  ;;  %p3558_p13 = scmp.lt.s32.totalorder %s3552_s4, %s3552_s4 }
  0x1e   :  { %p3559_p0 = por %p3558_p13, %p3557_p12 }
  0x20   :  { %p3560_p1 = pnand %p3559_p0, %p3553_p11 }
  0x22   :  { %3563 = shalt.err (!%p3560_p1)
}
  0x23   :  { %s3639_s26 = smov 256   ;;  %s3640_s16 = smov 16  }
  0x24   :  { %76 = dma.hbm_to_vmem [thread:$0]  %s4282_s8, 2048, %s71_s22, [#allocation12], %s3639_s26, %s3639_s26, %s3640_s16  }
  0x25   :  { %s3564_s21 = scalar_lea.hbm %s4275_s1, 256 }
  0x26   :  { %p3565_p2 = scmp.ne.s32.totalorder %s4275_s1, %s3564_s21  ;;  %p3568_p3 = scmp.lt.u32.totalorder %s3564_s21, %s4275_s1 }
  0x28   :  { %p3570_p4 = pnand %p3568_p3, %p3565_p2 }
  0x2a   :  { %3573 = shalt.err (!%p3570_p4)
}
  0x2b   :  { %s3574_s29 = scalar_lea.vmem %s29_s24, 256  ;;  %p3579_p6 = scmp.lt.s32.totalorder %s29_s24, %s29_s24 }
  0x2c   :  { %p3575_p5 = scmp.ne.s32.totalorder %s29_s24, %s3574_s29  ;;  %p3580_p7 = scmp.lt.s32.totalorder %s3574_s29, %s3574_s29 }
  0x2e   :  { %p3581_p8 = por %p3580_p7, %p3579_p6 }
  0x30   :  { %p3582_p9 = pnand %p3581_p8, %p3575_p5 }
  0x32   :  { %3585 = shalt.err (!%p3582_p9)
}
  0x33   :  { %s3641_s8 = smov 128   ;;  %s3642_s22 = smov 8  }
  0x34   :  { %34 = dma.hbm_to_vmem [thread:$0]  %s4275_s1, 256, %s29_s24, [#allocation7], %s3641_s8, %s3641_s8, %s3642_s22  }
  0x35   :  { %s3643_s15 = smov [#allocation10]   ;;  %s3644_s17 = smov [#allocation13]  }
  0x36   :  { %s56_s4 = sshll.u32 %s3643_s15, 4  ;;  %s82_s18 = sshll.u32 %s3644_s17, 4  ;;  %s57_s4 = int_to_ptr.vmem [resolvable:$true] %s56_s4  ;;  %s83_s18 = int_to_ptr.vmem [resolvable:$true] %s82_s18 }
  0x37   :  { %s3586_s21 = scalar_lea.hbm %s4280_s6, 2048 }
  0x38   :  { %p3587_p10 = scmp.ne.s32.totalorder %s4280_s6, %s3586_s21  ;;  %p3590_p11 = scmp.lt.u32.totalorder %s3586_s21, %s4280_s6 }
  0x3a   :  { %p3592_p12 = pnand %p3590_p11, %p3587_p10 }
  0x3c   :  { %3595 = shalt.err (!%p3592_p12)
}
  0x3d   :  { %s3596_s1 = scalar_lea.vmem %s57_s4, 2048  ;;  %p3601_p0 = scmp.lt.s32.totalorder %s57_s4, %s57_s4 }
  0x3e   :  { %p3597_p13 = scmp.ne.s32.totalorder %s57_s4, %s3596_s1  ;;  %p3602_p1 = scmp.lt.s32.totalorder %s3596_s1, %s3596_s1 }
  0x40   :  { %p3603_p2 = por %p3602_p1, %p3601_p0 }
  0x42   :  { %p3604_p3 = pnand %p3603_p2, %p3597_p13 }
  0x44   :  { %3607 = shalt.err (!%p3604_p3)
}
  0x45   :  { %62 = dma.hbm_to_vmem [thread:$0]  %s4280_s6, 2048, %s57_s4, [#allocation9], %s3639_s26, %s3639_s26, %s3640_s16  }
  0x46   :  { %s3608_s30 = scalar_lea.hbm %s4283_s9, 2048 }
  0x47   :  { %p3609_p4 = scmp.ne.s32.totalorder %s4283_s9, %s3608_s30  ;;  %p3612_p5 = scmp.lt.u32.totalorder %s3608_s30, %s4283_s9 }
  0x49   :  { %p3614_p6 = pnand %p3612_p5, %p3609_p4 }
  0x4b   :  { %3617 = shalt.err (!%p3614_p6)
}
  0x4c   :  { %s3618_s20 = scalar_lea.vmem %s83_s18, 2048  ;;  %p3623_p8 = scmp.lt.s32.totalorder %s83_s18, %s83_s18 }
  0x4d   :  { %p3619_p7 = scmp.ne.s32.totalorder %s83_s18, %s3618_s20  ;;  %p3624_p9 = scmp.lt.s32.totalorder %s3618_s20, %s3618_s20 }
  0x4f   :  { %p3625_p10 = por %p3624_p9, %p3623_p8 }
  0x51   :  { %p3626_p11 = pnand %p3625_p10, %p3619_p7 }
  0x53   :  { %3629 = shalt.err (!%p3626_p11)
}
  0x54   :  { %88 = dma.hbm_to_vmem [thread:$0]  %s4283_s9, 2048, %s83_s18, [#allocation12], %s3639_s26, %s3639_s26, %s3640_s16  }
  0x55   :  { %3630 = dma.done.wait [#allocation7], 256  }
  0x56   :  { %3631 = vsyncadd [#allocation7], 4294967040 }
  0x57   :  { %3632 = dma.done.wait [#allocation9], 2064  }
  0x58   :  { %3633 = vsyncadd [#allocation9], 4294965232 }
  0x59   :  { %3634 = dma.done.wait [#allocation12], 4096  }
  0x5a   :  { %3635 = vsyncadd [#allocation12], 4294963200  ;;  %vm121_vm0 = vcmask 130048   ;;  %v112_v0 = vld [vmem:[#allocation6] sm:$0xff]  ;;  %v113_v1 = vld [vmem:[#allocation6 + $0x8] sm:$0xff]  ;;  %v3645_v21 = vmov 0.0   ;;  %v238_v59 = vlaneseq }
  0x5b   :  { %v110_v2 = vld [vmem:[%s4274_s0] sm:$0xff]  ;;  %v2952_v3 = vpack.c.bf16 %v113_v1, %v112_v0  ;;  %v111_v4 = vld [vmem:[%s4274_s0 + $0x8] sm:$0xff]  ;;  %v231_v6 = vld [vmem:[%s4279_s5 + $0x18] sm:$0xff]  ;;  %318 = vmatprep.mubr.f32.mxu1 %v3645_v21  ;;  %vm223_vm1 = vcmask 261120   ;;  %s3647_s21 = smov 32   ;;  %vm490_vm2 = vcmask 254976  }
  0x5c   :  { %2930 = vmatprep.mubr.msk.f32.mxu0 %vm121_vm0, %v110_v2  ;;  %v229_v5 = vld [vmem:[%s4279_s5 + $0x8] sm:$0xff]  ;;  %v228_v8 = vld [vmem:[%s4279_s5] sm:$0xff]  ;;  %v230_v9 = vld [vmem:[%s4279_s5 + $0x10] sm:$0xff]  ;;  %v3875_v60 = vshrl.u32 %v238_v59, 7  ;;  %vm492_vm3 = vcmask 517376   ;;  %vm351_vm4 = vcmask 523264  }
  0x5d   :  { %2953 = vmatprep.subr.bf16.mxu0 %v2952_v3  ;;  %v2956_v7 = vpack.c.bf16 %v231_v6, %v229_v5  ;;  %v2958_v10 = vpack.c.bf16 %v230_v9, %v228_v8  ;;  %v336_v11 = vld [vmem:[#allocation10 + $0x8] sm:$0xff]  ;;  %v338_v12 = vld [vmem:[#allocation10 + $0x18] sm:$0xff]  ;;  %v335_v14 = vld [vmem:[#allocation10] sm:$0xff]  ;;  %vm2844_vm5 = vcmask 64512  }
  0x5e   :  { %2955 = vmatpush3.bf16.msra.mxu0 %v2952_v3  ;;  %v3805_v13 = vpack.c.bf16 %v338_v12, %v336_v11  ;;  %v337_v15 = vld [vmem:[#allocation10 + $0x10] sm:$0xff]  ;;  %v233_v16 = vld [vmem:[%s4279_s5 + $0x28] sm:$0xff]  ;;  %v232_v19 = vld [vmem:[%s4279_s5 + $0x20] sm:$0xff]  ;;  %v240_v61 = vsub.s32 0, %v3875_v60  ;;  %v244_v63 = vsub.s32 1, %v3875_v60 }
  0x5f   :  { %2957 = vmatprep.subr.bf16.mxu1 %v2956_v7  ;;  %v3810_v17 = vpack.c.bf16 %v337_v15, %v335_v14  ;;  %v235_v18 = vld [vmem:[%s4279_s5 + $0x38] sm:$0xff]  ;;  %v234_v20 = vld [vmem:[%s4279_s5 + $0x30] sm:$0xff]  ;;  %v339_v26 = vld [vmem:[#allocation10 + $0x20] sm:$0xff] }
  0x60   :  { %2959 = vmatpush1.bf16.msra.mxu1 %v2958_v10  ;;  %2965 = vmatprep.subr.bf16.mxu0 %v3805_v13  ;;  %v2960_v22 = vpack.c.bf16 %v235_v18, %v233_v16  ;;  %v2962_v23 = vpack.c.bf16 %v234_v20, %v232_v19  ;;  %v340_v24 = vld [vmem:[#allocation10 + $0x28] sm:$0xff]  ;;  %v342_v25 = vld [vmem:[#allocation10 + $0x38] sm:$0xff]  ;;  %v341_v28 = vld [vmem:[#allocation10 + $0x30] sm:$0xff] }
  0x61   :  { %2931 = vmatmul.mubr.msk.f32.vlgmr.msra.gmra.mrb[0].mxu0 %vm121_vm0, %v111_v4  ;;  %v3825_v27 = vpack.c.bf16 %v342_v25, %v340_v24  ;;  %v3827_v29 = vpack.c.bf16 %v341_v28, %v339_v26  ;;  %v344_v30 = vld [vmem:[#allocation10 + $0x48] sm:$0xff]  ;;  %v346_v31 = vld [vmem:[#allocation10 + $0x58] sm:$0xff]  ;;  %v343_v33 = vld [vmem:[#allocation10 + $0x40] sm:$0xff] }
  0x62   :  { %419 = vmatprep.mubr.f32.mxu0 %v3645_v21  ;;  %2967 = vmatpush1.bf16.msra.mxu0 %v3810_v17  ;;  %v3832_v32 = vpack.c.bf16 %v346_v31, %v344_v30  ;;  %v345_v34 = vld [vmem:[#allocation10 + $0x50] sm:$0xff]  ;;  %v348_v36 = vld [vmem:[#allocation10 + $0x68] sm:$0xff]  ;;  %v350_v37 = vld [vmem:[#allocation10 + $0x78] sm:$0xff] }
  0x63   :  { %2961 = vmatprep.subr.bf16.mxu1 %v2960_v22  ;;  %2969 = vmatprep.subr.bf16.mxu0 %v3825_v27  ;;  %v3834_v35 = vpack.c.bf16 %v345_v34, %v343_v33  ;;  %v3838_v38 = vpack.c.bf16 %v350_v37, %v348_v36  ;;  %v347_v39 = vld [vmem:[#allocation10 + $0x60] sm:$0xff]  ;;  %v349_v40 = vld [vmem:[#allocation10 + $0x70] sm:$0xff]  ;;  %v2854_v42 = vld [vmem:[%s4276_s2] ss:$0 sm:$0xff] }
  0x64   :  { %2963 = vmatpush1.bf16.msra.mxu1 %v2962_v23  ;;  %v3840_v41 = vpack.c.bf16 %v349_v40, %v347_v39  ;;  %v2857_v44 = vld [vmem:[%s4277_s3] ss:$0 sm:$0xff] }
  0x65   :  { %2981 = vmatprep.subr.bf16.mxu1 %v3805_v13  ;;  %v2858_v47 = vld [vmem:[#allocation8] ss:$0 sm:$0xff] }
  0x66   :  { %2971 = vmatpush1.bf16.msra.mxu0 %v3827_v29  ;;  %v236_v62 = vld [vmem:[%s4281_s7] sm:$0x3]  ;;  %s3646_s7 = smov 64  }
  0x67   :  { %2973 = vmatprep.subr.bf16.mxu0 %v3832_v32  ;;  %v241_v0 = vrot.slane %v236_v62, %v240_v61  ;;  %v245_v1 = vrot.slane %v236_v62, %v244_v63 }
  0x6a   :  { %2975 = vmatpush1.bf16.msra.mxu0 %v3834_v35 }
  0x6b   :  { %2977 = vmatprep.subr.bf16.mxu0 %v3838_v38 }
  0x6e   :  { %2979 = vmatpush1.bf16.msra.mxu0 %v3840_v41 }
  0x6f   :  { %2997 = vmatprep.subr.bf16.mxu0 %v3805_v13 }
  0x71   :  { %420 = vmatmul.mubr.f32.vlgmr.msra.gmra.mrb[2].mxu0 %v3645_v21 }
  0x72   :  { %2999 = vmatpush1.bf16.msra.mxu0 %v3810_v17  ;;  %704 = vmatprep.mubr.f32.mxu0 %v3645_v21 }
  0x73   :  { %3001 = vmatprep.subr.bf16.mxu0 %v3825_v27 }
  0x76   :  { %3003 = vmatpush1.bf16.msra.mxu0 %v3827_v29 }
  0x77   :  { %3005 = vmatprep.subr.bf16.mxu0 %v3832_v32 }
  0x7a   :  { %3007 = vmatpush1.bf16.msra.mxu0 %v3834_v35 }
  0x7b   :  { %3009 = vmatprep.subr.bf16.mxu0 %v3838_v38 }
  0x7e   :  { %3011 = vmatpush1.bf16.msra.mxu0 %v3840_v41 }
  0x7f   :  { %3029 = vmatprep.subr.bf16.mxu0 %v3805_v13 }
 0x134   :  { %v2932_v43 = vpop.f32.mrb[0].mxu0 }
 0x135   :  { %v200_v45 = vadd.f32 %v2932_v43, %v2854_v42  ;;  %v194_v46 = vpop.f32.mrb[1].mxu0 }
 0x136   :  { %v195_v48 = vadd.f32 %v2854_v42, %v194_v46 }
 0x137   :  { %v211_v49 = vmul.f32 %v2857_v44, %v200_v45 }
 0x138   :  { %v210_v50 = vmul.f32 %v2857_v44, %v195_v48 }
 0x139   :  { %v220_v51 = vadd.f32 %v2858_v47, %v211_v49 }
 0x13a   :  { %v219_v52 = vadd.f32 %v2858_v47, %v210_v50 }
 0x13b   :  { %v222_v53 = vmax.f32 %v220_v51, 0.0 }
 0x13c   :  { %v221_v54 = vmax.f32 %v219_v52, 0.0 }
 0x13d   :  { %225 = vst.msk [vmem:[#allocation2 + $0x8] sm:$0xff] %vm223_vm1, %v222_v53 }
 0x13e   :  { %224 = vst.msk [vmem:[#allocation2] sm:$0xff] %vm223_vm1, %v221_v54 }
 0x144   :  { %v227_v56 = vld [vmem:[#allocation2 + $0x8] sm:$0xff]  ;;  %v421_v57 = vpop.f32.mrb[2].mxu0 }
 0x145   :  { %v226_v55 = vld [vmem:[#allocation2] sm:$0xff]  ;;  %v423_v58 = vpop.f32.mrb[3].mxu0 }
 0x146   :  { %2859 = vmatmul.mubr.msk.f32.vlgmr.msra.gmra.mrb[0].mxu1 %vm223_vm1, %v226_v55 }
 0x147   :  { %324 = vmatprep.mubr.f32.mxu1 %v3645_v21  ;;  %2983 = vmatpush1.bf16.msra.mxu1 %v3810_v17 }
 0x148   :  { %2985 = vmatprep.subr.bf16.mxu1 %v3825_v27 }
 0x14a   :  { %2860 = vmatmul.mubr.msk.f32.gmra.mrb[2].mxu1 %vm223_vm1, %v227_v56 }
 0x14b   :  { %2987 = vmatpush1.bf16.msra.mxu1 %v3827_v29  ;;  %561 = vmatprep.mubr.f32.mxu1 %v3645_v21 }
 0x14c   :  { %2989 = vmatprep.subr.bf16.mxu1 %v3832_v32 }
 0x14f   :  { %2991 = vmatpush1.bf16.msra.mxu1 %v3834_v35 }
 0x150   :  { %2993 = vmatprep.subr.bf16.mxu1 %v3838_v38 }
 0x153   :  { %2995 = vmatpush1.bf16.msra.mxu1 %v3840_v41 }
 0x154   :  { %3013 = vmatprep.subr.bf16.mxu1 %v3805_v13 }
 0x219   :  { %v320_v2 = vpop.f32.mrb[0].mxu1 }
 0x21a   :  { %v321_v3 = vadd.f32 %v320_v2, %v241_v0  ;;  %v322_v4 = vpop.f32.mrb[1].mxu1 }
 0x21b   :  { %v323_v5 = vadd.f32 %v322_v4, %v245_v1 }
 0x21c   :  { %331 = vst [vmem:[#allocation5] sm:$0xff] %v321_v3 }
 0x21d   :  { %332 = vst [vmem:[#allocation5 + $0x8] sm:$0xff] %v323_v5  ;;  %v326_v6 = vpop.f32.mrb[2].mxu1 }
 0x21e   :  { %v327_v7 = vadd.f32 %v326_v6, %v241_v0  ;;  %v328_v8 = vpop.f32.mrb[3].mxu1 }
 0x21f   :  { %v329_v9 = vadd.f32 %v328_v8, %v245_v1 }
 0x220   :  { %333 = vst [vmem:[#allocation5 + $0x10] sm:$0xff] %v327_v7 }
 0x221   :  { %334 = vst [vmem:[#allocation5 + $0x18] sm:$0xff] %v329_v9 }
 0x223   :  { %v426_v10 = vld [vmem:[#allocation5] sm:$0x3]  ;;  %v568_v53 = vld [vmem:[#allocation5] sm:$0xc] }
 0x224   :  { %v427_v11 = vadd.f32 %v426_v10, %v421_v57  ;;  %v570_v55 = vrot.slane %v568_v53, 2 }
 0x226   :  { %3264 = vtanh.f32 %v427_v11  ;;  %v2861_v19 = vmul.f32 -1.442695, %v427_v11 }
 0x228   :  { %v428_v12 = vld [vmem:[#allocation5 + $0x18] sm:$0xc0]  ;;  %v573_v54 = vld [vmem:[#allocation5 + $0x18] sm:$0x30] }
 0x229   :  { %v430_v14 = vrot.slane %v428_v12, 6  ;;  %v575_v57 = vrot.slane %v573_v54, 4 }
 0x22b   :  { %v432_v15 = vadd.f32 %v430_v14, %v423_v58 }
 0x22d   :  { %3266 = vtanh.f32 %v432_v15  ;;  %v2862_v20 = vmul.f32 -1.442695, %v432_v15 }
 0x22e   :  { %3268 = vpow2.f32 %v2861_v19 }
 0x22f   :  { %3270 = vpow2.f32 %v2862_v20 }
 0x230   :  { %v3265_v16 = vpop.eup %3264 }
 0x231   :  { %449 = vrot.lane.b32.xlu0 %v3265_v16, %s3646_s7 }
 0x237   :  { %v3267_v18 = vpop.eup %3266 }
 0x238   :  { %460 = vrot.lane.b32.xlu0 %v3267_v18, %s3646_s7  ;;  %v3269_v22 = vpop.eup %3268 }
 0x239   :  { %v436_v23 = vadd.f32 1.0, %v3269_v22  ;;  %v3271_v24 = vpop.eup %3270 }
 0x23a   :  { %v442_v25 = vadd.f32 1.0, %v3271_v24 }
 0x23b   :  { %3272 = vrcp.f32 %v436_v23 }
 0x23c   :  { %3274 = vrcp.f32 %v442_v25 }
 0x245   :  { %v3273_v26 = vpop.eup %3272 }
 0x246   :  { %v3275_v31 = vpop.eup %3274  ;;  %v447_v36 = vmul.f32 0.0, %v3273_v26 }
 0x247   :  { %v458_v40 = vmul.f32 0.0, %v3275_v31 }
 0x2a3   :  { %v450_v28 = vpop.permute.xlu0 %449 }
 0x2a4   :  { %v452_v30 = vmul.f32 %v3273_v26, %v450_v28 }
 0x2a6   :  { %454 = vrot.lane.b32.xlu1 %v452_v30, %s3647_s21 }
 0x2aa   :  { %v461_v33 = vpop.permute.xlu0 %460 }
 0x2ab   :  { %v463_v34 = vmul.f32 %v3275_v31, %v461_v33 }
 0x2ad   :  { %465 = vrot.lane.b32.xlu1 %v463_v34, %s3647_s21 }
 0x318   :  { %v455_v37 = vpop.permute.xlu1 %454 }
 0x319   :  { %v3890_v39 = vadd.f32 %v455_v37, %v447_v36  ;;  %v711_v36 = vld [vmem:[#allocation5] sm:$0x30]  ;;  %v716_v37 = vld [vmem:[#allocation5 + $0x18] sm:$0xc] }
 0x31b   :  { %3276 = vtanh.f32 %v3890_v39 }
 0x31f   :  { %v466_v42 = vpop.permute.xlu1 %465 }
 0x320   :  { %v3893_v43 = vadd.f32 %v466_v42, %v458_v40  ;;  %v718_v42 = vrot.slane %v716_v37, 2 }
 0x322   :  { %3278 = vtanh.f32 %v3893_v43 }
 0x325   :  { %v3277_v44 = vpop.eup %3276 }
 0x326   :  { %471 = vrot.lane.b32.xlu0 %v3277_v44, %s3646_s7 }
 0x32c   :  { %v3279_v45 = vpop.eup %3278 }
 0x32d   :  { %477 = vrot.lane.b32.xlu1 %v3279_v45, %s3646_s7 }
 0x398   :  { %v472_v46 = vpop.permute.xlu0 %471 }
 0x399   :  { %v474_v47 = vmul.f32 %v3273_v26, %v472_v46 }
 0x39b   :  { %482 = vrot.lane.b32.xlu0 %v474_v47, %s3647_s21 }
 0x39f   :  { %v478_v48 = vpop.permute.xlu1 %477 }
 0x3a0   :  { %v480_v49 = vmul.f32 %v3275_v31, %v478_v48 }
 0x3a2   :  { %486 = vrot.lane.b32.xlu1 %v480_v49, %s3646_s7 }
 0x40d   :  { %v483_v50 = vpop.permute.xlu0 %482 }
 0x40e   :  { %491 = vst.msk [vmem:[#allocation3] sm:$0x3] %vm490_vm2, %v483_v50 }
 0x414   :  { %v487_v51 = vpop.permute.xlu1 %486 }
 0x415   :  { %v489_v52 = vsel %vm223_vm1, %v483_v50, %v487_v51  ;;  %493 = vst.msk [vmem:[#allocation3 + $0xe] sm:$0x3] %vm492_vm3, %v487_v51 }
 0x416   :  { %2863 = vmatmul.mubr.msk.f32.vlgmr.msra.gmra.mrb[4].mxu1 %vm351_vm4, %v489_v52 }
 0x417   :  { %3015 = vmatpush1.bf16.msra.mxu1 %v3810_v17  ;;  %847 = vmatprep.mubr.f32.mxu1 %v3645_v21 }
 0x418   :  { %3017 = vmatprep.subr.bf16.mxu1 %v3825_v27 }
 0x41b   :  { %3019 = vmatpush1.bf16.msra.mxu1 %v3827_v29 }
 0x41c   :  { %3021 = vmatprep.subr.bf16.mxu1 %v3832_v32 }
 0x41f   :  { %3023 = vmatpush1.bf16.msra.mxu1 %v3834_v35 }
 0x420   :  { %3025 = vmatprep.subr.bf16.mxu1 %v3838_v38 }
 0x423   :  { %3027 = vmatpush1.bf16.msra.mxu1 %v3840_v41 }
 0x424   :  { %3045 = vmatprep.subr.bf16.mxu1 %v3805_v13 }
 0x4e9   :  { %v563_v56 = vpop.f32.mrb[4].mxu1 }
 0x4ea   :  { %v572_v58 = vadd.f32 %v570_v55, %v563_v56  ;;  %v565_v59 = vpop.f32.mrb[5].mxu1 }
 0x4eb   :  { %v577_v62 = vadd.f32 %v575_v57, %v565_v59 }
 0x4ec   :  { %3280 = vtanh.f32 %v572_v58  ;;  %v2864_v2 = vmul.f32 -1.442695, %v572_v58 }
 0x4ed   :  { %3282 = vtanh.f32 %v577_v62  ;;  %v2865_v3 = vmul.f32 -1.442695, %v577_v62 }
 0x4ee   :  { %3284 = vpow2.f32 %v2864_v2 }
 0x4ef   :  { %3286 = vpow2.f32 %v2865_v3 }
 0x4f6   :  { %v3281_v0 = vpop.eup %3280 }
 0x4f7   :  { %v3283_v1 = vpop.eup %3282  ;;  %594 = vrot.lane.b32.xlu0 %v3281_v0, %s3646_s7 }
 0x4f8   :  { %605 = vrot.lane.b32.xlu1 %v3283_v1, %s3646_s7  ;;  %v3285_v4 = vpop.eup %3284 }
 0x4f9   :  { %v3287_v5 = vpop.eup %3286  ;;  %v581_v6 = vadd.f32 1.0, %v3285_v4 }
 0x4fa   :  { %v587_v7 = vadd.f32 1.0, %v3287_v5 }
 0x4fb   :  { %3288 = vrcp.f32 %v581_v6 }
 0x4fc   :  { %3290 = vrcp.f32 %v587_v7 }
 0x505   :  { %v3289_v8 = vpop.eup %3288 }
 0x506   :  { %v3291_v10 = vpop.eup %3290  ;;  %v592_v15 = vmul.f32 %v3289_v8, %v3890_v39  ;;  %v713_v39 = vrot.slane %v711_v36, 4 }
 0x507   :  { %v603_v18 = vmul.f32 %v3291_v10, %v3893_v43 }
 0x569   :  { %v595_v9 = vpop.permute.xlu0 %594 }
 0x56a   :  { %v597_v11 = vmul.f32 %v3289_v8, %v595_v9  ;;  %v606_v12 = vpop.permute.xlu1 %605 }
 0x56b   :  { %v608_v14 = vmul.f32 %v3291_v10, %v606_v12 }
 0x56c   :  { %599 = vrot.lane.b32.xlu0 %v597_v11, %s3647_s21 }
 0x56d   :  { %610 = vrot.lane.b32.xlu1 %v608_v14, %s3647_s21 }
 0x5de   :  { %v600_v16 = vpop.permute.xlu0 %599 }
 0x5df   :  { %v602_v19 = vadd.f32 %v600_v16, %v592_v15  ;;  %v611_v20 = vpop.permute.xlu1 %610  ;;  %v854_v15 = vld [vmem:[#allocation5] sm:$0xc0] }
 0x5e0   :  { %v613_v22 = vadd.f32 %v611_v20, %v603_v18  ;;  %v856_v16 = vrot.slane %v854_v15, 6 }
 0x5e1   :  { %3292 = vtanh.f32 %v602_v19 }
 0x5e2   :  { %3294 = vtanh.f32 %v613_v22 }
 0x5eb   :  { %v3293_v23 = vpop.eup %3292 }
 0x5ec   :  { %v3295_v24 = vpop.eup %3294  ;;  %616 = vrot.lane.b32.xlu0 %v3293_v23, %s3646_s7 }
 0x5ed   :  { %622 = vrot.lane.b32.xlu1 %v3295_v24, %s3646_s7 }
 0x65e   :  { %v617_v25 = vpop.permute.xlu0 %616 }
 0x65f   :  { %v619_v26 = vmul.f32 %v3289_v8, %v617_v25  ;;  %v623_v28 = vpop.permute.xlu1 %622 }
 0x660   :  { %v625_v30 = vmul.f32 %v3291_v10, %v623_v28 }
 0x661   :  { %627 = vrot.lane.b32.xlu0 %v619_v26, %s3647_s21 }
 0x662   :  { %631 = vrot.lane.b32.xlu1 %v625_v30, %s3646_s7 }
 0x6d3   :  { %v628_v31 = vpop.permute.xlu0 %627 }
 0x6d4   :  { %635 = vst.msk [vmem:[#allocation3 + $0x2] sm:$0x3] %vm490_vm2, %v628_v31  ;;  %v632_v33 = vpop.permute.xlu1 %631 }
 0x6d5   :  { %v634_v34 = vsel %vm223_vm1, %v628_v31, %v632_v33  ;;  %636 = vst.msk [vmem:[#allocation3 + $0xc] sm:$0x3] %vm492_vm3, %v632_v33 }
 0x6d6   :  { %2866 = vmatmul.mubr.msk.f32.vlgmr.msra.gmra.mrb[4].mxu0 %vm351_vm4, %v634_v34 }
 0x6d7   :  { %3031 = vmatpush1.bf16.msra.mxu0 %v3810_v17  ;;  %987 = vmatprep.mubr.f32.mxu0 %v3645_v21 }
 0x6d8   :  { %3033 = vmatprep.subr.bf16.mxu0 %v3825_v27 }
 0x6db   :  { %3035 = vmatpush1.bf16.msra.mxu0 %v3827_v29 }
 0x6dc   :  { %3037 = vmatprep.subr.bf16.mxu0 %v3832_v32 }
 0x6df   :  { %3039 = vmatpush1.bf16.msra.mxu0 %v3834_v35 }
 0x6e0   :  { %3041 = vmatprep.subr.bf16.mxu0 %v3838_v38 }
 0x6e3   :  { %3043 = vmatpush1.bf16.msra.mxu0 %v3840_v41 }
 0x6e4   :  { %3061 = vmatprep.subr.bf16.mxu0 %v3805_v13 }
 0x7a9   :  { %v706_v40 = vpop.f32.mrb[4].mxu0 }
 0x7aa   :  { %v715_v43 = vadd.f32 %v713_v39, %v706_v40  ;;  %v708_v44 = vpop.f32.mrb[5].mxu0 }
 0x7ab   :  { %v720_v45 = vadd.f32 %v718_v42, %v708_v44 }
 0x7ac   :  { %3296 = vtanh.f32 %v715_v43  ;;  %v2867_v48 = vmul.f32 -1.442695, %v715_v43 }
 0x7ad   :  { %3298 = vtanh.f32 %v720_v45  ;;  %v2868_v49 = vmul.f32 -1.442695, %v720_v45 }
 0x7ae   :  { %3300 = vpow2.f32 %v2867_v48 }
 0x7af   :  { %3302 = vpow2.f32 %v2868_v49 }
 0x7b6   :  { %v3297_v46 = vpop.eup %3296 }
 0x7b7   :  { %v3299_v47 = vpop.eup %3298  ;;  %737 = vrot.lane.b32.xlu0 %v3297_v46, %s3646_s7 }
 0x7b8   :  { %748 = vrot.lane.b32.xlu1 %v3299_v47, %s3646_s7  ;;  %v3301_v50 = vpop.eup %3300 }
 0x7b9   :  { %v3303_v51 = vpop.eup %3302  ;;  %v724_v52 = vadd.f32 1.0, %v3301_v50 }
 0x7ba   :  { %v730_v53 = vadd.f32 1.0, %v3303_v51 }
 0x7bb   :  { %3304 = vrcp.f32 %v724_v52 }
 0x7bc   :  { %3306 = vrcp.f32 %v730_v53 }
 0x7c5   :  { %v3305_v54 = vpop.eup %3304 }
 0x7c6   :  { %v3307_v56 = vpop.eup %3306  ;;  %v735_v62 = vmul.f32 %v3305_v54, %v602_v19 }
 0x7c7   :  { %v746_v1 = vmul.f32 %v3307_v56, %v613_v22  ;;  %v859_v22 = vld [vmem:[#allocation5 + $0x18] sm:$0x3] }
 0x829   :  { %v738_v55 = vpop.permute.xlu0 %737 }
 0x82a   :  { %v740_v57 = vmul.f32 %v3305_v54, %v738_v55  ;;  %v749_v58 = vpop.permute.xlu1 %748 }
 0x82b   :  { %v751_v59 = vmul.f32 %v3307_v56, %v749_v58  ;;  %v996_v58 = vld [vmem:[#allocation5 + $0x8] sm:$0xc0] }
 0x82c   :  { %742 = vrot.lane.b32.xlu0 %v740_v57, %s3647_s21 }
 0x82d   :  { %753 = vrot.lane.b32.xlu1 %v751_v59, %s3647_s21 }
 0x89e   :  { %v743_v0 = vpop.permute.xlu0 %742 }
 0x89f   :  { %v745_v2 = vadd.f32 %v743_v0, %v735_v62  ;;  %v754_v3 = vpop.permute.xlu1 %753  ;;  %v994_v62 = vld [vmem:[#allocation5 + $0x10] sm:$0x3]  ;;  %v998_v0 = vrot.slane %v996_v58, 6 }
 0x8a0   :  { %v756_v4 = vadd.f32 %v754_v3, %v746_v1 }
 0x8a1   :  { %3308 = vtanh.f32 %v745_v2 }
 0x8a2   :  { %3310 = vtanh.f32 %v756_v4 }
 0x8ab   :  { %v3309_v5 = vpop.eup %3308 }
 0x8ac   :  { %v3311_v6 = vpop.eup %3310  ;;  %759 = vrot.lane.b32.xlu0 %v3309_v5, %s3646_s7 }
 0x8ad   :  { %765 = vrot.lane.b32.xlu1 %v3311_v6, %s3646_s7 }
 0x91e   :  { %v760_v7 = vpop.permute.xlu0 %759 }
 0x91f   :  { %v762_v8 = vmul.f32 %v3305_v54, %v760_v7  ;;  %v766_v9 = vpop.permute.xlu1 %765 }
 0x920   :  { %v768_v10 = vmul.f32 %v3307_v56, %v766_v9 }
 0x921   :  { %770 = vrot.lane.b32.xlu0 %v762_v8, %s3647_s21 }
 0x922   :  { %774 = vrot.lane.b32.xlu1 %v768_v10, %s3646_s7 }
 0x993   :  { %v771_v11 = vpop.permute.xlu0 %770 }
 0x994   :  { %778 = vst.msk [vmem:[#allocation3 + $0x4] sm:$0x3] %vm490_vm2, %v771_v11  ;;  %v775_v12 = vpop.permute.xlu1 %774 }
 0x995   :  { %v777_v14 = vsel %vm223_vm1, %v771_v11, %v775_v12  ;;  %779 = vst.msk [vmem:[#allocation3 + $0xa] sm:$0x3] %vm492_vm3, %v775_v12 }
 0x996   :  { %2869 = vmatmul.mubr.msk.f32.vlgmr.msra.gmra.mrb[6].mxu1 %vm351_vm4, %v777_v14 }
 0x997   :  { %3047 = vmatpush1.bf16.msra.mxu1 %v3810_v17  ;;  %1127 = vmatprep.mubr.f32.mxu1 %v3645_v21 }
 0x998   :  { %3049 = vmatprep.subr.bf16.mxu1 %v3825_v27 }
 0x99b   :  { %3051 = vmatpush1.bf16.msra.mxu1 %v3827_v29 }
 0x99c   :  { %3053 = vmatprep.subr.bf16.mxu1 %v3832_v32 }
 0x99f   :  { %3055 = vmatpush1.bf16.msra.mxu1 %v3834_v35 }
 0x9a0   :  { %3057 = vmatprep.subr.bf16.mxu1 %v3838_v38 }
 0x9a3   :  { %3059 = vmatpush1.bf16.msra.mxu1 %v3840_v41 }
 0x9a4   :  { %3077 = vmatprep.subr.bf16.mxu1 %v3805_v13 }
 0xa69   :  { %v849_v18 = vpop.f32.mrb[6].mxu1 }
 0xa6a   :  { %v858_v19 = vadd.f32 %v856_v16, %v849_v18  ;;  %v851_v20 = vpop.f32.mrb[7].mxu1 }
 0xa6b   :  { %v860_v23 = vadd.f32 %v859_v22, %v851_v20 }
 0xa6c   :  { %3312 = vtanh.f32 %v858_v19  ;;  %v2870_v26 = vmul.f32 -1.442695, %v858_v19 }
 0xa6d   :  { %3314 = vtanh.f32 %v860_v23  ;;  %v2871_v28 = vmul.f32 -1.442695, %v860_v23 }
 0xa6e   :  { %3316 = vpow2.f32 %v2870_v26 }
 0xa6f   :  { %3318 = vpow2.f32 %v2871_v28 }
 0xa76   :  { %v3313_v24 = vpop.eup %3312 }
 0xa77   :  { %v3315_v25 = vpop.eup %3314  ;;  %877 = vrot.lane.b32.xlu0 %v3313_v24, %s3646_s7 }
 0xa78   :  { %888 = vrot.lane.b32.xlu1 %v3315_v25, %s3646_s7  ;;  %v3317_v13 = vpop.eup %3316 }
 0xa79   :  { %v3319_v30 = vpop.eup %3318  ;;  %v864_v31 = vadd.f32 1.0, %v3317_v13 }
 0xa7a   :  { %v870_v33 = vadd.f32 1.0, %v3319_v30 }
 0xa7b   :  { %3320 = vrcp.f32 %v864_v31 }
 0xa7c   :  { %3322 = vrcp.f32 %v870_v33 }
 0xa85   :  { %v3321_v34 = vpop.eup %3320 }
 0xa86   :  { %v3323_v37 = vpop.eup %3322  ;;  %v875_v43 = vmul.f32 %v3321_v34, %v745_v2 }
 0xa87   :  { %v886_v45 = vmul.f32 %v3323_v37, %v756_v4 }
 0xae9   :  { %v878_v36 = vpop.permute.xlu0 %877 }
 0xaea   :  { %v880_v39 = vmul.f32 %v3321_v34, %v878_v36  ;;  %v889_v40 = vpop.permute.xlu1 %888 }
 0xaeb   :  { %v891_v42 = vmul.f32 %v3323_v37, %v889_v40  ;;  %v1134_v40 = vld [vmem:[#allocation5 + $0x10] sm:$0xc] }
 0xaec   :  { %882 = vrot.lane.b32.xlu0 %v880_v39, %s3647_s21 }
 0xaed   :  { %893 = vrot.lane.b32.xlu1 %v891_v42, %s3647_s21  ;;  %v1139_v42 = vld [vmem:[#allocation5 + $0x8] sm:$0x30] }
 0xb5e   :  { %v883_v44 = vpop.permute.xlu0 %882 }
 0xb5f   :  { %v885_v46 = vadd.f32 %v883_v44, %v875_v43  ;;  %v894_v47 = vpop.permute.xlu1 %893  ;;  %v1136_v43 = vrot.slane %v1134_v40, 2 }
 0xb60   :  { %v896_v48 = vadd.f32 %v894_v47, %v886_v45  ;;  %v1141_v45 = vrot.slane %v1139_v42, 4 }
 0xb61   :  { %3324 = vtanh.f32 %v885_v46 }
 0xb62   :  { %3326 = vtanh.f32 %v896_v48 }
 0xb6b   :  { %v3325_v49 = vpop.eup %3324 }
 0xb6c   :  { %v3327_v50 = vpop.eup %3326  ;;  %899 = vrot.lane.b32.xlu0 %v3325_v49, %s3646_s7 }
 0xb6d   :  { %905 = vrot.lane.b32.xlu1 %v3327_v50, %s3646_s7 }
 0xbde   :  { %v900_v51 = vpop.permute.xlu0 %899 }
 0xbdf   :  { %v902_v52 = vmul.f32 %v3321_v34, %v900_v51  ;;  %v906_v53 = vpop.permute.xlu1 %905 }
 0xbe0   :  { %v908_v54 = vmul.f32 %v3323_v37, %v906_v53 }
 0xbe1   :  { %910 = vrot.lane.b32.xlu0 %v902_v52, %s3647_s21 }
 0xbe2   :  { %914 = vrot.lane.b32.xlu1 %v908_v54, %s3646_s7 }
 0xc53   :  { %v911_v55 = vpop.permute.xlu0 %910 }
 0xc54   :  { %918 = vst.msk [vmem:[#allocation3 + $0x6] sm:$0x3] %vm490_vm2, %v911_v55  ;;  %v915_v56 = vpop.permute.xlu1 %914 }
 0xc55   :  { %v917_v57 = vsel %vm223_vm1, %v911_v55, %v915_v56  ;;  %919 = vst.msk [vmem:[#allocation3 + $0x8] sm:$0x3] %vm492_vm3, %v915_v56 }
 0xc56   :  { %2872 = vmatmul.mubr.msk.f32.vlgmr.msra.gmra.mrb[6].mxu0 %vm351_vm4, %v917_v57 }
 0xc57   :  { %3063 = vmatpush1.bf16.msra.mxu0 %v3810_v17  ;;  %1270 = vmatprep.mubr.f32.mxu0 %v3645_v21 }
 0xc58   :  { %3065 = vmatprep.subr.bf16.mxu0 %v3825_v27 }
 0xc5b   :  { %3067 = vmatpush1.bf16.msra.mxu0 %v3827_v29 }
 0xc5c   :  { %3069 = vmatprep.subr.bf16.mxu0 %v3832_v32 }
 0xc5f   :  { %3071 = vmatpush1.bf16.msra.mxu0 %v3834_v35 }
 0xc60   :  { %3073 = vmatprep.subr.bf16.mxu0 %v3838_v38 }
 0xc63   :  { %3075 = vmatpush1.bf16.msra.mxu0 %v3840_v41 }
 0xd29   :  { %v989_v59 = vpop.f32.mrb[6].mxu0 }
 0xd2a   :  { %v995_v1 = vadd.f32 %v994_v62, %v989_v59  ;;  %v991_v2 = vpop.f32.mrb[7].mxu0 }
 0xd2b   :  { %v1000_v3 = vadd.f32 %v998_v0, %v991_v2 }
 0xd2c   :  { %3328 = vtanh.f32 %v995_v1  ;;  %v2873_v6 = vmul.f32 -1.442695, %v995_v1 }
 0xd2d   :  { %3330 = vtanh.f32 %v1000_v3  ;;  %v2874_v7 = vmul.f32 -1.442695, %v1000_v3 }
 0xd2e   :  { %3332 = vpow2.f32 %v2873_v6 }
 0xd2f   :  { %3334 = vpow2.f32 %v2874_v7 }
 0xd36   :  { %v3329_v4 = vpop.eup %3328 }
 0xd37   :  { %v3331_v5 = vpop.eup %3330  ;;  %1017 = vrot.lane.b32.xlu0 %v3329_v4, %s3646_s7 }
 0xd38   :  { %1028 = vrot.lane.b32.xlu1 %v3331_v5, %s3646_s7  ;;  %v3333_v8 = vpop.eup %3332 }
 0xd39   :  { %v3335_v9 = vpop.eup %3334  ;;  %v1004_v10 = vadd.f32 1.0, %v3333_v8 }
 0xd3a   :  { %v1010_v11 = vadd.f32 1.0, %v3335_v9 }
 0xd3b   :  { %3336 = vrcp.f32 %v1004_v10  ;;  %v1277_v10 = vld [vmem:[#allocation5 + $0x10] sm:$0x30] }
 0xd3c   :  { %3338 = vrcp.f32 %v1010_v11  ;;  %v1282_v11 = vld [vmem:[#allocation5 + $0x8] sm:$0xc] }
 0xd45   :  { %v3337_v12 = vpop.eup %3336 }
 0xd46   :  { %v3339_v15 = vpop.eup %3338  ;;  %v1015_v20 = vmul.f32 %v3337_v12, %v885_v46 }
 0xd47   :  { %v1026_v23 = vmul.f32 %v3339_v15, %v896_v48 }
 0xda9   :  { %v1018_v14 = vpop.permute.xlu0 %1017 }
 0xdaa   :  { %v1020_v16 = vmul.f32 %v3337_v12, %v1018_v14  ;;  %v1029_v18 = vpop.permute.xlu1 %1028 }
 0xdab   :  { %v1031_v19 = vmul.f32 %v3339_v15, %v1029_v18 }
 0xdac   :  { %1022 = vrot.lane.b32.xlu0 %v1020_v16, %s3647_s21 }
 0xdad   :  { %1033 = vrot.lane.b32.xlu1 %v1031_v19, %s3647_s21 }
 0xe1e   :  { %v1023_v22 = vpop.permute.xlu0 %1022 }
 0xe1f   :  { %v1025_v24 = vadd.f32 %v1023_v22, %v1015_v20  ;;  %v1034_v25 = vpop.permute.xlu1 %1033 }
 0xe20   :  { %v1036_v26 = vadd.f32 %v1034_v25, %v1026_v23 }
 0xe21   :  { %3340 = vtanh.f32 %v1025_v24 }
 0xe22   :  { %3342 = vtanh.f32 %v1036_v26 }
 0xe2b   :  { %v3341_v28 = vpop.eup %3340 }
 0xe2c   :  { %v3343_v13 = vpop.eup %3342  ;;  %1039 = vrot.lane.b32.xlu0 %v3341_v28, %s3646_s7 }
 0xe2d   :  { %1045 = vrot.lane.b32.xlu1 %v3343_v13, %s3646_s7 }
 0xe9e   :  { %v1040_v30 = vpop.permute.xlu0 %1039 }
 0xe9f   :  { %v1042_v31 = vmul.f32 %v3337_v12, %v1040_v30  ;;  %v1046_v33 = vpop.permute.xlu1 %1045  ;;  %v1279_v12 = vrot.slane %v1277_v10, 4 }
 0xea0   :  { %v1048_v34 = vmul.f32 %v3339_v15, %v1046_v33  ;;  %v1284_v15 = vrot.slane %v1282_v11, 2 }
 0xea1   :  { %1050 = vrot.lane.b32.xlu0 %v1042_v31, %s3647_s21 }
 0xea2   :  { %1054 = vrot.lane.b32.xlu1 %v1048_v34, %s3646_s7 }
 0xf13   :  { %v1051_v36 = vpop.permute.xlu0 %1050 }
 0xf14   :  { %1058 = vst.msk [vmem:[#allocation3 + $0x8] sm:$0x3] %vm490_vm2, %v1051_v36  ;;  %v1055_v37 = vpop.permute.xlu1 %1054 }
 0xf15   :  { %v1057_v39 = vsel %vm223_vm1, %v1051_v36, %v1055_v37  ;;  %1059 = vst.msk [vmem:[#allocation3 + $0x6] sm:$0x3] %vm492_vm3, %v1055_v37 }
 0xf16   :  { %2875 = vmatmul.mubr.msk.f32.vlgmr.msra.gmra.mrb[8].mxu1 %vm351_vm4, %v1057_v39 }
 0xf17   :  { %3079 = vmatpush1.bf16.msra.mxu1 %v3810_v17  ;;  %1413 = vmatprep.mubr.f32.mxu1 %v3645_v21 }
 0xf18   :  { %3081 = vmatprep.subr.bf16.mxu1 %v3825_v27 }
 0xf1b   :  { %3083 = vmatpush1.bf16.msra.mxu1 %v3827_v29 }
 0xf1c   :  { %3085 = vmatprep.subr.bf16.mxu1 %v3832_v32 }
 0xf1f   :  { %3087 = vmatpush1.bf16.msra.mxu1 %v3834_v35 }
 0xf20   :  { %3089 = vmatprep.subr.bf16.mxu1 %v3838_v38 }
 0xf23   :  { %3091 = vmatpush1.bf16.msra.mxu1 %v3840_v41 }
 0xfe9   :  { %v1129_v44 = vpop.f32.mrb[8].mxu1 }
 0xfea   :  { %v1138_v17 = vadd.f32 %v1136_v43, %v1129_v44  ;;  %v1131_v46 = vpop.f32.mrb[9].mxu1 }
 0xfeb   :  { %v1143_v47 = vadd.f32 %v1141_v45, %v1131_v46 }
 0xfec   :  { %3344 = vtanh.f32 %v1138_v17  ;;  %v2876_v32 = vmul.f32 -1.442695, %v1138_v17 }
 0xfed   :  { %3346 = vtanh.f32 %v1143_v47  ;;  %v2877_v35 = vmul.f32 -1.442695, %v1143_v47 }
 0xfee   :  { %3348 = vpow2.f32 %v2876_v32 }
 0xfef   :  { %3350 = vpow2.f32 %v2877_v35 }
 0xff6   :  { %v3345_v27 = vpop.eup %3344 }
 0xff7   :  { %v3347_v29 = vpop.eup %3346  ;;  %1160 = vrot.lane.b32.xlu0 %v3345_v27, %s3646_s7 }
 0xff8   :  { %1171 = vrot.lane.b32.xlu1 %v3347_v29, %s3646_s7  ;;  %v3349_v38 = vpop.eup %3348 }
 0xff9   :  { %v3351_v41 = vpop.eup %3350  ;;  %v1147_v48 = vadd.f32 1.0, %v3349_v38 }
 0xffa   :  { %v1153_v49 = vadd.f32 1.0, %v3351_v41 }
 0xffb   :  { %3352 = vrcp.f32 %v1147_v48  ;;  %v1420_v48 = vld [vmem:[#allocation5 + $0x10] sm:$0xc0] }
 0xffc   :  { %3354 = vrcp.f32 %v1153_v49  ;;  %v1422_v49 = vrot.slane %v1420_v48, 6  ;;  %v1609_v48 = vld [vmem:[#allocation13 + $0x38] sm:$0xff] }
0x1005   :  { %v3353_v50 = vpop.eup %3352 }
0x1006   :  { %v3355_v52 = vpop.eup %3354  ;;  %v1158_v56 = vmul.f32 %v3353_v50, %v1025_v24 }
0x1007   :  { %v1169_v58 = vmul.f32 %v3355_v52, %v1036_v26 }
0x1069   :  { %v1161_v51 = vpop.permute.xlu0 %1160 }
0x106a   :  { %v1163_v53 = vmul.f32 %v3353_v50, %v1161_v51  ;;  %v1172_v54 = vpop.permute.xlu1 %1171 }
0x106b   :  { %v1174_v55 = vmul.f32 %v3355_v52, %v1172_v54 }
0x106c   :  { %1165 = vrot.lane.b32.xlu0 %v1163_v53, %s3647_s21  ;;  %v1425_v53 = vld [vmem:[#allocation5 + $0x8] sm:$0x3] }
0x106d   :  { %1176 = vrot.lane.b32.xlu1 %v1174_v55, %s3647_s21 }
0x10de   :  { %v1166_v57 = vpop.permute.xlu0 %1165 }
0x10df   :  { %v1168_v59 = vadd.f32 %v1166_v57, %v1158_v56  ;;  %v1177_v62 = vpop.permute.xlu1 %1176 }
0x10e0   :  { %v1179_v0 = vadd.f32 %v1177_v62, %v1169_v58 }
0x10e1   :  { %3356 = vtanh.f32 %v1168_v59 }
0x10e2   :  { %3358 = vtanh.f32 %v1179_v0 }
0x10eb   :  { %v3357_v1 = vpop.eup %3356 }
0x10ec   :  { %v3359_v2 = vpop.eup %3358  ;;  %1182 = vrot.lane.b32.xlu0 %v3357_v1, %s3646_s7 }
0x10ed   :  { %1188 = vrot.lane.b32.xlu1 %v3359_v2, %s3646_s7 }
0x115e   :  { %v1183_v3 = vpop.permute.xlu0 %1182 }
0x115f   :  { %v1185_v4 = vmul.f32 %v3353_v50, %v1183_v3  ;;  %v1189_v5 = vpop.permute.xlu1 %1188 }
0x1160   :  { %v1191_v6 = vmul.f32 %v3355_v52, %v1189_v5 }
0x1161   :  { %1193 = vrot.lane.b32.xlu0 %v1185_v4, %s3647_s21 }
0x1162   :  { %1197 = vrot.lane.b32.xlu1 %v1191_v6, %s3646_s7 }
0x11d3   :  { %v1194_v7 = vpop.permute.xlu0 %1193 }
0x11d4   :  { %1201 = vst.msk [vmem:[#allocation3 + $0xa] sm:$0x3] %vm490_vm2, %v1194_v7  ;;  %v1198_v8 = vpop.permute.xlu1 %1197 }
0x11d5   :  { %v1200_v9 = vsel %vm223_vm1, %v1194_v7, %v1198_v8  ;;  %1202 = vst.msk [vmem:[#allocation3 + $0x4] sm:$0x3] %vm492_vm3, %v1198_v8 }
0x11d6   :  { %2878 = vmatmul.mubr.msk.f32.vlgmr.msra.gmra.mrb[8].mxu0 %vm351_vm4, %v1200_v9 }
0x11d7   :  { %1585 = vmatprep.mubr.f32.mxu0 %v3645_v21 }
0x12a9   :  { %v1272_v14 = vpop.f32.mrb[8].mxu0 }
0x12aa   :  { %v1281_v16 = vadd.f32 %v1279_v12, %v1272_v14  ;;  %v1274_v18 = vpop.f32.mrb[9].mxu0 }
0x12ab   :  { %v1286_v19 = vadd.f32 %v1284_v15, %v1274_v18  ;;  %v1488_v15 = vld [vmem:[#allocation11 + $0x8] sm:$0xff]  ;;  %v1487_v18 = vld [vmem:[#allocation11] sm:$0xff] }
0x12ac   :  { %3360 = vtanh.f32 %v1281_v16  ;;  %v2879_v23 = vmul.f32 -1.442695, %v1281_v16  ;;  %v1490_v16 = vld [vmem:[#allocation11 + $0x18] sm:$0xff] }
0x12ad   :  { %3362 = vtanh.f32 %v1286_v19  ;;  %v2880_v24 = vmul.f32 -1.442695, %v1286_v19  ;;  %v3092_v19 = vpack.c.bf16 %v1490_v16, %v1488_v15  ;;  %v1503_v15 = vld [vmem:[%s4284_s10] sm:$0x3] }
0x12ae   :  { %3364 = vpow2.f32 %v2879_v23  ;;  %v1494_v23 = vld [vmem:[#allocation11 + $0x38] sm:$0xff]  ;;  %v1508_v16 = vrot.slane %v1503_v15, %v240_v61 }
0x12af   :  { %3366 = vpow2.f32 %v2880_v24  ;;  %3093 = vmatprep.subr.bf16.mxu0 %v3092_v19 }
0x12b6   :  { %v3361_v20 = vpop.eup %3360 }
0x12b7   :  { %v3363_v22 = vpop.eup %3362  ;;  %1303 = vrot.lane.b32.xlu0 %v3361_v20, %s3646_s7  ;;  %v1489_v20 = vld [vmem:[#allocation11 + $0x10] sm:$0xff] }
0x12b8   :  { %1314 = vrot.lane.b32.xlu1 %v3363_v22, %s3646_s7  ;;  %v3365_v25 = vpop.eup %3364  ;;  %v1492_v22 = vld [vmem:[#allocation11 + $0x28] sm:$0xff]  ;;  %v3094_v24 = vpack.c.bf16 %v1489_v20, %v1487_v18  ;;  %v1512_v18 = vrot.slane %v1503_v15, %v244_v63 }
0x12b9   :  { %v3367_v26 = vpop.eup %3366  ;;  %v1290_v28 = vadd.f32 1.0, %v3365_v25  ;;  %v3096_v25 = vpack.c.bf16 %v1494_v23, %v1492_v22 }
0x12ba   :  { %v1296_v13 = vadd.f32 1.0, %v3367_v26  ;;  %v1491_v26 = vld [vmem:[#allocation11 + $0x20] sm:$0xff]  ;;  %3095 = vmatpush1.bf16.msra.mxu0 %v3094_v24 }
0x12bb   :  { %3368 = vrcp.f32 %v1290_v28  ;;  %v1493_v28 = vld [vmem:[#allocation11 + $0x30] sm:$0xff]  ;;  %3097 = vmatprep.subr.bf16.mxu0 %v3096_v25 }
0x12bc   :  { %3370 = vrcp.f32 %v1296_v13  ;;  %v3098_v13 = vpack.c.bf16 %v1493_v28, %v1491_v26 }
0x12be   :  { %3099 = vmatpush1.bf16.msra.mxu0 %v3098_v13 }
0x12c5   :  { %v3369_v30 = vpop.eup %3368 }
0x12c6   :  { %v3371_v33 = vpop.eup %3370  ;;  %v1301_v39 = vmul.f32 %v3369_v30, %v1168_v59 }
0x12c7   :  { %v1312_v42 = vmul.f32 %v3371_v33, %v1179_v0 }
0x1329   :  { %v1304_v31 = vpop.permute.xlu0 %1303 }
0x132a   :  { %v1306_v34 = vmul.f32 %v3369_v30, %v1304_v31  ;;  %v1315_v36 = vpop.permute.xlu1 %1314 }
0x132b   :  { %v1317_v37 = vmul.f32 %v3371_v33, %v1315_v36  ;;  %v1495_v36 = vld [vmem:[#allocation11 + $0x40] sm:$0xff] }
0x132c   :  { %1308 = vrot.lane.b32.xlu0 %v1306_v34, %s3647_s21  ;;  %v1498_v34 = vld [vmem:[#allocation11 + $0x58] sm:$0xff] }
0x132d   :  { %1319 = vrot.lane.b32.xlu1 %v1317_v37, %s3647_s21 }
0x139e   :  { %v1309_v40 = vpop.permute.xlu0 %1308 }
0x139f   :  { %v1311_v43 = vadd.f32 %v1309_v40, %v1301_v39  ;;  %v1320_v44 = vpop.permute.xlu1 %1319  ;;  %v1497_v39 = vld [vmem:[#allocation11 + $0x50] sm:$0xff]  ;;  %v1603_v40 = vld [vmem:[#allocation13 + $0x8] sm:$0xff] }
0x13a0   :  { %v1322_v45 = vadd.f32 %v1320_v44, %v1312_v42  ;;  %v1605_v42 = vld [vmem:[#allocation13 + $0x18] sm:$0xff] }
0x13a1   :  { %3372 = vtanh.f32 %v1311_v43  ;;  %v4037_v44 = vpack.c.bf16 %v1605_v42, %v1603_v40 }
0x13a2   :  { %3374 = vtanh.f32 %v1322_v45 }
0x13a3   :  { %3109 = vmatprep.subr.bf16.mxu1 %v4037_v44 }
0x13ab   :  { %v3373_v17 = vpop.eup %3372 }
0x13ac   :  { %v3375_v46 = vpop.eup %3374  ;;  %1325 = vrot.lane.b32.xlu0 %v3373_v17, %s3646_s7  ;;  %v1604_v17 = vld [vmem:[#allocation13 + $0x10] sm:$0xff] }
0x13ad   :  { %1331 = vrot.lane.b32.xlu1 %v3375_v46, %s3646_s7  ;;  %v1500_v46 = vld [vmem:[#allocation11 + $0x68] sm:$0xff] }
0x141e   :  { %v1326_v47 = vpop.permute.xlu0 %1325 }
0x141f   :  { %v1328_v27 = vmul.f32 %v3369_v30, %v1326_v47  ;;  %v1332_v29 = vpop.permute.xlu1 %1331 }
0x1420   :  { %v1334_v32 = vmul.f32 %v3371_v33, %v1332_v29  ;;  %v1496_v33 = vld [vmem:[#allocation11 + $0x48] sm:$0xff]  ;;  %v1499_v29 = vld [vmem:[#allocation11 + $0x60] sm:$0xff] }
0x1421   :  { %1336 = vrot.lane.b32.xlu0 %v1328_v27, %s3647_s21  ;;  %v3100_v37 = vpack.c.bf16 %v1498_v34, %v1496_v33  ;;  %v1502_v27 = vld [vmem:[#allocation11 + $0x78] sm:$0xff] }
0x1422   :  { %1340 = vrot.lane.b32.xlu1 %v1334_v32, %s3646_s7  ;;  %v1501_v32 = vld [vmem:[#allocation11 + $0x70] sm:$0xff] }
0x1423   :  { %3101 = vmatprep.subr.bf16.mxu0 %v3100_v37 }
0x1493   :  { %v1337_v35 = vpop.permute.xlu0 %1336 }
0x1494   :  { %1344 = vst.msk [vmem:[#allocation3 + $0xc] sm:$0x3] %vm490_vm2, %v1337_v35  ;;  %v1341_v38 = vpop.permute.xlu1 %1340 }
0x1495   :  { %v1343_v41 = vsel %vm223_vm1, %v1337_v35, %v1341_v38  ;;  %1345 = vst.msk [vmem:[#allocation3 + $0x2] sm:$0x3] %vm492_vm3, %v1341_v38  ;;  %v3104_v35 = vpack.c.bf16 %v1502_v27, %v1500_v46  ;;  %v3106_v38 = vpack.c.bf16 %v1501_v32, %v1499_v29 }
0x1496   :  { %2881 = vmatmul.mubr.msk.f32.vlgmr.msra.gmra.mrb[10].mxu1 %vm351_vm4, %v1343_v41  ;;  %v1607_v41 = vld [vmem:[#allocation13 + $0x28] sm:$0xff] }
0x1497   :  { %1682 = vmatprep.mubr.f32.mxu1 %v3645_v21 }
0x1569   :  { %v1415_v50 = vpop.f32.mrb[10].mxu1 }
0x156a   :  { %v1424_v51 = vadd.f32 %v1422_v49, %v1415_v50  ;;  %v1417_v52 = vpop.f32.mrb[11].mxu1  ;;  %v1606_v49 = vld [vmem:[#allocation13 + $0x20] sm:$0xff]  ;;  %v4043_v50 = vpack.c.bf16 %v1609_v48, %v1607_v41 }
0x156b   :  { %v1426_v54 = vadd.f32 %v1425_v53, %v1417_v52  ;;  %v1611_v53 = vld [vmem:[#allocation13 + $0x48] sm:$0xff] }
0x156c   :  { %3376 = vtanh.f32 %v1424_v51  ;;  %v2882_v57 = vmul.f32 -1.442695, %v1424_v51  ;;  %v1608_v51 = vld [vmem:[#allocation13 + $0x30] sm:$0xff] }
0x156d   :  { %3378 = vtanh.f32 %v1426_v54  ;;  %v2883_v58 = vmul.f32 -1.442695, %v1426_v54  ;;  %v4045_v52 = vpack.c.bf16 %v1608_v51, %v1606_v49  ;;  %v1613_v54 = vld [vmem:[#allocation13 + $0x58] sm:$0xff] }
0x156e   :  { %3380 = vpow2.f32 %v2882_v57  ;;  %v1610_v57 = vld [vmem:[#allocation13 + $0x40] sm:$0xff] }
0x156f   :  { %3382 = vpow2.f32 %v2883_v58  ;;  %v1612_v58 = vld [vmem:[#allocation13 + $0x50] sm:$0xff] }
0x1576   :  { %v3377_v55 = vpop.eup %3376 }
0x1577   :  { %v3379_v56 = vpop.eup %3378  ;;  %1443 = vrot.lane.b32.xlu1 %v3377_v55, %s3646_s7 }
0x1578   :  { %1454 = vrot.lane.b32.xlu0 %v3379_v56, %s3646_s7  ;;  %v3381_v59 = vpop.eup %3380  ;;  %v4049_v56 = vpack.c.bf16 %v1613_v54, %v1611_v53 }
0x1579   :  { %v3383_v62 = vpop.eup %3382  ;;  %v1430_v0 = vadd.f32 1.0, %v3381_v59 }
0x157a   :  { %v1436_v1 = vadd.f32 1.0, %v3383_v62 }
0x157b   :  { %3384 = vrcp.f32 %v1430_v0  ;;  %v4053_v0 = vpack.c.bf16 %v1612_v58, %v1610_v57 }
0x157c   :  { %3386 = vrcp.f32 %v1436_v1 }
0x1585   :  { %v4025_v2 = vpop.eup %3384 }
0x1586   :  { %v4027_v4 = vpop.eup %3386  ;;  %v1441_v8 = vmul.f32 %v4025_v2, %v1311_v43  ;;  %v3102_v43 = vpack.c.bf16 %v1497_v39, %v1495_v36 }
0x1587   :  { %v1452_v10 = vmul.f32 %v4027_v4, %v1322_v45  ;;  %v1602_v45 = vld [vmem:[#allocation13] sm:$0xff] }
0x1588   :  { %v4039_v47 = vpack.c.bf16 %v1604_v17, %v1602_v45  ;;  %3103 = vmatpush1.bf16.msra.mxu0 %v3102_v43 }
0x1589   :  { %3105 = vmatprep.subr.bf16.mxu0 %v3104_v35 }
0x158a   :  { %3111 = vmatpush1.bf16.msra.mxu1 %v4039_v47 }
0x158b   :  { %3113 = vmatprep.subr.bf16.mxu1 %v4043_v50 }
0x158c   :  { %3107 = vmatpush1.bf16.msra.mxu0 %v3106_v38 }
0x158d   :  { %3125 = vmatprep.subr.bf16.mxu0 %v4037_v44 }
0x158e   :  { %3115 = vmatpush1.bf16.msra.mxu1 %v4045_v52 }
0x158f   :  { %3117 = vmatprep.subr.bf16.mxu1 %v4049_v56 }
0x1592   :  { %3119 = vmatpush1.bf16.msra.mxu1 %v4053_v0 }
0x15e9   :  { %v1444_v3 = vpop.permute.xlu1 %1443 }
0x15ea   :  { %v1446_v5 = vmul.f32 %v4025_v2, %v1444_v3  ;;  %v1455_v6 = vpop.permute.xlu0 %1454  ;;  %v1615_v3 = vld [vmem:[#allocation13 + $0x68] sm:$0xff] }
0x15eb   :  { %v1457_v7 = vmul.f32 %v4027_v4, %v1455_v6  ;;  %v1614_v6 = vld [vmem:[#allocation13 + $0x60] sm:$0xff] }
0x15ec   :  { %1448 = vrot.lane.b32.xlu1 %v1446_v5, %s3647_s21  ;;  %v1617_v5 = vld [vmem:[#allocation13 + $0x78] sm:$0xff] }
0x15ed   :  { %1459 = vrot.lane.b32.xlu0 %v1457_v7, %s3647_s21  ;;  %v4060_v7 = vpack.c.bf16 %v1617_v5, %v1615_v3 }
0x15ef   :  { %3121 = vmatprep.subr.bf16.mxu1 %v4060_v7 }
0x165e   :  { %v1449_v9 = vpop.permute.xlu1 %1448 }
0x165f   :  { %v1451_v11 = vadd.f32 %v1449_v9, %v1441_v8  ;;  %v1460_v12 = vpop.permute.xlu0 %1459  ;;  %v1616_v8 = vld [vmem:[#allocation13 + $0x70] sm:$0xff] }
0x1660   :  { %v1462_v14 = vadd.f32 %v1460_v12, %v1452_v10 }
0x1661   :  { %3388 = vtanh.f32 %v1451_v11 }
0x1662   :  { %3390 = vtanh.f32 %v1462_v14 }
0x166b   :  { %v3389_v30 = vpop.eup %3388 }
0x166c   :  { %v3391_v31 = vpop.eup %3390  ;;  %1465 = vrot.lane.b32.xlu1 %v3389_v30, %s3646_s7 }
0x166d   :  { %1471 = vrot.lane.b32.xlu0 %v3391_v31, %s3646_s7 }
0x16de   :  { %v1466_v55 = vpop.permute.xlu1 %1465 }
0x16df   :  { %v1468_v59 = vmul.f32 %v4025_v2, %v1466_v55  ;;  %v1472_v62 = vpop.permute.xlu0 %1471  ;;  %v4062_v2 = vpack.c.bf16 %v1616_v8, %v1614_v6 }
0x16e0   :  { %v1474_v1 = vmul.f32 %v4027_v4, %v1472_v62 }
0x16e1   :  { %1476 = vrot.lane.b32.xlu1 %v1468_v59, %s3647_s21  ;;  %3123 = vmatpush1.bf16.msra.mxu1 %v4062_v2 }
0x16e2   :  { %1481 = vrot.lane.b32.xlu0 %v1474_v1, %s3646_s7  ;;  %3141 = vmatprep.subr.bf16.mxu1 %v4037_v44 }
0x16e4   :  { %1683 = vmatmul.mubr.f32.vlgmr.msra.gmra.mrb[12].mxu1 %v3645_v21 }
0x16e5   :  { %3143 = vmatpush1.bf16.msra.mxu1 %v4039_v47  ;;  %1965 = vmatprep.mubr.f32.mxu1 %v3645_v21 }
0x16e6   :  { %3145 = vmatprep.subr.bf16.mxu1 %v4043_v50 }
0x16e9   :  { %3147 = vmatpush1.bf16.msra.mxu1 %v4045_v52 }
0x16ea   :  { %3149 = vmatprep.subr.bf16.mxu1 %v4049_v56 }
0x16ed   :  { %3151 = vmatpush1.bf16.msra.mxu1 %v4053_v0 }
0x16ee   :  { %3153 = vmatprep.subr.bf16.mxu1 %v4060_v7 }
0x16f1   :  { %3155 = vmatpush1.bf16.msra.mxu1 %v4062_v2 }
0x16f2   :  { %3173 = vmatprep.subr.bf16.mxu1 %v4037_v44 }
0x1753   :  { %v1477_v4 = vpop.permute.xlu1 %1476 }
0x1754   :  { %1479 = vst.msk [vmem:[#allocation3 + $0xe] sm:$0x3] %vm490_vm2, %v1477_v4  ;;  %v1482_v9 = vpop.permute.xlu0 %1481 }
0x1755   :  { %1484 = vst.msk [vmem:[#allocation3] sm:$0x3] %vm492_vm3, %v1482_v9 }
0x175b   :  { %v1486_v11 = vld [vmem:[#allocation3 + $0x8] sm:$0xff] }
0x175c   :  { %v1485_v10 = vld [vmem:[#allocation3] sm:$0xff] }
0x175d   :  { %2884 = vmatmul.mubr.msk.f32.vlgmr.msra.gmra.mrb[10].mxu0 %vm351_vm4, %v1485_v10 }
0x175e   :  { %1591 = vmatprep.mubr.f32.mxu0 %v3645_v21  ;;  %3127 = vmatpush1.bf16.msra.mxu0 %v4039_v47 }
0x175f   :  { %3129 = vmatprep.subr.bf16.mxu0 %v4043_v50 }
0x1761   :  { %2885 = vmatmul.mubr.msk.f32.gmra.mrb[12].mxu0 %vm351_vm4, %v1486_v11 }
0x1762   :  { %3131 = vmatpush1.bf16.msra.mxu0 %v4045_v52  ;;  %1822 = vmatprep.mubr.f32.mxu0 %v3645_v21 }
0x1763   :  { %3133 = vmatprep.subr.bf16.mxu0 %v4049_v56 }
0x1766   :  { %3135 = vmatpush1.bf16.msra.mxu0 %v4053_v0 }
0x1767   :  { %3137 = vmatprep.subr.bf16.mxu0 %v4060_v7 }
0x176a   :  { %3139 = vmatpush1.bf16.msra.mxu0 %v4062_v2 }
0x176b   :  { %3157 = vmatprep.subr.bf16.mxu0 %v4037_v44 }
0x17b7   :  { %v1684_v12 = vpop.f32.mrb[12].mxu1 }
0x17b8   :  { %v1686_v14 = vpop.f32.mrb[13].mxu1 }
0x1830   :  { %v1587_v19 = vpop.f32.mrb[10].mxu0 }
0x1831   :  { %v1588_v20 = vadd.f32 %v1587_v19, %v1508_v16  ;;  %v1589_v22 = vpop.f32.mrb[11].mxu0 }
0x1832   :  { %v1590_v23 = vadd.f32 %v1589_v22, %v1512_v18 }
0x1833   :  { %1598 = vst [vmem:[#allocation5] sm:$0xff] %v1588_v20 }
0x1834   :  { %1599 = vst [vmem:[#allocation5 + $0x8] sm:$0xff] %v1590_v23  ;;  %v1593_v24 = vpop.f32.mrb[12].mxu0 }
0x1835   :  { %v1594_v25 = vadd.f32 %v1593_v24, %v1508_v16  ;;  %v1595_v26 = vpop.f32.mrb[13].mxu0 }
0x1836   :  { %v1596_v28 = vadd.f32 %v1595_v26, %v1512_v18 }
0x1837   :  { %1600 = vst [vmem:[#allocation5 + $0x10] sm:$0xff] %v1594_v25 }
0x1838   :  { %1601 = vst [vmem:[#allocation5 + $0x18] sm:$0xff] %v1596_v28 }
0x183a   :  { %v1689_v13 = vld [vmem:[#allocation5] sm:$0x3]  ;;  %v1829_v3 = vld [vmem:[#allocation5] sm:$0xc] }
0x183b   :  { %v1690_v30 = vadd.f32 %v1689_v13, %v1684_v12  ;;  %v1831_v6 = vrot.slane %v1829_v3, 2 }
0x183d   :  { %3392 = vtanh.f32 %v1690_v30  ;;  %v2886_v34 = vmul.f32 -1.442695, %v1690_v30 }
0x183f   :  { %v1691_v31 = vld [vmem:[#allocation5 + $0x18] sm:$0xc0]  ;;  %v1834_v5 = vld [vmem:[#allocation5 + $0x18] sm:$0x30] }
0x1840   :  { %v1693_v61 = vrot.slane %v1691_v31, 6  ;;  %v1836_v4 = vrot.slane %v1834_v5, 4 }
0x1842   :  { %v1695_v33 = vadd.f32 %v1693_v61, %v1686_v14 }
0x1844   :  { %3394 = vtanh.f32 %v1695_v33  ;;  %v2887_v36 = vmul.f32 -1.442695, %v1695_v33 }
0x1845   :  { %3396 = vpow2.f32 %v2886_v34 }
0x1846   :  { %3398 = vpow2.f32 %v2887_v36 }
0x1847   :  { %v3393_v60 = vpop.eup %3392 }
0x1848   :  { %1712 = vrot.lane.b32.xlu0 %v3393_v60, %s3646_s7 }
0x184e   :  { %v3395_v63 = vpop.eup %3394 }
0x184f   :  { %1723 = vrot.lane.b32.xlu1 %v3395_v63, %s3646_s7  ;;  %v3397_v37 = vpop.eup %3396 }
0x1850   :  { %v1699_v39 = vadd.f32 1.0, %v3397_v37  ;;  %v3399_v40 = vpop.eup %3398 }
0x1851   :  { %v1705_v42 = vadd.f32 1.0, %v3399_v40 }
0x1852   :  { %3400 = vrcp.f32 %v1699_v39 }
0x1853   :  { %3402 = vrcp.f32 %v1705_v42 }
0x185c   :  { %v3401_v43 = vpop.eup %3400 }
0x185d   :  { %v3403_v46 = vpop.eup %3402  ;;  %v1710_v32 = vmul.f32 0.0, %v3401_v43 }
0x185e   :  { %v1721_v41 = vmul.f32 0.0, %v3403_v46 }
0x18ba   :  { %v1713_v45 = vpop.permute.xlu0 %1712 }
0x18bb   :  { %v1715_v17 = vmul.f32 %v3401_v43, %v1713_v45 }
0x18bd   :  { %1717 = vrot.lane.b32.xlu0 %v1715_v17, %s3647_s21 }
0x18c1   :  { %v1724_v27 = vpop.permute.xlu1 %1723 }
0x18c2   :  { %v1726_v29 = vmul.f32 %v3403_v46, %v1724_v27  ;;  %v1977_v27 = vld [vmem:[#allocation5 + $0x18] sm:$0xc] }
0x18c4   :  { %1728 = vrot.lane.b32.xlu1 %v1726_v29, %s3647_s21 }
0x192f   :  { %v1718_v35 = vpop.permute.xlu0 %1717 }
0x1930   :  { %v4102_v38 = vadd.f32 %v1718_v35, %v1710_v32  ;;  %v1979_v35 = vrot.slane %v1977_v27, 2 }
0x1932   :  { %3404 = vtanh.f32 %v4102_v38 }
0x1936   :  { %v1729_v48 = vpop.permute.xlu1 %1728 }
0x1937   :  { %v1731_v49 = vadd.f32 %v1729_v48, %v1721_v41 }
0x1939   :  { %3406 = vtanh.f32 %v1731_v49 }
0x193c   :  { %v3405_v51 = vpop.eup %3404 }
0x193d   :  { %1734 = vrot.lane.b32.xlu0 %v3405_v51, %s3646_s7 }
0x1943   :  { %v3407_v53 = vpop.eup %3406 }
0x1944   :  { %1740 = vrot.lane.b32.xlu1 %v3407_v53, %s3646_s7 }
0x19af   :  { %v1735_v54 = vpop.permute.xlu0 %1734 }
0x19b0   :  { %v1737_v55 = vmul.f32 %v3401_v43, %v1735_v54 }
0x19b2   :  { %1745 = vrot.lane.b32.xlu0 %v1737_v55, %s3647_s21 }
0x19b6   :  { %v1741_v57 = vpop.permute.xlu1 %1740 }
0x19b7   :  { %v1743_v58 = vmul.f32 %v3403_v46, %v1741_v57  ;;  %v1972_v46 = vld [vmem:[#allocation5] sm:$0x30] }
0x19b8   :  { %v1974_v29 = vrot.slane %v1972_v46, 4 }
0x19b9   :  { %1749 = vrot.lane.b32.xlu1 %v1743_v58, %s3646_s7 }
0x1a24   :  { %v1746_v59 = vpop.permute.xlu0 %1745 }
0x1a25   :  { %1753 = vst.msk [vmem:[#allocation4] sm:$0x3] %vm490_vm2, %v1746_v59 }
0x1a2b   :  { %v1750_v62 = vpop.permute.xlu1 %1749 }
0x1a2c   :  { %v1752_v1 = vsel %vm223_vm1, %v1746_v59, %v1750_v62  ;;  %1754 = vst.msk [vmem:[#allocation4 + $0xe] sm:$0x3] %vm492_vm3, %v1750_v62 }
0x1a2d   :  { %2888 = vmatmul.mubr.msk.f32.vlgmr.msra.gmra.mrb[14].mxu0 %vm351_vm4, %v1752_v1 }
0x1a2e   :  { %3159 = vmatpush1.bf16.msra.mxu0 %v4039_v47  ;;  %2108 = vmatprep.mubr.f32.mxu0 %v3645_v21 }
0x1a2f   :  { %3161 = vmatprep.subr.bf16.mxu0 %v4043_v50 }
0x1a32   :  { %3163 = vmatpush1.bf16.msra.mxu0 %v4045_v52 }
0x1a33   :  { %3165 = vmatprep.subr.bf16.mxu0 %v4049_v56 }
0x1a36   :  { %3167 = vmatpush1.bf16.msra.mxu0 %v4053_v0 }
0x1a37   :  { %3169 = vmatprep.subr.bf16.mxu0 %v4060_v7 }
0x1a3a   :  { %3171 = vmatpush1.bf16.msra.mxu0 %v4062_v2 }
0x1a3b   :  { %3189 = vmatprep.subr.bf16.mxu0 %v4037_v44 }
0x1b00   :  { %v1824_v8 = vpop.f32.mrb[14].mxu0 }
0x1b01   :  { %v1833_v9 = vadd.f32 %v1831_v6, %v1824_v8  ;;  %v1826_v10 = vpop.f32.mrb[15].mxu0 }
0x1b02   :  { %v1838_v11 = vadd.f32 %v1836_v4, %v1826_v10 }
0x1b03   :  { %3408 = vtanh.f32 %v1833_v9  ;;  %v2889_v15 = vmul.f32 -1.442695, %v1833_v9 }
0x1b04   :  { %3410 = vtanh.f32 %v1838_v11  ;;  %v2890_v16 = vmul.f32 -1.442695, %v1838_v11 }
0x1b05   :  { %3412 = vpow2.f32 %v2889_v15 }
0x1b06   :  { %3414 = vpow2.f32 %v2890_v16 }
0x1b0d   :  { %v3409_v12 = vpop.eup %3408 }
0x1b0e   :  { %v3411_v14 = vpop.eup %3410  ;;  %1855 = vrot.lane.b32.xlu0 %v3409_v12, %s3646_s7 }
0x1b0f   :  { %1866 = vrot.lane.b32.xlu1 %v3411_v14, %s3646_s7  ;;  %v3413_v18 = vpop.eup %3412 }
0x1b10   :  { %v3415_v19 = vpop.eup %3414  ;;  %v1842_v20 = vadd.f32 1.0, %v3413_v18 }
0x1b11   :  { %v1848_v22 = vadd.f32 1.0, %v3415_v19 }
0x1b12   :  { %3416 = vrcp.f32 %v1842_v20 }
0x1b13   :  { %3418 = vrcp.f32 %v1848_v22 }
0x1b1c   :  { %v3417_v23 = vpop.eup %3416 }
0x1b1d   :  { %v3419_v25 = vpop.eup %3418  ;;  %v1853_v30 = vmul.f32 %v3417_v23, %v4102_v38 }
0x1b1e   :  { %v1864_v61 = vmul.f32 %v3419_v25, %v1731_v49 }
0x1b80   :  { %v1856_v24 = vpop.permute.xlu0 %1855 }
0x1b81   :  { %v1858_v26 = vmul.f32 %v3417_v23, %v1856_v24  ;;  %v1867_v28 = vpop.permute.xlu1 %1866 }
0x1b82   :  { %v1869_v13 = vmul.f32 %v3419_v25, %v1867_v28 }
0x1b83   :  { %1860 = vrot.lane.b32.xlu0 %v1858_v26, %s3647_s21  ;;  %v2115_v26 = vld [vmem:[#allocation5] sm:$0xc0] }
0x1b84   :  { %1871 = vrot.lane.b32.xlu1 %v1869_v13, %s3647_s21  ;;  %v2117_v28 = vrot.slane %v2115_v26, 6 }
0x1bf5   :  { %v1861_v31 = vpop.permute.xlu0 %1860 }
0x1bf6   :  { %v1863_v33 = vadd.f32 %v1861_v31, %v1853_v30  ;;  %v1872_v60 = vpop.permute.xlu1 %1871 }
0x1bf7   :  { %v1874_v63 = vadd.f32 %v1872_v60, %v1864_v61  ;;  %v2120_v61 = vld [vmem:[#allocation5 + $0x18] sm:$0x3] }
0x1bf8   :  { %3420 = vtanh.f32 %v1863_v33 }
0x1bf9   :  { %3422 = vtanh.f32 %v1874_v63 }
0x1c02   :  { %v3421_v34 = vpop.eup %3420 }
0x1c03   :  { %v3423_v36 = vpop.eup %3422  ;;  %1877 = vrot.lane.b32.xlu0 %v3421_v34, %s3646_s7 }
0x1c04   :  { %1883 = vrot.lane.b32.xlu1 %v3423_v36, %s3646_s7 }
0x1c75   :  { %v1878_v37 = vpop.permute.xlu0 %1877 }
0x1c76   :  { %v1880_v39 = vmul.f32 %v3417_v23, %v1878_v37  ;;  %v1884_v40 = vpop.permute.xlu1 %1883 }
0x1c77   :  { %v1886_v42 = vmul.f32 %v3419_v25, %v1884_v40 }
0x1c78   :  { %1888 = vrot.lane.b32.xlu0 %v1880_v39, %s3647_s21 }
0x1c79   :  { %1892 = vrot.lane.b32.xlu1 %v1886_v42, %s3646_s7 }
0x1cea   :  { %v1889_v43 = vpop.permute.xlu0 %1888 }
0x1ceb   :  { %1896 = vst.msk [vmem:[#allocation4 + $0x2] sm:$0x3] %vm490_vm2, %v1889_v43  ;;  %v1893_v45 = vpop.permute.xlu1 %1892 }
0x1cec   :  { %v1895_v17 = vsel %vm223_vm1, %v1889_v43, %v1893_v45  ;;  %1897 = vst.msk [vmem:[#allocation4 + $0xc] sm:$0x3] %vm492_vm3, %v1893_v45 }
0x1ced   :  { %2891 = vmatmul.mubr.msk.f32.vlgmr.msra.gmra.mrb[14].mxu1 %vm351_vm4, %v1895_v17 }
0x1cee   :  { %3175 = vmatpush1.bf16.msra.mxu1 %v4039_v47  ;;  %2248 = vmatprep.mubr.f32.mxu1 %v3645_v21 }
0x1cef   :  { %3177 = vmatprep.subr.bf16.mxu1 %v4043_v50 }
0x1cf2   :  { %3179 = vmatpush1.bf16.msra.mxu1 %v4045_v52 }
0x1cf3   :  { %3181 = vmatprep.subr.bf16.mxu1 %v4049_v56 }
0x1cf6   :  { %3183 = vmatpush1.bf16.msra.mxu1 %v4053_v0 }
0x1cf7   :  { %3185 = vmatprep.subr.bf16.mxu1 %v4060_v7 }
0x1cfa   :  { %3187 = vmatpush1.bf16.msra.mxu1 %v4062_v2 }
0x1cfb   :  { %3205 = vmatprep.subr.bf16.mxu1 %v4037_v44 }
0x1dc0   :  { %v1967_v32 = vpop.f32.mrb[14].mxu1 }
0x1dc1   :  { %v1976_v38 = vadd.f32 %v1974_v29, %v1967_v32  ;;  %v1969_v41 = vpop.f32.mrb[15].mxu1 }
0x1dc2   :  { %v1981_v48 = vadd.f32 %v1979_v35, %v1969_v41 }
0x1dc3   :  { %3424 = vtanh.f32 %v1976_v38  ;;  %v2892_v53 = vmul.f32 -1.442695, %v1976_v38 }
0x1dc4   :  { %3426 = vtanh.f32 %v1981_v48  ;;  %v2893_v54 = vmul.f32 -1.442695, %v1981_v48 }
0x1dc5   :  { %3428 = vpow2.f32 %v2892_v53 }
0x1dc6   :  { %3430 = vpow2.f32 %v2893_v54 }
0x1dcd   :  { %v3425_v49 = vpop.eup %3424 }
0x1dce   :  { %v3427_v51 = vpop.eup %3426  ;;  %1998 = vrot.lane.b32.xlu0 %v3425_v49, %s3646_s7 }
0x1dcf   :  { %2009 = vrot.lane.b32.xlu1 %v3427_v51, %s3646_s7  ;;  %v3429_v55 = vpop.eup %3428 }
0x1dd0   :  { %v3431_v57 = vpop.eup %3430  ;;  %v1985_v58 = vadd.f32 1.0, %v3429_v55 }
0x1dd1   :  { %v1991_v59 = vadd.f32 1.0, %v3431_v57 }
0x1dd2   :  { %3432 = vrcp.f32 %v1985_v58 }
0x1dd3   :  { %3434 = vrcp.f32 %v1991_v59 }
0x1ddc   :  { %v3433_v62 = vpop.eup %3432 }
0x1ddd   :  { %v3435_v3 = vpop.eup %3434  ;;  %v1996_v4 = vmul.f32 %v3433_v62, %v1863_v33 }
0x1dde   :  { %v2007_v10 = vmul.f32 %v3435_v3, %v1874_v63 }
0x1e40   :  { %v1999_v1 = vpop.permute.xlu0 %1998 }
0x1e41   :  { %v2001_v5 = vmul.f32 %v3433_v62, %v1999_v1  ;;  %v2010_v6 = vpop.permute.xlu1 %2009  ;;  %v2257_v1 = vld [vmem:[#allocation5 + $0x8] sm:$0xc0] }
0x1e42   :  { %v2012_v8 = vmul.f32 %v3435_v3, %v2010_v6  ;;  %v2259_v6 = vrot.slane %v2257_v1, 6 }
0x1e43   :  { %2003 = vrot.lane.b32.xlu0 %v2001_v5, %s3647_s21  ;;  %v2255_v5 = vld [vmem:[#allocation5 + $0x10] sm:$0x3] }
0x1e44   :  { %2014 = vrot.lane.b32.xlu1 %v2012_v8, %s3647_s21 }
0x1eb5   :  { %v2004_v9 = vpop.permute.xlu0 %2003 }
0x1eb6   :  { %v2006_v11 = vadd.f32 %v2004_v9, %v1996_v4  ;;  %v2015_v12 = vpop.permute.xlu1 %2014 }
0x1eb7   :  { %v2017_v14 = vadd.f32 %v2015_v12, %v2007_v10 }
0x1eb8   :  { %3436 = vtanh.f32 %v2006_v11 }
0x1eb9   :  { %3438 = vtanh.f32 %v2017_v14 }
0x1ec2   :  { %v3437_v15 = vpop.eup %3436 }
0x1ec3   :  { %v3439_v16 = vpop.eup %3438  ;;  %2020 = vrot.lane.b32.xlu0 %v3437_v15, %s3646_s7 }
0x1ec4   :  { %2026 = vrot.lane.b32.xlu1 %v3439_v16, %s3646_s7 }
0x1f35   :  { %v2021_v18 = vpop.permute.xlu0 %2020 }
0x1f36   :  { %v2023_v19 = vmul.f32 %v3433_v62, %v2021_v18  ;;  %v2027_v20 = vpop.permute.xlu1 %2026 }
0x1f37   :  { %v2029_v22 = vmul.f32 %v3435_v3, %v2027_v20 }
0x1f38   :  { %2031 = vrot.lane.b32.xlu0 %v2023_v19, %s3647_s21 }
0x1f39   :  { %2035 = vrot.lane.b32.xlu1 %v2029_v22, %s3646_s7 }
0x1faa   :  { %v2032_v23 = vpop.permute.xlu0 %2031 }
0x1fab   :  { %2039 = vst.msk [vmem:[#allocation4 + $0x4] sm:$0x3] %vm490_vm2, %v2032_v23  ;;  %v2036_v24 = vpop.permute.xlu1 %2035 }
0x1fac   :  { %v2038_v25 = vsel %vm223_vm1, %v2032_v23, %v2036_v24  ;;  %2040 = vst.msk [vmem:[#allocation4 + $0xa] sm:$0x3] %vm492_vm3, %v2036_v24 }
0x1fad   :  { %2894 = vmatmul.mubr.msk.f32.vlgmr.msra.gmra.mrb[16].mxu0 %vm351_vm4, %v2038_v25 }
0x1fae   :  { %3191 = vmatpush1.bf16.msra.mxu0 %v4039_v47  ;;  %2388 = vmatprep.mubr.f32.mxu0 %v3645_v21 }
0x1faf   :  { %3193 = vmatprep.subr.bf16.mxu0 %v4043_v50 }
0x1fb2   :  { %3195 = vmatpush1.bf16.msra.mxu0 %v4045_v52 }
0x1fb3   :  { %3197 = vmatprep.subr.bf16.mxu0 %v4049_v56 }
0x1fb6   :  { %3199 = vmatpush1.bf16.msra.mxu0 %v4053_v0 }
0x1fb7   :  { %3201 = vmatprep.subr.bf16.mxu0 %v4060_v7 }
0x1fba   :  { %3203 = vmatpush1.bf16.msra.mxu0 %v4062_v2 }
0x1fbb   :  { %3221 = vmatprep.subr.bf16.mxu0 %v4037_v44 }
0x2080   :  { %v2110_v13 = vpop.f32.mrb[16].mxu0 }
0x2081   :  { %v2119_v30 = vadd.f32 %v2117_v28, %v2110_v13  ;;  %v2112_v31 = vpop.f32.mrb[17].mxu0 }
0x2082   :  { %v2121_v33 = vadd.f32 %v2120_v61, %v2112_v31 }
0x2083   :  { %3440 = vtanh.f32 %v2119_v30  ;;  %v2895_v34 = vmul.f32 -1.442695, %v2119_v30 }
0x2084   :  { %3442 = vtanh.f32 %v2121_v33  ;;  %v2896_v36 = vmul.f32 -1.442695, %v2121_v33 }
0x2085   :  { %3444 = vpow2.f32 %v2895_v34 }
0x2086   :  { %3446 = vpow2.f32 %v2896_v36 }
0x208d   :  { %v3441_v60 = vpop.eup %3440 }
0x208e   :  { %v3443_v63 = vpop.eup %3442  ;;  %2138 = vrot.lane.b32.xlu0 %v3441_v60, %s3646_s7 }
0x208f   :  { %2149 = vrot.lane.b32.xlu1 %v3443_v63, %s3646_s7  ;;  %v3445_v44 = vpop.eup %3444 }
0x2090   :  { %v3447_v37 = vpop.eup %3446  ;;  %v2125_v39 = vadd.f32 1.0, %v3445_v44 }
0x2091   :  { %v2131_v40 = vadd.f32 1.0, %v3447_v37 }
0x2092   :  { %3448 = vrcp.f32 %v2125_v39 }
0x2093   :  { %3450 = vrcp.f32 %v2131_v40 }
0x209c   :  { %v3449_v42 = vpop.eup %3448 }
0x209d   :  { %v3451_v45 = vpop.eup %3450  ;;  %v2136_v29 = vmul.f32 %v3449_v42, %v2006_v11 }
0x209e   :  { %v2147_v35 = vmul.f32 %v3451_v45, %v2017_v14 }
0x2100   :  { %v2139_v43 = vpop.permute.xlu0 %2138 }
0x2101   :  { %v2141_v17 = vmul.f32 %v3449_v42, %v2139_v43  ;;  %v2150_v46 = vpop.permute.xlu1 %2149  ;;  %v2395_v43 = vld [vmem:[#allocation5 + $0x10] sm:$0xc] }
0x2102   :  { %v2152_v27 = vmul.f32 %v3451_v45, %v2150_v46 }
0x2103   :  { %2143 = vrot.lane.b32.xlu0 %v2141_v17, %s3647_s21  ;;  %v2397_v17 = vrot.slane %v2395_v43, 2 }
0x2104   :  { %2154 = vrot.lane.b32.xlu1 %v2152_v27, %s3647_s21 }
0x2175   :  { %v2144_v32 = vpop.permute.xlu0 %2143 }
0x2176   :  { %v2146_v38 = vadd.f32 %v2144_v32, %v2136_v29  ;;  %v2155_v41 = vpop.permute.xlu1 %2154 }
0x2177   :  { %v2157_v48 = vadd.f32 %v2155_v41, %v2147_v35 }
0x2178   :  { %3452 = vtanh.f32 %v2146_v38 }
0x2179   :  { %3454 = vtanh.f32 %v2157_v48 }
0x2182   :  { %v3453_v49 = vpop.eup %3452 }
0x2183   :  { %v3455_v51 = vpop.eup %3454  ;;  %2160 = vrot.lane.b32.xlu0 %v3453_v49, %s3646_s7 }
0x2184   :  { %2166 = vrot.lane.b32.xlu1 %v3455_v51, %s3646_s7 }
0x21f5   :  { %v2161_v53 = vpop.permute.xlu0 %2160 }
0x21f6   :  { %v2163_v54 = vmul.f32 %v3449_v42, %v2161_v53  ;;  %v2167_v55 = vpop.permute.xlu1 %2166 }
0x21f7   :  { %v2169_v57 = vmul.f32 %v3451_v45, %v2167_v55  ;;  %v2400_v45 = vld [vmem:[#allocation5 + $0x8] sm:$0x30] }
0x21f8   :  { %2171 = vrot.lane.b32.xlu0 %v2163_v54, %s3647_s21  ;;  %v2402_v27 = vrot.slane %v2400_v45, 4 }
0x21f9   :  { %2175 = vrot.lane.b32.xlu1 %v2169_v57, %s3646_s7 }
0x226a   :  { %v2172_v58 = vpop.permute.xlu0 %2171 }
0x226b   :  { %2179 = vst.msk [vmem:[#allocation4 + $0x6] sm:$0x3] %vm490_vm2, %v2172_v58  ;;  %v2176_v59 = vpop.permute.xlu1 %2175 }
0x226c   :  { %v2178_v62 = vsel %vm223_vm1, %v2172_v58, %v2176_v59  ;;  %2180 = vst.msk [vmem:[#allocation4 + $0x8] sm:$0x3] %vm492_vm3, %v2176_v59 }
0x226d   :  { %2897 = vmatmul.mubr.msk.f32.vlgmr.msra.gmra.mrb[16].mxu1 %vm351_vm4, %v2178_v62 }
0x226e   :  { %3207 = vmatpush1.bf16.msra.mxu1 %v4039_v47  ;;  %2531 = vmatprep.mubr.f32.mxu1 %v3645_v21 }
0x226f   :  { %3209 = vmatprep.subr.bf16.mxu1 %v4043_v50 }
0x2272   :  { %3211 = vmatpush1.bf16.msra.mxu1 %v4045_v52 }
0x2273   :  { %3213 = vmatprep.subr.bf16.mxu1 %v4049_v56 }
0x2276   :  { %3215 = vmatpush1.bf16.msra.mxu1 %v4053_v0 }
0x2277   :  { %3217 = vmatprep.subr.bf16.mxu1 %v4060_v7 }
0x227a   :  { %3219 = vmatpush1.bf16.msra.mxu1 %v4062_v2 }
0x2340   :  { %v2250_v3 = vpop.f32.mrb[16].mxu1 }
0x2341   :  { %v2256_v8 = vadd.f32 %v2255_v5, %v2250_v3  ;;  %v2252_v4 = vpop.f32.mrb[17].mxu1 }
0x2342   :  { %v2261_v9 = vadd.f32 %v2259_v6, %v2252_v4 }
0x2343   :  { %3456 = vtanh.f32 %v2256_v8  ;;  %v2898_v12 = vmul.f32 -1.442695, %v2256_v8 }
0x2344   :  { %3458 = vtanh.f32 %v2261_v9  ;;  %v2899_v14 = vmul.f32 -1.442695, %v2261_v9 }
0x2345   :  { %3460 = vpow2.f32 %v2898_v12  ;;  %v2538_v12 = vld [vmem:[#allocation5 + $0x10] sm:$0x30] }
0x2346   :  { %3462 = vpow2.f32 %v2899_v14  ;;  %v2543_v14 = vld [vmem:[#allocation5 + $0x8] sm:$0xc] }
0x234d   :  { %v3457_v10 = vpop.eup %3456 }
0x234e   :  { %v3459_v11 = vpop.eup %3458  ;;  %2278 = vrot.lane.b32.xlu0 %v3457_v10, %s3646_s7 }
0x234f   :  { %2289 = vrot.lane.b32.xlu1 %v3459_v11, %s3646_s7  ;;  %v3461_v15 = vpop.eup %3460 }
0x2350   :  { %v3463_v16 = vpop.eup %3462  ;;  %v2265_v18 = vadd.f32 1.0, %v3461_v15  ;;  %v2540_v15 = vrot.slane %v2538_v12, 4  ;;  %v2748_v12 = vld [vmem:[%s4285_s11] sm:$0xff] }
0x2351   :  { %v2271_v19 = vadd.f32 1.0, %v3463_v16 }
0x2352   :  { %3464 = vrcp.f32 %v2265_v18  ;;  %v2545_v18 = vrot.slane %v2543_v14, 2  ;;  %v2749_v14 = vld [vmem:[%s4285_s11 + $0x8] sm:$0xff] }
0x2353   :  { %3466 = vrcp.f32 %v2271_v19 }
0x235c   :  { %v3465_v20 = vpop.eup %3464 }
0x235d   :  { %v3467_v23 = vpop.eup %3466  ;;  %v2276_v28 = vmul.f32 %v3465_v20, %v2146_v38 }
0x235e   :  { %v2287_v30 = vmul.f32 %v3467_v23, %v2157_v48 }
0x23c0   :  { %v2279_v22 = vpop.permute.xlu0 %2278 }
0x23c1   :  { %v2281_v24 = vmul.f32 %v3465_v20, %v2279_v22  ;;  %v2290_v25 = vpop.permute.xlu1 %2289 }
0x23c2   :  { %v2292_v26 = vmul.f32 %v3467_v23, %v2290_v25 }
0x23c3   :  { %2283 = vrot.lane.b32.xlu0 %v2281_v24, %s3647_s21 }
0x23c4   :  { %2294 = vrot.lane.b32.xlu1 %v2292_v26, %s3647_s21 }
0x2435   :  { %v2284_v13 = vpop.permute.xlu0 %2283 }
0x2436   :  { %v2286_v31 = vadd.f32 %v2284_v13, %v2276_v28  ;;  %v2295_v61 = vpop.permute.xlu1 %2294 }
0x2437   :  { %v2297_v33 = vadd.f32 %v2295_v61, %v2287_v30 }
0x2438   :  { %3468 = vtanh.f32 %v2286_v31 }
0x2439   :  { %3470 = vtanh.f32 %v2297_v33 }
0x2442   :  { %v3469_v60 = vpop.eup %3468 }
0x2443   :  { %v3471_v63 = vpop.eup %3470  ;;  %2300 = vrot.lane.b32.xlu0 %v3469_v60, %s3646_s7 }
0x2444   :  { %2306 = vrot.lane.b32.xlu1 %v3471_v63, %s3646_s7 }
0x24b5   :  { %v2301_v34 = vpop.permute.xlu0 %2300 }
0x24b6   :  { %v2303_v36 = vmul.f32 %v3465_v20, %v2301_v34  ;;  %v2307_v44 = vpop.permute.xlu1 %2306 }
0x24b7   :  { %v2309_v37 = vmul.f32 %v3467_v23, %v2307_v44 }
0x24b8   :  { %2311 = vrot.lane.b32.xlu0 %v2303_v36, %s3647_s21 }
0x24b9   :  { %2315 = vrot.lane.b32.xlu1 %v2309_v37, %s3646_s7 }
0x252a   :  { %v2312_v39 = vpop.permute.xlu0 %2311 }
0x252b   :  { %2319 = vst.msk [vmem:[#allocation4 + $0x8] sm:$0x3] %vm490_vm2, %v2312_v39  ;;  %v2316_v40 = vpop.permute.xlu1 %2315 }
0x252c   :  { %v2318_v42 = vsel %vm223_vm1, %v2312_v39, %v2316_v40  ;;  %2320 = vst.msk [vmem:[#allocation4 + $0x6] sm:$0x3] %vm492_vm3, %v2316_v40 }
0x252d   :  { %2900 = vmatmul.mubr.msk.f32.vlgmr.msra.gmra.mrb[18].mxu0 %vm351_vm4, %v2318_v42 }
0x252e   :  { %3223 = vmatpush1.bf16.msra.mxu0 %v4039_v47  ;;  %2674 = vmatprep.mubr.f32.mxu0 %v3645_v21 }
0x252f   :  { %3225 = vmatprep.subr.bf16.mxu0 %v4043_v50 }
0x2532   :  { %3227 = vmatpush1.bf16.msra.mxu0 %v4045_v52 }
0x2533   :  { %3229 = vmatprep.subr.bf16.mxu0 %v4049_v56 }
0x2536   :  { %3231 = vmatpush1.bf16.msra.mxu0 %v4053_v0 }
0x2537   :  { %3233 = vmatprep.subr.bf16.mxu0 %v4060_v7 }
0x253a   :  { %3235 = vmatpush1.bf16.msra.mxu0 %v4062_v2 }
0x2600   :  { %v2390_v46 = vpop.f32.mrb[18].mxu0 }
0x2601   :  { %v2399_v47 = vadd.f32 %v2397_v17, %v2390_v46  ;;  %v2392_v29 = vpop.f32.mrb[19].mxu0 }
0x2602   :  { %v2404_v21 = vadd.f32 %v2402_v27, %v2392_v29 }
0x2603   :  { %3472 = vtanh.f32 %v2399_v47  ;;  %v2901_v56 = vmul.f32 -1.442695, %v2399_v47 }
0x2604   :  { %3474 = vtanh.f32 %v2404_v21  ;;  %v2902_v0 = vmul.f32 -1.442695, %v2404_v21 }
0x2605   :  { %3476 = vpow2.f32 %v2901_v56  ;;  %v2681_v56 = vld [vmem:[#allocation5 + $0x10] sm:$0xc0] }
0x2606   :  { %3478 = vpow2.f32 %v2902_v0  ;;  %v2683_v0 = vrot.slane %v2681_v56, 6 }
0x260d   :  { %v3473_v50 = vpop.eup %3472 }
0x260e   :  { %v3475_v52 = vpop.eup %3474  ;;  %2421 = vrot.lane.b32.xlu0 %v3473_v50, %s3646_s7 }
0x260f   :  { %2432 = vrot.lane.b32.xlu1 %v3475_v52, %s3646_s7  ;;  %v3477_v7 = vpop.eup %3476 }
0x2610   :  { %v3479_v2 = vpop.eup %3478  ;;  %v2408_v32 = vadd.f32 1.0, %v3477_v7 }
0x2611   :  { %v2414_v35 = vadd.f32 1.0, %v3479_v2 }
0x2612   :  { %3480 = vrcp.f32 %v2408_v32 }
0x2613   :  { %3482 = vrcp.f32 %v2414_v35  ;;  %v2686_v35 = vld [vmem:[#allocation5 + $0x8] sm:$0x3] }
0x261c   :  { %v3481_v38 = vpop.eup %3480 }
0x261d   :  { %v3483_v48 = vpop.eup %3482  ;;  %v2419_v54 = vmul.f32 %v3481_v38, %v2286_v31 }
0x261e   :  { %v2430_v57 = vmul.f32 %v3483_v48, %v2297_v33 }
0x2680   :  { %v2422_v41 = vpop.permute.xlu0 %2421 }
0x2681   :  { %v2424_v49 = vmul.f32 %v3481_v38, %v2422_v41  ;;  %v2433_v51 = vpop.permute.xlu1 %2432 }
0x2682   :  { %v2435_v53 = vmul.f32 %v3483_v48, %v2433_v51 }
0x2683   :  { %2426 = vrot.lane.b32.xlu0 %v2424_v49, %s3647_s21 }
0x2684   :  { %2437 = vrot.lane.b32.xlu1 %v2435_v53, %s3647_s21 }
0x26f5   :  { %v2427_v55 = vpop.permute.xlu0 %2426 }
0x26f6   :  { %v2429_v58 = vadd.f32 %v2427_v55, %v2419_v54  ;;  %v2438_v59 = vpop.permute.xlu1 %2437 }
0x26f7   :  { %v2440_v62 = vadd.f32 %v2438_v59, %v2430_v57 }
0x26f8   :  { %3484 = vtanh.f32 %v2429_v58 }
0x26f9   :  { %3486 = vtanh.f32 %v2440_v62 }
0x2702   :  { %v3485_v1 = vpop.eup %3484 }
0x2703   :  { %v3487_v3 = vpop.eup %3486  ;;  %2443 = vrot.lane.b32.xlu0 %v3485_v1, %s3646_s7 }
0x2704   :  { %2449 = vrot.lane.b32.xlu1 %v3487_v3, %s3646_s7 }
0x2775   :  { %v2444_v5 = vpop.permute.xlu0 %2443 }
0x2776   :  { %v2446_v6 = vmul.f32 %v3481_v38, %v2444_v5  ;;  %v2450_v8 = vpop.permute.xlu1 %2449 }
0x2777   :  { %v2452_v4 = vmul.f32 %v3483_v48, %v2450_v8 }
0x2778   :  { %2454 = vrot.lane.b32.xlu0 %v2446_v6, %s3647_s21 }
0x2779   :  { %2458 = vrot.lane.b32.xlu1 %v2452_v4, %s3646_s7 }
0x27ea   :  { %v2455_v9 = vpop.permute.xlu0 %2454 }
0x27eb   :  { %2462 = vst.msk [vmem:[#allocation4 + $0xa] sm:$0x3] %vm490_vm2, %v2455_v9  ;;  %v2459_v10 = vpop.permute.xlu1 %2458 }
0x27ec   :  { %v2461_v11 = vsel %vm223_vm1, %v2455_v9, %v2459_v10  ;;  %2463 = vst.msk [vmem:[#allocation4 + $0x4] sm:$0x3] %vm492_vm3, %v2459_v10 }
0x27ed   :  { %2903 = vmatmul.mubr.msk.f32.vlgmr.msra.gmra.mrb[18].mxu1 %vm351_vm4, %v2461_v11 }
0x28c0   :  { %v2533_v16 = vpop.f32.mrb[18].mxu1 }
0x28c1   :  { %v2542_v19 = vadd.f32 %v2540_v15, %v2533_v16  ;;  %v2535_v20 = vpop.f32.mrb[19].mxu1  ;;  %v2750_v15 = vld [vmem:[%s4285_s11 + $0x10] sm:$0xff]  ;;  %v3236_v16 = vpack.c.bf16 %v2749_v14, %v2748_v12 }
0x28c2   :  { %v2547_v22 = vadd.f32 %v2545_v18, %v2535_v20  ;;  %v2751_v18 = vld [vmem:[%s4285_s11 + $0x18] sm:$0xff] }
0x28c3   :  { %3488 = vtanh.f32 %v2542_v19  ;;  %v2904_v25 = vmul.f32 -1.442695, %v2542_v19  ;;  %v3240_v19 = vpack.c.bf16 %v2751_v18, %v2750_v15  ;;  %3237 = vmatprep.subr.bf16.mxu1 %v3236_v16 }
0x28c4   :  { %3490 = vtanh.f32 %v2547_v22  ;;  %v2905_v26 = vmul.f32 -1.442695, %v2547_v22  ;;  %3239 = vmatpush3.bf16.msra.mxu1 %v3236_v16 }
0x28c5   :  { %3492 = vpow2.f32 %v2904_v25  ;;  %3241 = vmatprep.subr.bf16.mxu1 %v3240_v19  ;;  %v2754_v25 = vld [vmem:[%s4285_s11 + $0x30] sm:$0xff] }
0x28c6   :  { %3494 = vpow2.f32 %v2905_v26 }
0x28c8   :  { %3243 = vmatpush3.bf16.msra.mxu1 %v3240_v19 }
0x28cd   :  { %v3489_v23 = vpop.eup %3488 }
0x28ce   :  { %v3491_v24 = vpop.eup %3490  ;;  %2564 = vrot.lane.b32.xlu0 %v3489_v23, %s3646_s7  ;;  %v2752_v23 = vld [vmem:[%s4285_s11 + $0x20] sm:$0xff] }
0x28cf   :  { %2575 = vrot.lane.b32.xlu1 %v3491_v24, %s3646_s7  ;;  %v3493_v28 = vpop.eup %3492  ;;  %v2753_v24 = vld [vmem:[%s4285_s11 + $0x28] sm:$0xff] }
0x28d0   :  { %v3495_v13 = vpop.eup %3494  ;;  %v2551_v30 = vadd.f32 1.0, %v3493_v28  ;;  %v3244_v26 = vpack.c.bf16 %v2753_v24, %v2752_v23  ;;  %v2755_v28 = vld [vmem:[%s4285_s11 + $0x38] sm:$0xff] }
0x28d1   :  { %v2557_v31 = vadd.f32 1.0, %v3495_v13  ;;  %v3248_v13 = vpack.c.bf16 %v2755_v28, %v2754_v25 }
0x28d2   :  { %3496 = vrcp.f32 %v2551_v30  ;;  %3245 = vmatprep.subr.bf16.mxu1 %v3244_v26 }
0x28d3   :  { %3498 = vrcp.f32 %v2557_v31  ;;  %3247 = vmatpush3.bf16.msra.mxu1 %v3244_v26 }
0x28d4   :  { %3249 = vmatprep.subr.bf16.mxu1 %v3248_v13 }
0x28d7   :  { %3251 = vmatpush3.bf16.msra.mxu1 %v3248_v13 }
0x28dc   :  { %v3497_v61 = vpop.eup %3496 }
0x28dd   :  { %v3499_v60 = vpop.eup %3498  ;;  %v2562_v44 = vmul.f32 %v3497_v61, %v2429_v58 }
0x28de   :  { %v2573_v39 = vmul.f32 %v3499_v60, %v2440_v62 }
0x2940   :  { %v2565_v33 = vpop.permute.xlu0 %2564 }
0x2941   :  { %v2567_v63 = vmul.f32 %v3497_v61, %v2565_v33  ;;  %v2576_v34 = vpop.permute.xlu1 %2575 }
0x2942   :  { %v2578_v36 = vmul.f32 %v3499_v60, %v2576_v34 }
0x2943   :  { %2569 = vrot.lane.b32.xlu0 %v2567_v63, %s3647_s21 }
0x2944   :  { %2580 = vrot.lane.b32.xlu1 %v2578_v36, %s3647_s21 }
0x29b5   :  { %v2570_v37 = vpop.permute.xlu0 %2569 }
0x29b6   :  { %v2572_v40 = vadd.f32 %v2570_v37, %v2562_v44  ;;  %v2581_v42 = vpop.permute.xlu1 %2580  ;;  %v2909_v44 = vld [vmem:[%s4286_s12] ss:$0 sm:$0xff] }
0x29b7   :  { %v2583_v43 = vadd.f32 %v2581_v42, %v2573_v39 }
0x29b8   :  { %3500 = vtanh.f32 %v2572_v40 }
0x29b9   :  { %3502 = vtanh.f32 %v2583_v43 }
0x29c2   :  { %v3501_v45 = vpop.eup %3500 }
0x29c3   :  { %v3503_v17 = vpop.eup %3502  ;;  %2586 = vrot.lane.b32.xlu0 %v3501_v45, %s3646_s7 }
0x29c4   :  { %2592 = vrot.lane.b32.xlu1 %v3503_v17, %s3646_s7 }
0x2a35   :  { %v2587_v46 = vpop.permute.xlu0 %2586 }
0x2a36   :  { %v2589_v27 = vmul.f32 %v3497_v61, %v2587_v46  ;;  %v2593_v47 = vpop.permute.xlu1 %2592 }
0x2a37   :  { %v2595_v29 = vmul.f32 %v3499_v60, %v2593_v47 }
0x2a38   :  { %2597 = vrot.lane.b32.xlu0 %v2589_v27, %s3647_s21 }
0x2a39   :  { %2601 = vrot.lane.b32.xlu1 %v2595_v29, %s3646_s7 }
0x2aaa   :  { %v2598_v21 = vpop.permute.xlu0 %2597 }
0x2aab   :  { %2605 = vst.msk [vmem:[#allocation4 + $0xc] sm:$0x3] %vm490_vm2, %v2598_v21  ;;  %v2602_v50 = vpop.permute.xlu1 %2601 }
0x2aac   :  { %v2604_v52 = vsel %vm223_vm1, %v2598_v21, %v2602_v50  ;;  %2606 = vst.msk [vmem:[#allocation4 + $0x2] sm:$0x3] %vm492_vm3, %v2602_v50 }
0x2aad   :  { %2906 = vmatmul.mubr.msk.f32.vlgmr.msra.gmra.mrb[20].mxu0 %vm351_vm4, %v2604_v52 }
0x2b80   :  { %v2676_v7 = vpop.f32.mrb[20].mxu0 }
0x2b81   :  { %v2685_v2 = vadd.f32 %v2683_v0, %v2676_v7  ;;  %v2678_v32 = vpop.f32.mrb[21].mxu0 }
0x2b82   :  { %v2687_v38 = vadd.f32 %v2686_v35, %v2678_v32 }
0x2b83   :  { %3504 = vtanh.f32 %v2685_v2  ;;  %v2907_v49 = vmul.f32 -1.442695, %v2685_v2 }
0x2b84   :  { %3506 = vtanh.f32 %v2687_v38  ;;  %v2908_v51 = vmul.f32 -1.442695, %v2687_v38 }
0x2b85   :  { %3508 = vpow2.f32 %v2907_v49 }
0x2b86   :  { %3510 = vpow2.f32 %v2908_v51 }
0x2b8d   :  { %v3505_v41 = vpop.eup %3504 }
0x2b8e   :  { %v3507_v48 = vpop.eup %3506  ;;  %2704 = vrot.lane.b32.xlu1 %v3505_v41, %s3646_s7 }
0x2b8f   :  { %2715 = vrot.lane.b32.xlu0 %v3507_v48, %s3646_s7  ;;  %v3509_v53 = vpop.eup %3508 }
0x2b90   :  { %v3511_v54 = vpop.eup %3510  ;;  %v2691_v55 = vadd.f32 1.0, %v3509_v53 }
0x2b91   :  { %v2697_v57 = vadd.f32 1.0, %v3511_v54 }
0x2b92   :  { %3512 = vrcp.f32 %v2691_v55 }
0x2b93   :  { %3514 = vrcp.f32 %v2697_v57 }
0x2b9c   :  { %v3513_v58 = vpop.eup %3512 }
0x2b9d   :  { %v3515_v62 = vpop.eup %3514  ;;  %v2702_v6 = vmul.f32 %v3513_v58, %v2572_v40 }
0x2b9e   :  { %v2713_v4 = vmul.f32 %v3515_v62, %v2583_v43 }
0x2c00   :  { %v2705_v59 = vpop.permute.xlu1 %2704 }
0x2c01   :  { %v2707_v1 = vmul.f32 %v3513_v58, %v2705_v59  ;;  %v2716_v3 = vpop.permute.xlu0 %2715 }
0x2c02   :  { %v2718_v5 = vmul.f32 %v3515_v62, %v2716_v3 }
0x2c03   :  { %2709 = vrot.lane.b32.xlu1 %v2707_v1, %s3647_s21 }
0x2c04   :  { %2720 = vrot.lane.b32.xlu0 %v2718_v5, %s3647_s21 }
0x2c75   :  { %v2710_v8 = vpop.permute.xlu1 %2709 }
0x2c76   :  { %v2712_v9 = vadd.f32 %v2710_v8, %v2702_v6  ;;  %v2721_v10 = vpop.permute.xlu0 %2720 }
0x2c77   :  { %v2723_v11 = vadd.f32 %v2721_v10, %v2713_v4 }
0x2c78   :  { %3516 = vtanh.f32 %v2712_v9 }
0x2c79   :  { %3518 = vtanh.f32 %v2723_v11 }
0x2c82   :  { %v3517_v20 = vpop.eup %3516 }
0x2c83   :  { %v3519_v22 = vpop.eup %3518  ;;  %2726 = vrot.lane.b32.xlu1 %v3517_v20, %s3646_s7 }
0x2c84   :  { %2732 = vrot.lane.b32.xlu0 %v3519_v22, %s3646_s7 }
0x2cf5   :  { %v2727_v30 = vpop.permute.xlu1 %2726 }
0x2cf6   :  { %v2729_v31 = vmul.f32 %v3513_v58, %v2727_v30  ;;  %v2733_v61 = vpop.permute.xlu0 %2732 }
0x2cf7   :  { %v2735_v33 = vmul.f32 %v3515_v62, %v2733_v61 }
0x2cf8   :  { %2737 = vrot.lane.b32.xlu1 %v2729_v31, %s3647_s21 }
0x2cf9   :  { %2742 = vrot.lane.b32.xlu0 %v2735_v33, %s3646_s7 }
0x2d6a   :  { %v2738_v60 = vpop.permute.xlu1 %2737 }
0x2d6b   :  { %2740 = vst.msk [vmem:[#allocation4 + $0xe] sm:$0x3] %vm490_vm2, %v2738_v60  ;;  %v2743_v63 = vpop.permute.xlu0 %2742 }
0x2d6c   :  { %2745 = vst.msk [vmem:[#allocation4] sm:$0x3] %vm492_vm3, %v2743_v63 }
0x2d72   :  { %v2747_v36 = vld [vmem:[#allocation4 + $0x8] sm:$0xff] }
0x2d73   :  { %v2746_v34 = vld [vmem:[#allocation4] sm:$0xff] }
0x2d74   :  { %2949 = vmatprep.mubr.msk.f32.mxu1 %vm351_vm4, %v2746_v34 }
0x2d75   :  { %2950 = vmatmul.mubr.msk.f32.vlgmr.msra.gmra.mrb[20].mxu1 %vm351_vm4, %v2747_v36 }
0x2e48   :  { %v2951_v37 = vpop.f32.mrb[20].mxu1 }
0x2e49   :  { %v2841_v39 = vadd.f32 %v2951_v37, %v2909_v44  ;;  %v2835_v40 = vpop.f32.mrb[21].mxu1 }
0x2e4a   :  { %v2836_v42 = vadd.f32 %v2909_v44, %v2835_v40 }
0x2e4b   :  { %2846 = vst.msk [vmem:[%s4287_s13 + $0x8] sm:$0xff] %vm2844_vm5, %v2841_v39 }
0x2e4c   :  { %2845 = vst.msk [vmem:[%s4287_s13] sm:$0xff] %vm2844_vm5, %v2836_v42 }
0x2e4d   :  { %2851 = vsyncpa [#allocation7], 1 }
0x2e4e   :  { %2852 = vsyncpa [#allocation9], 1 }
0x2e4f   :  { %2853 = vsyncpa [#allocation12], 1 }

</bundles_post_ra>
